<compile_context>
chip_gen: v7x
topology: tpu7x:2x2x1
jax: 0.10.0
libtpu: 0.0.40
codegen_flags: <defaults>
</compile_context>

<pallas_src>
import jax
import jax.numpy as jnp
from jax import lax
from jax.experimental import pallas as pl
from jax.experimental.pallas import tpu as pltpu

LANE = 128


# ----------------------------------------------------------------------------
# small helpers: padding, VMEM budget, byte-budgeted divisor tiling
# ----------------------------------------------------------------------------
def _round_up(x, m):
    return ((x + m - 1) // m) * m


def _vmem_limit_bytes():
    cap = 64 * 1024 * 1024
    try:
        cap = getattr(pltpu.get_tpu_info(), "vmem_capacity_bytes", cap)
    except Exception:  # pragma: no cover - e.g. interpret mode / old jax
        pass
    # 3/4 of physical: ~48 MiB on v7x (64 MiB parts), 96 MiB on v5e/v6e.
    return int(min(96 * 1024 * 1024, cap * 3 // 4))


def _compiler_params():
    return pltpu.CompilerParams(
        dimension_semantics=("parallel",),
        vmem_limit_bytes=_vmem_limit_bytes(),
    )


def _divisors(n):
    return [d for d in range(1, n + 1) if n % d == 0]


def _pick_row_tile(m, bytes_per_row, *, budget_bytes=8 << 20, min_grid=2):
    """Largest divisor of m that (a) keeps the sublane dim 8-aligned (or full),
    (b) fits the per-step byte budget, (c) leaves >= min_grid grid steps so
    both v7x TensorCores get work.  Constraints relaxed in that order."""
    divs = [d for d in _divisors(m) if d % 8 == 0 or d == m]
    target = max(1, budget_bytes // max(bytes_per_row, 1))
    for need_grid, need_budget in ((True, True), (False, True),
                                   (True, False), (False, False)):
        cands = [d for d in divs
                 if (not need_budget or d <= target)
                 and (not need_grid or m // d >= min_grid)]
        if cands:
            return max(cands)
    return m


def _pick_image_tile(n, hw, per_image_bytes, *, budget_bytes=16 << 20, min_grid=2):
    """Images per conv2 grid step (tile rows must stay 8-aligned)."""
    divs = _divisors(n)
    target = max(1, budget_bytes // max(per_image_bytes, 1))
    for need_grid, need_budget in ((True, True), (False, True),
                                   (True, False), (False, False)):
        cands = [d for d in divs
                 if ((d * hw) % 8 == 0 or d == n)
                 and (not need_budget or d <= target)
                 and (not need_grid or n // d >= min_grid)]
        if cands:
            return max(cands)
    return n


# ----------------------------------------------------------------------------
# in-kernel BN partials: per-tile mean and centered M2 (Welford partials)
# ----------------------------------------------------------------------------
def _emit_tile_stats(y, mean_ref, m2_ref):
    rows, c = y.shape
    mean = jnp.sum(y, axis=0, keepdims=True) * (1.0 / rows)
    m2 = jnp.sum((y - mean) ** 2, axis=0, keepdims=True)
    mean_ref[...] = mean.reshape(1, 1, c)
    m2_ref[...] = m2.reshape(1, 1, c)


# ----------------------------------------------------------------------------
# kernels
# ----------------------------------------------------------------------------
def _conv1x1_stats_kernel(x_ref, w_ref, y_ref, mean_ref, m2_ref):
    """y = x @ w (bf16 MXU inputs, f32 acc) + per-tile BN partials."""
    x = x_ref[...].astype(jnp.bfloat16)
    y = jnp.dot(x, w_ref[...], preferred_element_type=jnp.float32)
    y_ref[...] = y.astype(y_ref.dtype)
    _emit_tile_stats(y, mean_ref, m2_ref)


def _bnrelu_conv1x1_stats_kernel(x_ref, sc_ref, sh_ref, w_ref,
                                 y_ref, mean_ref, m2_ref):
    """a = relu(x*scale + shift); y = a @ w; per-tile BN partials of y."""
    a = jnp.maximum(x_ref[...].astype(jnp.float32) * sc_ref[...] + sh_ref[...], 0.0)
    y = jnp.dot(a.astype(jnp.bfloat16), w_ref[...],
                preferred_element_type=jnp.float32)
    y_ref[...] = y.astype(y_ref.dtype)
    _emit_tile_stats(y, mean_ref, m2_ref)


def _conv3x3_fused_kernel(y1_ref, sc_ref, sh_ref, w_ref,
                          y2_ref, mean_ref, m2_ref, a_scr, k_scr):
    """bn1+relu fused, 3x3 conv (stride 1, pad 1) as ONE stacked-K matmul.

    y1_ref: [BT, H, W, Cp]   raw conv1 output (bf16)
    sc/sh : [1, Cp]          bn1 scale / shift (f32)
    w_ref : [9*Cp, Cop]      taps, (dy, dx) row-major then input channel (bf16)
    y2_ref: [BT*H*W, Cop]    raw conv2 output (bf16)
    a_scr : [BT, H, W, Cp]   bn1+relu activations (bf16, VMEM)
    k_scr : [BT, H, W, 9*Cp] lane-stacked shifted taps (bf16, VMEM)
    """
    bt, h, w, cp = a_scr.shape
    cop = y2_ref.shape[-1]
    rows = bt * h * w

    # bn1 + relu on the tile (f32 math, bf16 for the MXU)
    a = jnp.maximum(y1_ref[...].astype(jnp.float32) * sc_ref[...] + sh_ref[...], 0.0)
    a_scr[...] = a.astype(jnp.bfloat16)

    # Scatter the 9 shifted taps into lane-blocks of k_scr.  Image-border
    # padding comes from explicitly zeroed strips (written every step, so the
    # kernel carries no cross-iteration scratch state -> megacore safe).
    for dy in range(3):
        for dx in range(3):
            t = 3 * dy + dx
            oy, ox = dy - 1, dx - 1
            if oy == -1:
                k_scr[:, 0:1, :, t * cp:(t + 1) * cp] = \
                    jnp.zeros((bt, 1, w, cp), jnp.bfloat16)
            if oy == 1:
                k_scr[:, h - 1:h, :, t * cp:(t + 1) * cp] = \
                    jnp.zeros((bt, 1, w, cp), jnp.bfloat16)
            if ox == -1:
                k_scr[:, :, 0:1, t * cp:(t + 1) * cp] = \
                    jnp.zeros((bt, h, 1, cp), jnp.bfloat16)
            if ox == 1:
                k_scr[:, :, w - 1:w, t * cp:(t + 1) * cp] = \
                    jnp.zeros((bt, h, 1, cp), jnp.bfloat16)
            yd0, yd1 = max(0, -oy), h - max(0, oy)
            xd0, xd1 = max(0, -ox), w - max(0, ox)
            ys0, ys1 = max(0, oy), h - max(0, -oy)
            xs0, xs1 = max(0, ox), w - max(0, -ox)
            k_scr[:, yd0:yd1, xd0:xd1, t * cp:(t + 1) * cp] = \
                a_scr[:, ys0:ys1, xs0:xs1, :]

    # one MXU matmul, K = 9*Cp
    kmat = k_scr[...].reshape(rows, 9 * cp)
    y = jnp.dot(kmat, w_ref[...], preferred_element_type=jnp.float32)
    y2_ref[...] = y.astype(y2_ref.dtype)
    _emit_tile_stats(y, mean_ref, m2_ref)


def _bn_residual_relu_kernel(y3_ref, sc_ref, sh_ref, res_ref, o_ref):
    """out = relu(y3*scale + shift + residual)."""
    o_ref[...] = jnp.maximum(
        y3_ref[...] * sc_ref[...] + sh_ref[...] + res_ref[...], 0.0
    ).astype(o_ref.dtype)


# ----------------------------------------------------------------------------
# pallas_call wrappers
# ----------------------------------------------------------------------------
def _stats_shapes(g, c):
    return (jax.ShapeDtypeStruct((g, 1, c), jnp.float32),
            jax.ShapeDtypeStruct((g, 1, c), jnp.float32))


def _stats_specs():
    return (pl.BlockSpec((1, 1, None), None),)  # unused placeholder


def _conv1x1_stats(x2d, w, out_dtype):
    m, cin = x2d.shape
    cout = w.shape[1]
    bpr = 2 * (x2d.dtype.itemsize * cin + jnp.dtype(out_dtype).itemsize * cout)
    tm = _pick_row_tile(m, bpr)
    g = m // tm
    y, mean, m2 = pl.pallas_call(
        _conv1x1_stats_kernel,
        out_shape=(jax.ShapeDtypeStruct((m, cout), out_dtype),) + _stats_shapes(g, cout),
        grid=(g,),
        in_specs=[pl.BlockSpec((tm, cin), lambda i: (i, 0)),
                  pl.BlockSpec((cin, cout), lambda i: (0, 0))],
        out_specs=(pl.BlockSpec((tm, cout), lambda i: (i, 0)),
                   pl.BlockSpec((1, 1, cout), lambda i: (i, 0, 0)),
                   pl.BlockSpec((1, 1, cout), lambda i: (i, 0, 0))),
        compiler_params=_compiler_params(),
    )(x2d, w)
    return y, mean.reshape(g, cout), m2.reshape(g, cout)


def _bnrelu_conv1x1_stats(x2d, sc, sh, w, out_dtype):
    m, cin = x2d.shape
    cout = w.shape[1]
    bpr = 2 * (x2d.dtype.itemsize * cin + jnp.dtype(out_dtype).itemsize * cout)
    tm = _pick_row_tile(m, bpr)
    g = m // tm
    y, mean, m2 = pl.pallas_call(
        _bnrelu_conv1x1_stats_kernel,
        out_shape=(jax.ShapeDtypeStruct((m, cout), out_dtype),) + _stats_shapes(g, cout),
        grid=(g,),
        in_specs=[pl.BlockSpec((tm, cin), lambda i: (i, 0)),
                  pl.BlockSpec((1, cin), lambda i: (0, 0)),
                  pl.BlockSpec((1, cin), lambda i: (0, 0)),
                  pl.BlockSpec((cin, cout), lambda i: (0, 0))],
        out_specs=(pl.BlockSpec((tm, cout), lambda i: (i, 0)),
                   pl.BlockSpec((1, 1, cout), lambda i: (i, 0, 0)),
                   pl.BlockSpec((1, 1, cout), lambda i: (i, 0, 0))),
        compiler_params=_compiler_params(),
    )(x2d, sc.reshape(1, cin), sh.reshape(1, cin), w)
    return y, mean.reshape(g, cout), m2.reshape(g, cout)


def _conv3x3_fused(y1_nhwc, sc, sh, w_taps, out_dtype):
    n, h, w, cp = y1_nhwc.shape
    cop = w_taps.shape[-1]
    # per-image bytes: y1 in (bf16, x2 buffers) + y2 out (x2) + a_scr + k_scr
    per_img = h * w * (2 * 2 * cp + 2 * 2 * cop + 2 * cp + 2 * 9 * cp)
    bt = _pick_image_tile(n, h * w, per_img)
    g = n // bt
    rows = bt * h * w
    m = n * h * w
    y2, mean, m2 = pl.pallas_call(
        _conv3x3_fused_kernel,
        out_shape=(jax.ShapeDtypeStruct((m, cop), out_dtype),) + _stats_shapes(g, cop),
        grid=(g,),
        in_specs=[pl.BlockSpec((bt, h, w, cp), lambda i: (i, 0, 0, 0)),
                  pl.BlockSpec((1, cp), lambda i: (0, 0)),
                  pl.BlockSpec((1, cp), lambda i: (0, 0)),
                  pl.BlockSpec((9 * cp, cop), lambda i: (0, 0))],
        out_specs=(pl.BlockSpec((rows, cop), lambda i: (i, 0)),
                   pl.BlockSpec((1, 1, cop), lambda i: (i, 0, 0)),
                   pl.BlockSpec((1, 1, cop), lambda i: (i, 0, 0))),
        scratch_shapes=[pltpu.VMEM((bt, h, w, cp), jnp.bfloat16),
                        pltpu.VMEM((bt, h, w, 9 * cp), jnp.bfloat16)],
        compiler_params=_compiler_params(),
    )(y1_nhwc, sc.reshape(1, cp), sh.reshape(1, cp), w_taps)
    return y2, mean.reshape(g, cop), m2.reshape(g, cop)


def _bn_residual_relu(y3, sc, sh, res):
    m, c = y3.shape
    bpr = 2 * (y3.dtype.itemsize * c + res.dtype.itemsize * c + 4 * c)
    tm = _pick_row_tile(m, bpr)
    g = m // tm
    return pl.pallas_call(
        _bn_residual_relu_kernel,
        out_shape=jax.ShapeDtypeStruct((m, c), jnp.float32),
        grid=(g,),
        in_specs=[pl.BlockSpec((tm, c), lambda i: (i, 0)),
                  pl.BlockSpec((1, c), lambda i: (0, 0)),
                  pl.BlockSpec((1, c), lambda i: (0, 0)),
                  pl.BlockSpec((tm, c), lambda i: (i, 0))],
        out_specs=pl.BlockSpec((tm, c), lambda i: (i, 0)),
        compiler_params=_compiler_params(),
    )(y3, sc.reshape(1, c), sh.reshape(1, c), res)


# ----------------------------------------------------------------------------
# JAX glue: BN finalize (tiny [C]-sized math, parallel-Welford combine)
# ----------------------------------------------------------------------------
def _bn_scale_shift(mean_t, m2_t, rows_per_tile, gamma, beta, eps):
    g = mean_t.shape[0]
    total = g * rows_per_tile
    mean = jnp.mean(mean_t, axis=0)                           # equal tile counts
    m2 = jnp.sum(m2_t, axis=0) + rows_per_tile * jnp.sum(
        (mean_t - mean[None, :]) ** 2, axis=0)
    var = m2 / total                                          # biased (train mode)
    scale = gamma * lax.rsqrt(var + eps)
    shift = beta - mean * scale
    return scale, shift


def bottleneck_forward(x_nchw, params, eps=1e-5):
    n, cin, h, w = x_nchw.shape
    m = n * h * w
    width = params["conv1_w"].shape[0]
    outc = params["conv3_w"].shape[0]
    if cin != outc:
        raise ValueError("identity residual requires inplanes == planes*4 "
                         "(stride=1, downsample=None)")

    cinp = _round_up(cin, LANE)
    wdp = _round_up(width, LANE)
    outp = _round_up(outc, LANE)

    # TODO(synk): accept NHWC to avoid this full-HBM transpose pass.
    x2d = jnp.transpose(x_nchw, (0, 2, 3, 1)).reshape(m, cin)
    xpad = jnp.pad(x2d, ((0, 0), (0, cinp - cin)))            # f32 [M, Cinp]

    # lane-padded bf16 weights for the MXU
    w1 = jnp.pad(jnp.transpose(params["conv1_w"][:, :, 0, 0], (1, 0)),
                 ((0, cinp - cin), (0, wdp - width))).astype(jnp.bfloat16)
    w2 = jnp.pad(jnp.transpose(params["conv2_w"], (2, 3, 1, 0)),
                 ((0, 0), (0, 0), (0, wdp - width), (0, wdp - width))
                 ).reshape(9 * wdp, wdp).astype(jnp.bfloat16)
    w3 = jnp.pad(jnp.transpose(params["conv3_w"][:, :, 0, 0], (1, 0)),
                 ((0, wdp - width), (0, outp - outc))).astype(jnp.bfloat16)

    def padc(v, cp):
        return jnp.pad(v, (0, cp - v.shape[0]))

    # conv1 (1x1) + per-tile BN partials
    y1, mu1, m21 = _conv1x1_stats(xpad, w1, jnp.bfloat16)
    sc1, sh1 = _bn_scale_shift(mu1, m21, m // mu1.shape[0],
                               padc(params["bn1_g"], wdp),
                               padc(params["bn1_b"], wdp), eps)

    # conv2 (3x3, stride 1, pad 1): bn1+relu+zero-pad fused, stacked-K matmul
    y2, mu2, m22 = _conv3x3_fused(y1.reshape(n, h, w, wdp), sc1, sh1,
                                  w2, jnp.bfloat16)
    sc2, sh2 = _bn_scale_shift(mu2, m22, m // mu2.shape[0],
                               padc(params["bn2_g"], wdp),
                               padc(params["bn2_b"], wdp), eps)

    # conv3 (1x1) with bn2+relu fused in
    y3, mu3, m23 = _bnrelu_conv1x1_stats(y2, sc2, sh2, w3, jnp.float32)
    sc3, sh3 = _bn_scale_shift(mu3, m23, m // mu3.shape[0],
                               padc(params["bn3_g"], outp),
                               padc(params["bn3_b"], outp), eps)

    # bn3 + identity residual + relu  (cinp == outp since cin == outc)
    out = _bn_residual_relu(y3, sc3, sh3, xpad)

    out = out[:, :outc].reshape(n, h, w, outc)
    # TODO(synk): return NHWC to avoid this transpose pass.
    return jnp.transpose(out, (0, 3, 1, 2))


# ----------------------------------------------------------------------------
# Pure-JAX f32 reference (lax convs, NCHW, training-mode BN) for verification
# ----------------------------------------------------------------------------
def _bn_train_ref(y, g, b, eps):
    mn = jnp.mean(y, axis=(0, 2, 3), keepdims=True)
    v = jnp.mean((y - mn) ** 2, axis=(0, 2, 3), keepdims=True)
    return (y - mn) * lax.rsqrt(v + eps) * g.reshape(1, -1, 1, 1) + b.reshape(1, -1, 1, 1)


def bottleneck_ref(x, p, eps=1e-5):
    dn = ("NCHW", "OIHW", "NCHW")
    out = lax.conv_general_dilated(x, p["conv1_w"], (1, 1), "VALID", dimension_numbers=dn)
    out = jnp.maximum(_bn_train_ref(out, p["bn1_g"], p["bn1_b"], eps), 0.0)
    out = lax.conv_general_dilated(out, p["conv2_w"], (1, 1), ((1, 1), (1, 1)), dimension_numbers=dn)
    out = jnp.maximum(_bn_train_ref(out, p["bn2_g"], p["bn2_b"], eps), 0.0)
    out = lax.conv_general_dilated(out, p["conv3_w"], (1, 1), "VALID", dimension_numbers=dn)
    out = _bn_train_ref(out, p["bn3_g"], p["bn3_b"], eps)
    return jnp.maximum(out + x, 0.0)


# ----------------------------------------------------------------------------
if __name__ == "__main__":
    # Bottleneck(inplanes=16, planes=4): width=4, out_channels=16, stride=1,
    # downsample=None  ->  identity residual add is valid.
    N, INPLANES, H, W = 2, 16, 8, 8
    PLANES = 4
    WIDTH = PLANES            # base_width=64, groups=1
    OUTC = PLANES * 4

    key = jax.random.PRNGKey(0)
    ks = jax.random.split(key, 8)

    params = {
        "conv1_w": 0.1 * jax.random.normal(ks[0], (WIDTH, INPLANES, 1, 1), jnp.float32),
        "conv2_w": 0.1 * jax.random.normal(ks[1], (WIDTH, WIDTH, 3, 3), jnp.float32),
        "conv3_w": 0.1 * jax.random.normal(ks[2], (OUTC, WIDTH, 1, 1), jnp.float32),
        "bn1_g": 1.0 + 0.1 * jax.random.normal(ks[3], (WIDTH,), jnp.float32),
        "bn1_b": 0.1 * jax.random.normal(ks[4], (WIDTH,), jnp.float32),
        "bn2_g": 1.0 + 0.1 * jax.random.normal(ks[5], (WIDTH,), jnp.float32),
        "bn2_b": 0.1 * jax.random.normal(ks[6], (WIDTH,), jnp.float32),
        "bn3_g": jnp.ones((OUTC,), jnp.float32),
        "bn3_b": jnp.zeros((OUTC,), jnp.float32),
    }

    x = jax.random.normal(ks[7], (N, INPLANES, H, W), jnp.float32)

    fwd = jax.jit(bottleneck_forward)
    out = jax.block_until_ready(fwd(x, params))
    ref = jax.block_until_ready(bottleneck_ref(x, params))

    assert out.shape == (N, OUTC, H, W), out.shape
    # bf16 MXU inputs (f32 accumulation) -> loosened tolerance vs the f32 reference.
    err = float(jnp.max(jnp.abs(out - ref)))
    assert jnp.allclose(out, ref, rtol=5e-2, atol=5e-2), err

    print("KERNEL_OK")
</pallas_src>

<mosaic_0001>
module attributes {stable_mosaic.version = 11 : i64} {
  func.func @_conv1x1_stats_kernel(%arg0: i32, %arg1: memref<64x128xf32, #tpu.memory_space<vmem>>, %arg2: memref<128x128xbf16, #tpu.memory_space<vmem>>, %arg3: memref<64x128xbf16, #tpu.memory_space<vmem>>, %arg4: memref<1x1x128xf32, #tpu.memory_space<vmem>>, %arg5: memref<1x1x128xf32, #tpu.memory_space<vmem>>) attributes {dimension_semantics = [#tpu.dimension_semantics<parallel>], iteration_bounds = array<i64: 2>, scalar_prefetch = 0 : i64, scratch_operands = 0 : i64, tpu.core_type = #tpu.core_type<tc>, window_params = [{transform_indices = @transform_0, window_bounds = array<i64: 64, 128>}, {pipeline_mode = #tpu.pipeline_mode<synchronous>, transform_indices = @transform_1, window_bounds = array<i64: 128, 128>}, {transform_indices = @transform_2, window_bounds = array<i64: 64, 128>}, {transform_indices = @transform_3, window_bounds = array<i64: 1, 1, 128>}, {transform_indices = @transform_4, window_bounds = array<i64: 1, 1, 128>}]} {
    %c0 = arith.constant 0 : index
    %c0_0 = arith.constant 0 : index
    %0 = vector.load %arg1[%c0, %c0_0] : memref<64x128xf32, #tpu.memory_space<vmem>>, vector<64x128xf32>
    %1 = arith.truncf %0 : vector<64x128xf32> to vector<64x128xbf16>
    %c0_1 = arith.constant 0 : index
    %c0_2 = arith.constant 0 : index
    %2 = vector.load %arg2[%c0_1, %c0_2] : memref<128x128xbf16, #tpu.memory_space<vmem>>, vector<128x128xbf16>
    %cst = arith.constant dense<0.000000e+00> : vector<64x128xf32>
    %3 = tpu.matmul %1, %2, %cst {dimension_numbers = #tpu.dot_dimension_numbers<[1], [0], [0], [1], [0, 0, 1, 1], [], []>} : vector<64x128xbf16>, vector<128x128xbf16>, vector<64x128xf32> -> vector<64x128xf32>
    %4 = arith.truncf %3 : vector<64x128xf32> to vector<64x128xbf16>
    %c0_3 = arith.constant 0 : index
    %c0_4 = arith.constant 0 : index
    %5 = vector.load %arg3[%c0_3, %c0_4] : memref<64x128xbf16, #tpu.memory_space<vmem>>, vector<64x128xbf16>
    tpu.vector_store %arg3[%c0_3, %c0_4], %4 {strides = array<i32>} : memref<64x128xbf16, #tpu.memory_space<vmem>>, vector<64x128xbf16>,
    %cst_5 = arith.constant dense<0.000000e+00> : vector<128xf32>
    %6 = vector.multi_reduction <add>, %3, %cst_5 [0] : vector<64x128xf32> to vector<128xf32>
    %7 = vector.shape_cast %6 : vector<128xf32> to vector<1x128xf32>
    %cst_6 = arith.constant 1.562500e-02 : f32
    %8 = vector.broadcast %cst_6 : f32 to vector<1x128xf32>
    %9 = arith.mulf %7, %8 : vector<1x128xf32>
    %10 = vector.broadcast %9 : vector<1x128xf32> to vector<64x128xf32>
    %11 = arith.subf %3, %10 : vector<64x128xf32>
    %12 = arith.mulf %11, %11 : vector<64x128xf32>
    %cst_7 = arith.constant dense<0.000000e+00> : vector<128xf32>
    %13 = vector.multi_reduction <add>, %12, %cst_7 [0] : vector<64x128xf32> to vector<128xf32>
    %14 = vector.shape_cast %13 : vector<128xf32> to vector<1x128xf32>
    %15 = vector.shape_cast %9 : vector<1x128xf32> to vector<1x1x128xf32>
    %c0_8 = arith.constant 0 : index
    %c0_9 = arith.constant 0 : index
    %c0_10 = arith.constant 0 : index
    %16 = vector.load %arg4[%c0_8, %c0_9, %c0_10] : memref<1x1x128xf32, #tpu.memory_space<vmem>>, vector<1x1x128xf32>
    tpu.vector_store %arg4[%c0_8, %c0_9, %c0_10], %15 {strides = array<i32>} : memref<1x1x128xf32, #tpu.memory_space<vmem>>, vector<1x1x128xf32>,
    %17 = vector.shape_cast %14 : vector<1x128xf32> to vector<1x1x128xf32>
    %c0_11 = arith.constant 0 : index
    %c0_12 = arith.constant 0 : index
    %c0_13 = arith.constant 0 : index
    %18 = vector.load %arg5[%c0_11, %c0_12, %c0_13] : memref<1x1x128xf32, #tpu.memory_space<vmem>>, vector<1x1x128xf32>
    tpu.vector_store %arg5[%c0_11, %c0_12, %c0_13], %17 {strides = array<i32>} : memref<1x1x128xf32, #tpu.memory_space<vmem>>, vector<1x1x128xf32>,
    return
  }
  func.func @transform_0(%arg0: i32) -> (i32, i32) {
    %c0_i32 = arith.constant 0 : i32
    %c0_i32_0 = arith.constant 0 : i32
    return %arg0, %c0_i32 : i32, i32
  }
  func.func @transform_1(%arg0: i32) -> (i32, i32) {
    %c0_i32 = arith.constant 0 : i32
    %c0_i32_0 = arith.constant 0 : i32
    %c0_i32_1 = arith.constant 0 : i32
    return %c0_i32, %c0_i32_0 : i32, i32
  }
  func.func @transform_2(%arg0: i32) -> (i32, i32) {
    %c0_i32 = arith.constant 0 : i32
    %c0_i32_0 = arith.constant 0 : i32
    return %arg0, %c0_i32 : i32, i32
  }
  func.func @transform_3(%arg0: i32) -> (i32, i32, i32) {
    %c0_i32 = arith.constant 0 : i32
    %c0_i32_0 = arith.constant 0 : i32
    %c0_i32_1 = arith.constant 0 : i32
    return %arg0, %c0_i32, %c0_i32_0 : i32, i32, i32
  }
  func.func @transform_4(%arg0: i32) -> (i32, i32, i32) {
    %c0_i32 = arith.constant 0 : i32
    %c0_i32_0 = arith.constant 0 : i32
    %c0_i32_1 = arith.constant 0 : i32
    return %arg0, %c0_i32, %c0_i32_0 : i32, i32, i32
  }
}

module attributes {stable_mosaic.version = 11 : i64} {
  func.func @_conv3x3_fused_kernel(%arg0: i32, %arg1: memref<1x8x8x128xbf16, #tpu.memory_space<vmem>>, %arg2: memref<1x128xf32, #tpu.memory_space<vmem>>, %arg3: memref<1x128xf32, #tpu.memory_space<vmem>>, %arg4: memref<1152x128xbf16, #tpu.memory_space<vmem>>, %arg5: memref<64x128xbf16, #tpu.memory_space<vmem>>, %arg6: memref<1x1x128xf32, #tpu.memory_space<vmem>>, %arg7: memref<1x1x128xf32, #tpu.memory_space<vmem>>, %arg8: memref<1x8x8x128xbf16, #tpu.memory_space<vmem>>, %arg9: memref<1x8x8x1152xbf16, #tpu.memory_space<vmem>>) attributes {dimension_semantics = [#tpu.dimension_semantics<parallel>], iteration_bounds = array<i64: 2>, scalar_prefetch = 0 : i64, scratch_operands = 2 : i64, tpu.core_type = #tpu.core_type<tc>, window_params = [{transform_indices = @transform_0, window_bounds = array<i64: 1, 8, 8, 128>}, {pipeline_mode = #tpu.pipeline_mode<synchronous>, transform_indices = @transform_1, window_bounds = array<i64: 1, 128>}, {pipeline_mode = #tpu.pipeline_mode<synchronous>, transform_indices = @transform_2, window_bounds = array<i64: 1, 128>}, {pipeline_mode = #tpu.pipeline_mode<synchronous>, transform_indices = @transform_3, window_bounds = array<i64: 1152, 128>}, {transform_indices = @transform_4, window_bounds = array<i64: 64, 128>}, {transform_indices = @transform_5, window_bounds = array<i64: 1, 1, 128>}, {transform_indices = @transform_6, window_bounds = array<i64: 1, 1, 128>}]} {
    %c0 = arith.constant 0 : index
    %c0_0 = arith.constant 0 : index
    %c0_1 = arith.constant 0 : index
    %c0_2 = arith.constant 0 : index
    %0 = vector.load %arg1[%c0, %c0_0, %c0_1, %c0_2] : memref<1x8x8x128xbf16, #tpu.memory_space<vmem>>, vector<1x8x8x128xbf16>
    %1 = arith.extf %0 : vector<1x8x8x128xbf16> to vector<1x8x8x128xf32>
    %c0_3 = arith.constant 0 : index
    %c0_4 = arith.constant 0 : index
    %2 = vector.load %arg2[%c0_3, %c0_4] : memref<1x128xf32, #tpu.memory_space<vmem>>, vector<1x128xf32>
    %3 = vector.shape_cast %2 : vector<1x128xf32> to vector<1x1x1x128xf32>
    %4 = vector.broadcast %3 : vector<1x1x1x128xf32> to vector<1x8x8x128xf32>
    %5 = arith.mulf %1, %4 : vector<1x8x8x128xf32>
    %c0_5 = arith.constant 0 : index
    %c0_6 = arith.constant 0 : index
    %6 = vector.load %arg3[%c0_5, %c0_6] : memref<1x128xf32, #tpu.memory_space<vmem>>, vector<1x128xf32>
    %7 = vector.shape_cast %6 : vector<1x128xf32> to vector<1x1x1x128xf32>
    %8 = vector.broadcast %7 : vector<1x1x1x128xf32> to vector<1x8x8x128xf32>
    %9 = arith.addf %5, %8 : vector<1x8x8x128xf32>
    %cst = arith.constant 0.000000e+00 : f32
    %10 = vector.broadcast %cst : f32 to vector<1x8x8x128xf32>
    %11 = arith.maximumf %9, %10 : vector<1x8x8x128xf32>
    %12 = arith.truncf %11 : vector<1x8x8x128xf32> to vector<1x8x8x128xbf16>
    %c0_7 = arith.constant 0 : index
    %c0_8 = arith.constant 0 : index
    %c0_9 = arith.constant 0 : index
    %c0_10 = arith.constant 0 : index
    %13 = vector.load %arg8[%c0_7, %c0_8, %c0_9, %c0_10] : memref<1x8x8x128xbf16, #tpu.memory_space<vmem>>, vector<1x8x8x128xbf16>
    tpu.vector_store %arg8[%c0_7, %c0_8, %c0_9, %c0_10], %12 {strides = array<i32>} : memref<1x8x8x128xbf16, #tpu.memory_space<vmem>>, vector<1x8x8x128xbf16>,
    %cst_11 = arith.constant 0.000000e+00 : bf16
    %14 = vector.broadcast %cst_11 : bf16 to vector<1x1x8x128xbf16>
    %c0_12 = arith.constant 0 : index
    %c0_13 = arith.constant 0 : index
    %c0_14 = arith.constant 0 : index
    %c0_15 = arith.constant 0 : index
    %15 = vector.load %arg9[%c0_12, %c0_13, %c0_14, %c0_15] : memref<1x8x8x1152xbf16, #tpu.memory_space<vmem>>, vector<1x1x8x128xbf16>
    tpu.vector_store %arg9[%c0_12, %c0_13, %c0_14, %c0_15], %14 {strides = array<i32>} : memref<1x8x8x1152xbf16, #tpu.memory_space<vmem>>, vector<1x1x8x128xbf16>,
    %cst_16 = arith.constant 0.000000e+00 : bf16
    %16 = vector.broadcast %cst_16 : bf16 to vector<1x8x1x128xbf16>
    %c0_17 = arith.constant 0 : index
    %c0_18 = arith.constant 0 : index
    %c0_19 = arith.constant 0 : index
    %c0_20 = arith.constant 0 : index
    %17 = vector.load %arg9[%c0_17, %c0_18, %c0_19, %c0_20] : memref<1x8x8x1152xbf16, #tpu.memory_space<vmem>>, vector<1x8x1x128xbf16>
    tpu.vector_store %arg9[%c0_17, %c0_18, %c0_19, %c0_20], %16 {strides = array<i32>} : memref<1x8x8x1152xbf16, #tpu.memory_space<vmem>>, vector<1x8x1x128xbf16>,
    %c0_21 = arith.constant 0 : index
    %c0_22 = arith.constant 0 : index
    %c0_23 = arith.constant 0 : index
    %c0_24 = arith.constant 0 : index
    %18 = vector.load %arg8[%c0_21, %c0_22, %c0_23, %c0_24] : memref<1x8x8x128xbf16, #tpu.memory_space<vmem>>, vector<1x7x7x128xbf16>
    %c0_25 = arith.constant 0 : index
    %c1 = arith.constant 1 : index
    %c1_26 = arith.constant 1 : index
    %c0_27 = arith.constant 0 : index
    %19 = vector.load %arg9[%c0_25, %c1, %c1_26, %c0_27] : memref<1x8x8x1152xbf16, #tpu.memory_space<vmem>>, vector<1x7x7x128xbf16>
    tpu.vector_store %arg9[%c0_25, %c1, %c1_26, %c0_27], %18 {strides = array<i32>} : memref<1x8x8x1152xbf16, #tpu.memory_space<vmem>>, vector<1x7x7x128xbf16>,
    %cst_28 = arith.constant 0.000000e+00 : bf16
    %20 = vector.broadcast %cst_28 : bf16 to vector<1x1x8x128xbf16>
    %c0_29 = arith.constant 0 : index
    %c0_30 = arith.constant 0 : index
    %c0_31 = arith.constant 0 : index
    %c128 = arith.constant 128 : index
    %21 = vector.load %arg9[%c0_29, %c0_30, %c0_31, %c128] : memref<1x8x8x1152xbf16, #tpu.memory_space<vmem>>, vector<1x1x8x128xbf16>
    tpu.vector_store %arg9[%c0_29, %c0_30, %c0_31, %c128], %20 {strides = array<i32>} : memref<1x8x8x1152xbf16, #tpu.memory_space<vmem>>, vector<1x1x8x128xbf16>,
    %c0_32 = arith.constant 0 : index
    %c0_33 = arith.constant 0 : index
    %c0_34 = arith.constant 0 : index
    %c0_35 = arith.constant 0 : index
    %22 = vector.load %arg8[%c0_32, %c0_33, %c0_34, %c0_35] : memref<1x8x8x128xbf16, #tpu.memory_space<vmem>>, vector<1x7x8x128xbf16>
    %c0_36 = arith.constant 0 : index
    %c1_37 = arith.constant 1 : index
    %c0_38 = arith.constant 0 : index
    %c128_39 = arith.constant 128 : index
    %23 = vector.load %arg9[%c0_36, %c1_37, %c0_38, %c128_39] : memref<1x8x8x1152xbf16, #tpu.memory_space<vmem>>, vector<1x7x8x128xbf16>
    tpu.vector_store %arg9[%c0_36, %c1_37, %c0_38, %c128_39], %22 {strides = array<i32>} : memref<1x8x8x1152xbf16, #tpu.memory_space<vmem>>, vector<1x7x8x128xbf16>,
    %cst_40 = arith.constant 0.000000e+00 : bf16
    %24 = vector.broadcast %cst_40 : bf16 to vector<1x1x8x128xbf16>
    %c0_41 = arith.constant 0 : index
    %c0_42 = arith.constant 0 : index
    %c0_43 = arith.constant 0 : index
    %c256 = arith.constant 256 : index
    %25 = vector.load %arg9[%c0_41, %c0_42, %c0_43, %c256] : memref<1x8x8x1152xbf16, #tpu.memory_space<vmem>>, vector<1x1x8x128xbf16>
    tpu.vector_store %arg9[%c0_41, %c0_42, %c0_43, %c256], %24 {strides = array<i32>} : memref<1x8x8x1152xbf16, #tpu.memory_space<vmem>>, vector<1x1x8x128xbf16>,
    %cst_44 = arith.constant 0.000000e+00 : bf16
    %26 = vector.broadcast %cst_44 : bf16 to vector<1x8x1x128xbf16>
    %c0_45 = arith.constant 0 : index
    %c0_46 = arith.constant 0 : index
    %c7 = arith.constant 7 : index
    %c256_47 = arith.constant 256 : index
    %27 = vector.load %arg9[%c0_45, %c0_46, %c7, %c256_47] : memref<1x8x8x1152xbf16, #tpu.memory_space<vmem>>, vector<1x8x1x128xbf16>
    tpu.vector_store %arg9[%c0_45, %c0_46, %c7, %c256_47], %26 {strides = array<i32>} : memref<1x8x8x1152xbf16, #tpu.memory_space<vmem>>, vector<1x8x1x128xbf16>,
    %c0_48 = arith.constant 0 : index
    %c0_49 = arith.constant 0 : index
    %c1_50 = arith.constant 1 : index
    %c0_51 = arith.constant 0 : index
    %28 = vector.load %arg8[%c0_48, %c0_49, %c1_50, %c0_51] : memref<1x8x8x128xbf16, #tpu.memory_space<vmem>>, vector<1x7x7x128xbf16>
    %c0_52 = arith.constant 0 : index
    %c1_53 = arith.constant 1 : index
    %c0_54 = arith.constant 0 : index
    %c256_55 = arith.constant 256 : index
    %29 = vector.load %arg9[%c0_52, %c1_53, %c0_54, %c256_55] : memref<1x8x8x1152xbf16, #tpu.memory_space<vmem>>, vector<1x7x7x128xbf16>
    tpu.vector_store %arg9[%c0_52, %c1_53, %c0_54, %c256_55], %28 {strides = array<i32>} : memref<1x8x8x1152xbf16, #tpu.memory_space<vmem>>, vector<1x7x7x128xbf16>,
    %cst_56 = arith.constant 0.000000e+00 : bf16
    %30 = vector.broadcast %cst_56 : bf16 to vector<1x8x1x128xbf16>
    %c0_57 = arith.constant 0 : index
    %c0_58 = arith.constant 0 : index
    %c0_59 = arith.constant 0 : index
    %c384 = arith.constant 384 : index
    %31 = vector.load %arg9[%c0_57, %c0_58, %c0_59, %c384] : memref<1x8x8x1152xbf16, #tpu.memory_space<vmem>>, vector<1x8x1x128xbf16>
    tpu.vector_store %arg9[%c0_57, %c0_58, %c0_59, %c384], %30 {strides = array<i32>} : memref<1x8x8x1152xbf16, #tpu.memory_space<vmem>>, vector<1x8x1x128xbf16>,
    %c0_60 = arith.constant 0 : index
    %c0_61 = arith.constant 0 : index
    %c0_62 = arith.constant 0 : index
    %c0_63 = arith.constant 0 : index
    %32 = vector.load %arg8[%c0_60, %c0_61, %c0_62, %c0_63] : memref<1x8x8x128xbf16, #tpu.memory_space<vmem>>, vector<1x8x7x128xbf16>
    %c0_64 = arith.constant 0 : index
    %c0_65 = arith.constant 0 : index
    %c1_66 = arith.constant 1 : index
    %c384_67 = arith.constant 384 : index
    %33 = vector.load %arg9[%c0_64, %c0_65, %c1_66, %c384_67] : memref<1x8x8x1152xbf16, #tpu.memory_space<vmem>>, vector<1x8x7x128xbf16>
    tpu.vector_store %arg9[%c0_64, %c0_65, %c1_66, %c384_67], %32 {strides = array<i32>} : memref<1x8x8x1152xbf16, #tpu.memory_space<vmem>>, vector<1x8x7x128xbf16>,
    %c0_68 = arith.constant 0 : index
    %c0_69 = arith.constant 0 : index
    %c0_70 = arith.constant 0 : index
    %c0_71 = arith.constant 0 : index
    %34 = vector.load %arg8[%c0_68, %c0_69, %c0_70, %c0_71] : memref<1x8x8x128xbf16, #tpu.memory_space<vmem>>, vector<1x8x8x128xbf16>
    %c0_72 = arith.constant 0 : index
    %c0_73 = arith.constant 0 : index
    %c0_74 = arith.constant 0 : index
    %c512 = arith.constant 512 : index
    %35 = vector.load %arg9[%c0_72, %c0_73, %c0_74, %c512] : memref<1x8x8x1152xbf16, #tpu.memory_space<vmem>>, vector<1x8x8x128xbf16>
    tpu.vector_store %arg9[%c0_72, %c0_73, %c0_74, %c512], %34 {strides = array<i32>} : memref<1x8x8x1152xbf16, #tpu.memory_space<vmem>>, vector<1x8x8x128xbf16>,
    %cst_75 = arith.constant 0.000000e+00 : bf16
    %36 = vector.broadcast %cst_75 : bf16 to vector<1x8x1x128xbf16>
    %c0_76 = arith.constant 0 : index
    %c0_77 = arith.constant 0 : index
    %c7_78 = arith.constant 7 : index
    %c640 = arith.constant 640 : index
    %37 = vector.load %arg9[%c0_76, %c0_77, %c7_78, %c640] : memref<1x8x8x1152xbf16, #tpu.memory_space<vmem>>, vector<1x8x1x128xbf16>
    tpu.vector_store %arg9[%c0_76, %c0_77, %c7_78, %c640], %36 {strides = array<i32>} : memref<1x8x8x1152xbf16, #tpu.memory_space<vmem>>, vector<1x8x1x128xbf16>,
    %c0_79 = arith.constant 0 : index
    %c0_80 = arith.constant 0 : index
    %c1_81 = arith.constant 1 : index
    %c0_82 = arith.constant 0 : index
    %38 = vector.load %arg8[%c0_79, %c0_80, %c1_81, %c0_82] : memref<1x8x8x128xbf16, #tpu.memory_space<vmem>>, vector<1x8x7x128xbf16>
    %c0_83 = arith.constant 0 : index
    %c0_84 = arith.constant 0 : index
    %c0_85 = arith.constant 0 : index
    %c640_86 = arith.constant 640 : index
    %39 = vector.load %arg9[%c0_83, %c0_84, %c0_85, %c640_86] : memref<1x8x8x1152xbf16, #tpu.memory_space<vmem>>, vector<1x8x7x128xbf16>
    tpu.vector_store %arg9[%c0_83, %c0_84, %c0_85, %c640_86], %38 {strides = array<i32>} : memref<1x8x8x1152xbf16, #tpu.memory_space<vmem>>, vector<1x8x7x128xbf16>,
    %cst_87 = arith.constant 0.000000e+00 : bf16
    %40 = vector.broadcast %cst_87 : bf16 to vector<1x1x8x128xbf16>
    %c0_88 = arith.constant 0 : index
    %c7_89 = arith.constant 7 : index
    %c0_90 = arith.constant 0 : index
    %c768 = arith.constant 768 : index
    %41 = vector.load %arg9[%c0_88, %c7_89, %c0_90, %c768] : memref<1x8x8x1152xbf16, #tpu.memory_space<vmem>>, vector<1x1x8x128xbf16>
    tpu.vector_store %arg9[%c0_88, %c7_89, %c0_90, %c768], %40 {strides = array<i32>} : memref<1x8x8x1152xbf16, #tpu.memory_space<vmem>>, vector<1x1x8x128xbf16>,
    %cst_91 = arith.constant 0.000000e+00 : bf16
    %42 = vector.broadcast %cst_91 : bf16 to vector<1x8x1x128xbf16>
    %c0_92 = arith.constant 0 : index
    %c0_93 = arith.constant 0 : index
    %c0_94 = arith.constant 0 : index
    %c768_95 = arith.constant 768 : index
    %43 = vector.load %arg9[%c0_92, %c0_93, %c0_94, %c768_95] : memref<1x8x8x1152xbf16, #tpu.memory_space<vmem>>, vector<1x8x1x128xbf16>
    tpu.vector_store %arg9[%c0_92, %c0_93, %c0_94, %c768_95], %42 {strides = array<i32>} : memref<1x8x8x1152xbf16, #tpu.memory_space<vmem>>, vector<1x8x1x128xbf16>,
    %c0_96 = arith.constant 0 : index
    %c1_97 = arith.constant 1 : index
    %c0_98 = arith.constant 0 : index
    %c0_99 = arith.constant 0 : index
    %44 = vector.load %arg8[%c0_96, %c1_97, %c0_98, %c0_99] : memref<1x8x8x128xbf16, #tpu.memory_space<vmem>>, vector<1x7x7x128xbf16>
    %c0_100 = arith.constant 0 : index
    %c0_101 = arith.constant 0 : index
    %c1_102 = arith.constant 1 : index
    %c768_103 = arith.constant 768 : index
    %45 = vector.load %arg9[%c0_100, %c0_101, %c1_102, %c768_103] : memref<1x8x8x1152xbf16, #tpu.memory_space<vmem>>, vector<1x7x7x128xbf16>
    tpu.vector_store %arg9[%c0_100, %c0_101, %c1_102, %c768_103], %44 {strides = array<i32>} : memref<1x8x8x1152xbf16, #tpu.memory_space<vmem>>, vector<1x7x7x128xbf16>,
    %cst_104 = arith.constant 0.000000e+00 : bf16
    %46 = vector.broadcast %cst_104 : bf16 to vector<1x1x8x128xbf16>
    %c0_105 = arith.constant 0 : index
    %c7_106 = arith.constant 7 : index
    %c0_107 = arith.constant 0 : index
    %c896 = arith.constant 896 : index
    %47 = vector.load %arg9[%c0_105, %c7_106, %c0_107, %c896] : memref<1x8x8x1152xbf16, #tpu.memory_space<vmem>>, vector<1x1x8x128xbf16>
    tpu.vector_store %arg9[%c0_105, %c7_106, %c0_107, %c896], %46 {strides = array<i32>} : memref<1x8x8x1152xbf16, #tpu.memory_space<vmem>>, vector<1x1x8x128xbf16>,
    %c0_108 = arith.constant 0 : index
    %c1_109 = arith.constant 1 : index
    %c0_110 = arith.constant 0 : index
    %c0_111 = arith.constant 0 : index
    %48 = vector.load %arg8[%c0_108, %c1_109, %c0_110, %c0_111] : memref<1x8x8x128xbf16, #tpu.memory_space<vmem>>, vector<1x7x8x128xbf16>
    %c0_112 = arith.constant 0 : index
    %c0_113 = arith.constant 0 : index
    %c0_114 = arith.constant 0 : index
    %c896_115 = arith.constant 896 : index
    %49 = vector.load %arg9[%c0_112, %c0_113, %c0_114, %c896_115] : memref<1x8x8x1152xbf16, #tpu.memory_space<vmem>>, vector<1x7x8x128xbf16>
    tpu.vector_store %arg9[%c0_112, %c0_113, %c0_114, %c896_115], %48 {strides = array<i32>} : memref<1x8x8x1152xbf16, #tpu.memory_space<vmem>>, vector<1x7x8x128xbf16>,
    %cst_116 = arith.constant 0.000000e+00 : bf16
    %50 = vector.broadcast %cst_116 : bf16 to vector<1x1x8x128xbf16>
    %c0_117 = arith.constant 0 : index
    %c7_118 = arith.constant 7 : index
    %c0_119 = arith.constant 0 : index
    %c1024 = arith.constant 1024 : index
    %51 = vector.load %arg9[%c0_117, %c7_118, %c0_119, %c1024] : memref<1x8x8x1152xbf16, #tpu.memory_space<vmem>>, vector<1x1x8x128xbf16>
    tpu.vector_store %arg9[%c0_117, %c7_118, %c0_119, %c1024], %50 {strides = array<i32>} : memref<1x8x8x1152xbf16, #tpu.memory_space<vmem>>, vector<1x1x8x128xbf16>,
    %cst_120 = arith.constant 0.000000e+00 : bf16
    %52 = vector.broadcast %cst_120 : bf16 to vector<1x8x1x128xbf16>
    %c0_121 = arith.constant 0 : index
    %c0_122 = arith.constant 0 : index
    %c7_123 = arith.constant 7 : index
    %c1024_124 = arith.constant 1024 : index
    %53 = vector.load %arg9[%c0_121, %c0_122, %c7_123, %c1024_124] : memref<1x8x8x1152xbf16, #tpu.memory_space<vmem>>, vector<1x8x1x128xbf16>
    tpu.vector_store %arg9[%c0_121, %c0_122, %c7_123, %c1024_124], %52 {strides = array<i32>} : memref<1x8x8x1152xbf16, #tpu.memory_space<vmem>>, vector<1x8x1x128xbf16>,
    %c0_125 = arith.constant 0 : index
    %c1_126 = arith.constant 1 : index
    %c1_127 = arith.constant 1 : index
    %c0_128 = arith.constant 0 : index
    %54 = vector.load %arg8[%c0_125, %c1_126, %c1_127, %c0_128] : memref<1x8x8x128xbf16, #tpu.memory_space<vmem>>, vector<1x7x7x128xbf16>
    %c0_129 = arith.constant 0 : index
    %c0_130 = arith.constant 0 : index
    %c0_131 = arith.constant 0 : index
    %c1024_132 = arith.constant 1024 : index
    %55 = vector.load %arg9[%c0_129, %c0_130, %c0_131, %c1024_132] : memref<1x8x8x1152xbf16, #tpu.memory_space<vmem>>, vector<1x7x7x128xbf16>
    tpu.vector_store %arg9[%c0_129, %c0_130, %c0_131, %c1024_132], %54 {strides = array<i32>} : memref<1x8x8x1152xbf16, #tpu.memory_space<vmem>>, vector<1x7x7x128xbf16>,
    %c0_133 = arith.constant 0 : index
    %c0_134 = arith.constant 0 : index
    %c0_135 = arith.constant 0 : index
    %c0_136 = arith.constant 0 : index
    %56 = vector.load %arg9[%c0_133, %c0_134, %c0_135, %c0_136] : memref<1x8x8x1152xbf16, #tpu.memory_space<vmem>>, vector<1x8x8x1152xbf16>
    %57 = vector.shape_cast %56 : vector<1x8x8x1152xbf16> to vector<64x1152xbf16>
    %c0_137 = arith.constant 0 : index
    %c0_138 = arith.constant 0 : index
    %58 = vector.load %arg4[%c0_137, %c0_138] : memref<1152x128xbf16, #tpu.memory_space<vmem>>, vector<1152x128xbf16>
    %cst_139 = arith.constant dense<0.000000e+00> : vector<64x128xf32>
    %59 = tpu.matmul %57, %58, %cst_139 {dimension_numbers = #tpu.dot_dimension_numbers<[1], [0], [0], [1], [0, 0, 1, 1], [], []>} : vector<64x1152xbf16>, vector<1152x128xbf16>, vector<64x128xf32> -> vector<64x128xf32>
    %60 = arith.truncf %59 : vector<64x128xf32> to vector<64x128xbf16>
    %c0_140 = arith.constant 0 : index
    %c0_141 = arith.constant 0 : index
    %61 = vector.load %arg5[%c0_140, %c0_141] : memref<64x128xbf16, #tpu.memory_space<vmem>>, vector<64x128xbf16>
    tpu.vector_store %arg5[%c0_140, %c0_141], %60 {strides = array<i32>} : memref<64x128xbf16, #tpu.memory_space<vmem>>, vector<64x128xbf16>,
    %cst_142 = arith.constant dense<0.000000e+00> : vector<128xf32>
    %62 = vector.multi_reduction <add>, %59, %cst_142 [0] : vector<64x128xf32> to vector<128xf32>
    %63 = vector.shape_cast %62 : vector<128xf32> to vector<1x128xf32>
    %cst_143 = arith.constant 1.562500e-02 : f32
    %64 = vector.broadcast %cst_143 : f32 to vector<1x128xf32>
    %65 = arith.mulf %63, %64 : vector<1x128xf32>
    %66 = vector.broadcast %65 : vector<1x128xf32> to vector<64x128xf32>
    %67 = arith.subf %59, %66 : vector<64x128xf32>
    %68 = arith.mulf %67, %67 : vector<64x128xf32>
    %cst_144 = arith.constant dense<0.000000e+00> : vector<128xf32>
    %69 = vector.multi_reduction <add>, %68, %cst_144 [0] : vector<64x128xf32> to vector<128xf32>
    %70 = vector.shape_cast %69 : vector<128xf32> to vector<1x128xf32>
    %71 = vector.shape_cast %65 : vector<1x128xf32> to vector<1x1x128xf32>
    %c0_145 = arith.constant 0 : index
    %c0_146 = arith.constant 0 : index
    %c0_147 = arith.constant 0 : index
    %72 = vector.load %arg6[%c0_145, %c0_146, %c0_147] : memref<1x1x128xf32, #tpu.memory_space<vmem>>, vector<1x1x128xf32>
    tpu.vector_store %arg6[%c0_145, %c0_146, %c0_147], %71 {strides = array<i32>} : memref<1x1x128xf32, #tpu.memory_space<vmem>>, vector<1x1x128xf32>,
    %73 = vector.shape_cast %70 : vector<1x128xf32> to vector<1x1x128xf32>
    %c0_148 = arith.constant 0 : index
    %c0_149 = arith.constant 0 : index
    %c0_150 = arith.constant 0 : index
    %74 = vector.load %arg7[%c0_148, %c0_149, %c0_150] : memref<1x1x128xf32, #tpu.memory_space<vmem>>, vector<1x1x128xf32>
    tpu.vector_store %arg7[%c0_148, %c0_149, %c0_150], %73 {strides = array<i32>} : memref<1x1x128xf32, #tpu.memory_space<vmem>>, vector<1x1x128xf32>,
    return
  }
  func.func @transform_0(%arg0: i32) -> (i32, i32, i32, i32) {
    %c0_i32 = arith.constant 0 : i32
    %c0_i32_0 = arith.constant 0 : i32
    %c0_i32_1 = arith.constant 0 : i32
    %c0_i32_2 = arith.constant 0 : i32
    return %arg0, %c0_i32, %c0_i32_0, %c0_i32_1 : i32, i32, i32, i32
  }
  func.func @transform_1(%arg0: i32) -> (i32, i32) {
    %c0_i32 = arith.constant 0 : i32
    %c0_i32_0 = arith.constant 0 : i32
    %c0_i32_1 = arith.constant 0 : i32
    return %c0_i32, %c0_i32_0 : i32, i32
  }
  func.func @transform_2(%arg0: i32) -> (i32, i32) {
    %c0_i32 = arith.constant 0 : i32
    %c0_i32_0 = arith.constant 0 : i32
    %c0_i32_1 = arith.constant 0 : i32
    return %c0_i32, %c0_i32_0 : i32, i32
  }
  func.func @transform_3(%arg0: i32) -> (i32, i32) {
    %c0_i32 = arith.constant 0 : i32
    %c0_i32_0 = arith.constant 0 : i32
    %c0_i32_1 = arith.constant 0 : i32
    return %c0_i32, %c0_i32_0 : i32, i32
  }
  func.func @transform_4(%arg0: i32) -> (i32, i32) {
    %c0_i32 = arith.constant 0 : i32
    %c0_i32_0 = arith.constant 0 : i32
    return %arg0, %c0_i32 : i32, i32
  }
  func.func @transform_5(%arg0: i32) -> (i32, i32, i32) {
    %c0_i32 = arith.constant 0 : i32
    %c0_i32_0 = arith.constant 0 : i32
    %c0_i32_1 = arith.constant 0 : i32
    return %arg0, %c0_i32, %c0_i32_0 : i32, i32, i32
  }
  func.func @transform_6(%arg0: i32) -> (i32, i32, i32) {
    %c0_i32 = arith.constant 0 : i32
    %c0_i32_0 = arith.constant 0 : i32
    %c0_i32_1 = arith.constant 0 : i32
    return %arg0, %c0_i32, %c0_i32_0 : i32, i32, i32
  }
}

module attributes {stable_mosaic.version = 11 : i64} {
  func.func @_bnrelu_conv1x1_stats_kernel(%arg0: i32, %arg1: memref<64x128xbf16, #tpu.memory_space<vmem>>, %arg2: memref<1x128xf32, #tpu.memory_space<vmem>>, %arg3: memref<1x128xf32, #tpu.memory_space<vmem>>, %arg4: memref<128x128xbf16, #tpu.memory_space<vmem>>, %arg5: memref<64x128xf32, #tpu.memory_space<vmem>>, %arg6: memref<1x1x128xf32, #tpu.memory_space<vmem>>, %arg7: memref<1x1x128xf32, #tpu.memory_space<vmem>>) attributes {dimension_semantics = [#tpu.dimension_semantics<parallel>], iteration_bounds = array<i64: 2>, scalar_prefetch = 0 : i64, scratch_operands = 0 : i64, tpu.core_type = #tpu.core_type<tc>, window_params = [{transform_indices = @transform_0, window_bounds = array<i64: 64, 128>}, {pipeline_mode = #tpu.pipeline_mode<synchronous>, transform_indices = @transform_1, window_bounds = array<i64: 1, 128>}, {pipeline_mode = #tpu.pipeline_mode<synchronous>, transform_indices = @transform_2, window_bounds = array<i64: 1, 128>}, {pipeline_mode = #tpu.pipeline_mode<synchronous>, transform_indices = @transform_3, window_bounds = array<i64: 128, 128>}, {transform_indices = @transform_4, window_bounds = array<i64: 64, 128>}, {transform_indices = @transform_5, window_bounds = array<i64: 1, 1, 128>}, {transform_indices = @transform_6, window_bounds = array<i64: 1, 1, 128>}]} {
    %c0 = arith.constant 0 : index
    %c0_0 = arith.constant 0 : index
    %0 = vector.load %arg1[%c0, %c0_0] : memref<64x128xbf16, #tpu.memory_space<vmem>>, vector<64x128xbf16>
    %1 = arith.extf %0 : vector<64x128xbf16> to vector<64x128xf32>
    %c0_1 = arith.constant 0 : index
    %c0_2 = arith.constant 0 : index
    %2 = vector.load %arg2[%c0_1, %c0_2] : memref<1x128xf32, #tpu.memory_space<vmem>>, vector<1x128xf32>
    %3 = vector.broadcast %2 : vector<1x128xf32> to vector<64x128xf32>
    %4 = arith.mulf %1, %3 : vector<64x128xf32>
    %c0_3 = arith.constant 0 : index
    %c0_4 = arith.constant 0 : index
    %5 = vector.load %arg3[%c0_3, %c0_4] : memref<1x128xf32, #tpu.memory_space<vmem>>, vector<1x128xf32>
    %6 = vector.broadcast %5 : vector<1x128xf32> to vector<64x128xf32>
    %7 = arith.addf %4, %6 : vector<64x128xf32>
    %cst = arith.constant 0.000000e+00 : f32
    %8 = vector.broadcast %cst : f32 to vector<64x128xf32>
    %9 = arith.maximumf %7, %8 : vector<64x128xf32>
    %10 = arith.truncf %9 : vector<64x128xf32> to vector<64x128xbf16>
    %c0_5 = arith.constant 0 : index
    %c0_6 = arith.constant 0 : index
    %11 = vector.load %arg4[%c0_5, %c0_6] : memref<128x128xbf16, #tpu.memory_space<vmem>>, vector<128x128xbf16>
    %cst_7 = arith.constant dense<0.000000e+00> : vector<64x128xf32>
    %12 = tpu.matmul %10, %11, %cst_7 {dimension_numbers = #tpu.dot_dimension_numbers<[1], [0], [0], [1], [0, 0, 1, 1], [], []>} : vector<64x128xbf16>, vector<128x128xbf16>, vector<64x128xf32> -> vector<64x128xf32>
    %c0_8 = arith.constant 0 : index
    %c0_9 = arith.constant 0 : index
    %13 = vector.load %arg5[%c0_8, %c0_9] : memref<64x128xf32, #tpu.memory_space<vmem>>, vector<64x128xf32>
    tpu.vector_store %arg5[%c0_8, %c0_9], %12 {strides = array<i32>} : memref<64x128xf32, #tpu.memory_space<vmem>>, vector<64x128xf32>,
    %cst_10 = arith.constant dense<0.000000e+00> : vector<128xf32>
    %14 = vector.multi_reduction <add>, %12, %cst_10 [0] : vector<64x128xf32> to vector<128xf32>
    %15 = vector.shape_cast %14 : vector<128xf32> to vector<1x128xf32>
    %cst_11 = arith.constant 1.562500e-02 : f32
    %16 = vector.broadcast %cst_11 : f32 to vector<1x128xf32>
    %17 = arith.mulf %15, %16 : vector<1x128xf32>
    %18 = vector.broadcast %17 : vector<1x128xf32> to vector<64x128xf32>
    %19 = arith.subf %12, %18 : vector<64x128xf32>
    %20 = arith.mulf %19, %19 : vector<64x128xf32>
    %cst_12 = arith.constant dense<0.000000e+00> : vector<128xf32>
    %21 = vector.multi_reduction <add>, %20, %cst_12 [0] : vector<64x128xf32> to vector<128xf32>
    %22 = vector.shape_cast %21 : vector<128xf32> to vector<1x128xf32>
    %23 = vector.shape_cast %17 : vector<1x128xf32> to vector<1x1x128xf32>
    %c0_13 = arith.constant 0 : index
    %c0_14 = arith.constant 0 : index
    %c0_15 = arith.constant 0 : index
    %24 = vector.load %arg6[%c0_13, %c0_14, %c0_15] : memref<1x1x128xf32, #tpu.memory_space<vmem>>, vector<1x1x128xf32>
    tpu.vector_store %arg6[%c0_13, %c0_14, %c0_15], %23 {strides = array<i32>} : memref<1x1x128xf32, #tpu.memory_space<vmem>>, vector<1x1x128xf32>,
    %25 = vector.shape_cast %22 : vector<1x128xf32> to vector<1x1x128xf32>
    %c0_16 = arith.constant 0 : index
    %c0_17 = arith.constant 0 : index
    %c0_18 = arith.constant 0 : index
    %26 = vector.load %arg7[%c0_16, %c0_17, %c0_18] : memref<1x1x128xf32, #tpu.memory_space<vmem>>, vector<1x1x128xf32>
    tpu.vector_store %arg7[%c0_16, %c0_17, %c0_18], %25 {strides = array<i32>} : memref<1x1x128xf32, #tpu.memory_space<vmem>>, vector<1x1x128xf32>,
    return
  }
  func.func @transform_0(%arg0: i32) -> (i32, i32) {
    %c0_i32 = arith.constant 0 : i32
    %c0_i32_0 = arith.constant 0 : i32
    return %arg0, %c0_i32 : i32, i32
  }
  func.func @transform_1(%arg0: i32) -> (i32, i32) {
    %c0_i32 = arith.constant 0 : i32
    %c0_i32_0 = arith.constant 0 : i32
    %c0_i32_1 = arith.constant 0 : i32
    return %c0_i32, %c0_i32_0 : i32, i32
  }
  func.func @transform_2(%arg0: i32) -> (i32, i32) {
    %c0_i32 = arith.constant 0 : i32
    %c0_i32_0 = arith.constant 0 : i32
    %c0_i32_1 = arith.constant 0 : i32
    return %c0_i32, %c0_i32_0 : i32, i32
  }
  func.func @transform_3(%arg0: i32) -> (i32, i32) {
    %c0_i32 = arith.constant 0 : i32
    %c0_i32_0 = arith.constant 0 : i32
    %c0_i32_1 = arith.constant 0 : i32
    return %c0_i32, %c0_i32_0 : i32, i32
  }
  func.func @transform_4(%arg0: i32) -> (i32, i32) {
    %c0_i32 = arith.constant 0 : i32
    %c0_i32_0 = arith.constant 0 : i32
    return %arg0, %c0_i32 : i32, i32
  }
  func.func @transform_5(%arg0: i32) -> (i32, i32, i32) {
    %c0_i32 = arith.constant 0 : i32
    %c0_i32_0 = arith.constant 0 : i32
    %c0_i32_1 = arith.constant 0 : i32
    return %arg0, %c0_i32, %c0_i32_0 : i32, i32, i32
  }
  func.func @transform_6(%arg0: i32) -> (i32, i32, i32) {
    %c0_i32 = arith.constant 0 : i32
    %c0_i32_0 = arith.constant 0 : i32
    %c0_i32_1 = arith.constant 0 : i32
    return %arg0, %c0_i32, %c0_i32_0 : i32, i32, i32
  }
}

module attributes {stable_mosaic.version = 11 : i64} {
  func.func @_bn_residual_relu_kernel(%arg0: i32, %arg1: memref<64x128xf32, #tpu.memory_space<vmem>>, %arg2: memref<1x128xf32, #tpu.memory_space<vmem>>, %arg3: memref<1x128xf32, #tpu.memory_space<vmem>>, %arg4: memref<64x128xf32, #tpu.memory_space<vmem>>, %arg5: memref<64x128xf32, #tpu.memory_space<vmem>>) attributes {dimension_semantics = [#tpu.dimension_semantics<parallel>], iteration_bounds = array<i64: 2>, scalar_prefetch = 0 : i64, scratch_operands = 0 : i64, tpu.core_type = #tpu.core_type<tc>, window_params = [{transform_indices = @transform_0, window_bounds = array<i64: 64, 128>}, {pipeline_mode = #tpu.pipeline_mode<synchronous>, transform_indices = @transform_1, window_bounds = array<i64: 1, 128>}, {pipeline_mode = #tpu.pipeline_mode<synchronous>, transform_indices = @transform_2, window_bounds = array<i64: 1, 128>}, {transform_indices = @transform_3, window_bounds = array<i64: 64, 128>}, {transform_indices = @transform_4, window_bounds = array<i64: 64, 128>}]} {
    %c0 = arith.constant 0 : index
    %c0_0 = arith.constant 0 : index
    %0 = vector.load %arg1[%c0, %c0_0] : memref<64x128xf32, #tpu.memory_space<vmem>>, vector<64x128xf32>
    %c0_1 = arith.constant 0 : index
    %c0_2 = arith.constant 0 : index
    %1 = vector.load %arg2[%c0_1, %c0_2] : memref<1x128xf32, #tpu.memory_space<vmem>>, vector<1x128xf32>
    %2 = vector.broadcast %1 : vector<1x128xf32> to vector<64x128xf32>
    %3 = arith.mulf %0, %2 : vector<64x128xf32>
    %c0_3 = arith.constant 0 : index
    %c0_4 = arith.constant 0 : index
    %4 = vector.load %arg3[%c0_3, %c0_4] : memref<1x128xf32, #tpu.memory_space<vmem>>, vector<1x128xf32>
    %5 = vector.broadcast %4 : vector<1x128xf32> to vector<64x128xf32>
    %6 = arith.addf %3, %5 : vector<64x128xf32>
    %c0_5 = arith.constant 0 : index
    %c0_6 = arith.constant 0 : index
    %7 = vector.load %arg4[%c0_5, %c0_6] : memref<64x128xf32, #tpu.memory_space<vmem>>, vector<64x128xf32>
    %8 = arith.addf %6, %7 : vector<64x128xf32>
    %cst = arith.constant 0.000000e+00 : f32
    %9 = vector.broadcast %cst : f32 to vector<64x128xf32>
    %10 = arith.maximumf %8, %9 : vector<64x128xf32>
    %c0_7 = arith.constant 0 : index
    %c0_8 = arith.constant 0 : index
    %11 = vector.load %arg5[%c0_7, %c0_8] : memref<64x128xf32, #tpu.memory_space<vmem>>, vector<64x128xf32>
    tpu.vector_store %arg5[%c0_7, %c0_8], %10 {strides = array<i32>} : memref<64x128xf32, #tpu.memory_space<vmem>>, vector<64x128xf32>,
    return
  }
  func.func @transform_0(%arg0: i32) -> (i32, i32) {
    %c0_i32 = arith.constant 0 : i32
    %c0_i32_0 = arith.constant 0 : i32
    return %arg0, %c0_i32 : i32, i32
  }
  func.func @transform_1(%arg0: i32) -> (i32, i32) {
    %c0_i32 = arith.constant 0 : i32
    %c0_i32_0 = arith.constant 0 : i32
    %c0_i32_1 = arith.constant 0 : i32
    return %c0_i32, %c0_i32_0 : i32, i32
  }
  func.func @transform_2(%arg0: i32) -> (i32, i32) {
    %c0_i32 = arith.constant 0 : i32
    %c0_i32_0 = arith.constant 0 : i32
    %c0_i32_1 = arith.constant 0 : i32
    return %c0_i32, %c0_i32_0 : i32, i32
  }
  func.func @transform_3(%arg0: i32) -> (i32, i32) {
    %c0_i32 = arith.constant 0 : i32
    %c0_i32_0 = arith.constant 0 : i32
    return %arg0, %c0_i32 : i32, i32
  }
  func.func @transform_4(%arg0: i32) -> (i32, i32) {
    %c0_i32 = arith.constant 0 : i32
    %c0_i32_0 = arith.constant 0 : i32
    return %arg0, %c0_i32 : i32, i32
  }
}

</mosaic_0001>

<bundles_post_ra>
// kernel: bottleneck_forward.4
= control target key start
LH: loop header
LB: loop body
LE: loop exit
PB: predicated region body
PF: predicated region fallthrough
CT: control target
= control target key end

     0   :  { %s710_s15 = smov 0   ;;  %s780_s0 = inlined_call_operand.vmem [shape: f32[128,128], index: 0, kind: input, shape index: {}]   ;;  %s781_s1 = inlined_call_operand.vmem [shape: bf16[128,128], index: 1, kind: input, shape index: {}]   ;;  %s782_s2 = inlined_call_operand.vmem [shape: bf16[128,128], index: 2, kind: output, shape index: {0}]   ;;  %s783_s3 = inlined_call_operand.vmem [shape: f32[2,1,128], index: 3, kind: output, shape index: {1}]   ;;  %s784_s4 = inlined_call_operand.vmem [shape: f32[2,1,128], index: 4, kind: output, shape index: {2}]  }
   0x1 LB: > { %s716_s16 = sadd.s32 4294967295, %s683_s15   ;;  %p555_p0 = scmp.ge.s32.totalorder %s683_s15, 1  ;;  %s683_s15 = sphi %s710_s15, %s15_s15  }
   0x2   : > { %p168_p1 = scmp.lt.s32.totalorder %s683_s15, 3 }
   0x4   : > { %p169_p2 = pnand %p555_p0, %p168_p1 }
   0x5   : > { %v669_v0 = vld [vmem:[%s781_s1] sm:$0xff] (!%p169_p2)   ;;  %s556_s19 = sshll.u32 (!%p169_p2), %s716_s16, 3  ;;  %v670_v1 = vld [vmem:[%s781_s1 + $0x8] sm:$0xff] (!%p169_p2)   ;;  %v671_v2 = vld [vmem:[%s781_s1 + $0x10] sm:$0xff] (!%p169_p2)   ;;  %p212_p4 = scmp.lt.s32.totalorder (!%p169_p2), %s716_s16, 1 }
   0x6   : > { %172 = sbr.rel (%p169_p2) target bundleno = 312 (0x138), region = 28  ;;  %p201_p3 = scmp.lt.s32.totalorder (!%p169_p2), %s556_s19, 15  ;;  %621 = vmatprep.subr.bf16.mxu0 (!%p169_p2), %v669_v0  ;;  %645 = vmatprep.subr.bf16.mxu1 (!%p169_p2), %v669_v0  ;;  %v672_v3 = vld [vmem:[%s781_s1 + $0x18] sm:$0xff] (!%p169_p2)   ;;  %v673_v10 = vld [vmem:[%s781_s1 + $0x20] sm:$0xff] (!%p169_p2)   ;;  %v674_v11 = vld [vmem:[%s781_s1 + $0x28] sm:$0xff] (!%p169_p2)  }
   0x7   : > { %622 = vmatpush3.bf16.msra.mxu0 (!%p169_p2), %v669_v0  ;;  %653 = vmatpush3.bf16.msra.mxu1 (!%p169_p2), %v669_v0  ;;  %v675_v12 = vld [vmem:[%s781_s1 + $0x30] sm:$0xff] (!%p169_p2)   ;;  %v676_v13 = vld [vmem:[%s781_s1 + $0x38] sm:$0xff] (!%p169_p2)  }
   0x8   : > { %623 = vmatprep.subr.bf16.mxu0 (!%p169_p2), %v670_v1  ;;  %646 = vmatprep.subr.bf16.mxu1 (!%p169_p2), %v670_v1 }
   0xb   : > { %624 = vmatpush3.bf16.msra.mxu0 (!%p169_p2), %v670_v1  ;;  %654 = vmatpush3.bf16.msra.mxu1 (!%p169_p2), %v670_v1 }
   0xc   : > { %625 = vmatprep.subr.bf16.mxu0 (!%p169_p2), %v671_v2  ;;  %647 = vmatprep.subr.bf16.mxu1 (!%p169_p2), %v671_v2 }
   0xd   : > { %s786_s19 = smov (!%p201_p3, %s556_s19), 15  ;;  %s788_s16 = smov (!%p212_p4, %s716_s16), 1 }
   0xe   : > { %s557_s24 = sshll.u32 %s786_s19, 3  ;;  %s559_s12 = sshll.u32 %s786_s19, 2 }
   0xf   : > { %s736_s27 = scalar_lea.vmem %s780_s0, %s557_s24  ;;  %626 = vmatpush3.bf16.msra.mxu0 %v671_v2  ;;  %655 = vmatpush3.bf16.msra.mxu1 %v671_v2  ;;  %s210_s17 = scalar_lea.vmem %s782_s2, %s559_s12 }
  0x10   : > { %v219_v4 = vld [vmem:[%s736_s27] sm:$0xff]  ;;  %v220_v5 = vld [vmem:[%s736_s27 + $0x8] sm:$0xff]  ;;  %627 = vmatprep.subr.bf16.mxu0 %v672_v3  ;;  %648 = vmatprep.subr.bf16.mxu1 %v672_v3  ;;  %v221_v14 = vld [vmem:[%s736_s27 + $0x10] sm:$0xff]  ;;  %s214_s20 = scalar_lea.vmem %s783_s3, %s788_s16  ;;  %s217_s23 = scalar_lea.vmem %s784_s4, %s788_s16 }
  0x11   : > { %v227_v6 = vpack.c.bf16 %v220_v5, %v219_v4  ;;  %v223_v7 = vld [vmem:[%s736_s27 + $0x20] sm:$0xff]  ;;  %v224_v8 = vld [vmem:[%s736_s27 + $0x28] sm:$0xff]  ;;  %v222_v15 = vld [vmem:[%s736_s27 + $0x18] sm:$0xff] }
  0x12   : > { %v229_v9 = vpack.c.bf16 %v224_v8, %v223_v7  ;;  %v225_v16 = vld [vmem:[%s736_s27 + $0x30] sm:$0xff]  ;;  %v226_v17 = vld [vmem:[%s736_s27 + $0x38] sm:$0xff]  ;;  %v228_v18 = vpack.c.bf16 %v222_v15, %v221_v14 }
  0x13   : > { %637 = vmatprep.mubr.bf16.mxu0 %v227_v6  ;;  %628 = vmatpush3.bf16.msra.mxu0 %v672_v3  ;;  %v230_v19 = vpack.c.bf16 %v226_v17, %v225_v16 }
  0x14   : > { %641 = vmatprep.mubr.bf16.mxu1 %v229_v9  ;;  %656 = vmatpush3.bf16.msra.mxu1 %v672_v3 }
  0x15   : > { %629 = vmatprep.subr.bf16.mxu0 %v673_v10  ;;  %649 = vmatprep.subr.bf16.mxu1 %v673_v10 }
  0x17   : > { %630 = vmatpush3.bf16.msra.mxu0 %v673_v10 }
  0x18   : > { %657 = vmatpush3.bf16.msra.mxu1 %v673_v10  ;;  %631 = vmatprep.subr.bf16.mxu0 %v674_v11 }
  0x19   : > { %650 = vmatprep.subr.bf16.mxu1 %v674_v11 }
  0x1b   : > { %632 = vmatpush3.bf16.msra.mxu0 %v674_v11 }
  0x1c   : > { %658 = vmatpush3.bf16.msra.mxu1 %v674_v11  ;;  %633 = vmatprep.subr.bf16.mxu0 %v675_v12 }
  0x1d   : > { %651 = vmatprep.subr.bf16.mxu1 %v675_v12 }
  0x1f   : > { %634 = vmatpush3.bf16.msra.mxu0 %v675_v12 }
  0x20   : > { %659 = vmatpush3.bf16.msra.mxu1 %v675_v12  ;;  %635 = vmatprep.subr.bf16.mxu0 %v676_v13 }
  0x21   : > { %652 = vmatprep.subr.bf16.mxu1 %v676_v13 }
  0x23   : > { %636 = vmatpush3.bf16.msra.mxu0 %v676_v13 }
  0x24   : > { %660 = vmatpush3.bf16.msra.mxu1 %v676_v13 }
  0x26   : > { %638 = vmatmul.mubr.bf16.vlgmr.msra.gmra.mrb[0].mxu0 %v228_v18 }
  0x27   : > { %642 = vmatmul.mubr.bf16.vlgmr.msra.gmra.mrb[0].mxu1 %v230_v19 }
  0xf9   : > { %v639_v20 = vpop.f32.mrb[0].mxu0 }
  0xfa   : > { %v643_v21 = vpop.f32.mrb[0].mxu1  ;;  %v329_v22 = vpop.f32.mrb[1].mxu0 }
  0xfb   : > { %v345_v23 = vpop.f32.mrb[1].mxu1  ;;  %v640_v24 = vpop.f32.mrb[2].mxu0 }
  0xfc   : > { %v644_v25 = vpop.f32.mrb[2].mxu1  ;;  %v594_v26 = vpack.c.bf16 %v640_v24, %v639_v20  ;;  %v332_v27 = vpop.f32.mrb[3].mxu0 }
  0xfd   : > { %v604_v28 = vpack.c.bf16 %v644_v25, %v643_v21  ;;  %v348_v29 = vpop.f32.mrb[3].mxu1  ;;  %v589_v30 = vpack.c.bf16 %v332_v27, %v329_v22  ;;  %v400_v31 = vadd.f32 %v332_v27, %v329_v22 }
  0xfe   : > { %v599_v32 = vpack.c.bf16 %v348_v29, %v345_v23  ;;  %606 = vst [vmem:[%s210_s17 + $0x8] sm:$0xff] %v594_v26  }
  0xff   : > { %608 = vst [vmem:[%s210_s17 + $0x18] sm:$0xff] %v604_v28   ;;  %590 = vst [vmem:[%s210_s17] sm:$0xff] %v589_v30   ;;  %v401_v33 = vadd.f32 %v639_v20, %v400_v31 }
 0x100   : > { %607 = vst [vmem:[%s210_s17 + $0x10] sm:$0xff] %v599_v32  }
 0x101   : > { %v402_v34 = vadd.f32 %v640_v24, %v401_v33 }
 0x103   : > { %v403_v35 = vadd.f32 %v402_v34, %v345_v23 }
 0x105   : > { %v404_v36 = vadd.f32 %v403_v35, %v348_v29 }
 0x107   : > { %v405_v37 = vadd.f32 %v643_v21, %v404_v36 }
 0x109   : > { %v406_v38 = vadd.f32 %v644_v25, %v405_v37 }
 0x10b   : > { %v407_v39 = vrot.slane %v406_v38, 4 }
 0x10d   : > { %v408_v40 = vadd.f32 %v407_v39, %v406_v38 }
 0x10f   : > { %v409_v41 = vrot.slane %v408_v40, 2 }
 0x111   : > { %v410_v42 = vadd.f32 %v409_v41, %v408_v40 }
 0x113   : > { %v411_v43 = vrot.slane %v410_v42, 1 }
 0x115   : > { %v412_v44 = vadd.f32 %v411_v43, %v410_v42 }
 0x117   : > { %v413_v45 = vmul.f32 0.015625, %v412_v44 }
 0x119   : > { %v414_v46 = vsub.f32 %v329_v22, %v413_v45  ;;  %v415_v47 = vsub.f32 %v332_v27, %v413_v45  ;;  %v416_v48 = vsub.f32 %v639_v20, %v413_v45  ;;  %v417_v49 = vsub.f32 %v640_v24, %v413_v45  ;;  %443 = vst [vmem:[%s214_s20] sm:$0x1] %v413_v45 }
 0x11a   : > { %v418_v50 = vsub.f32 %v345_v23, %v413_v45  ;;  %v419_v51 = vsub.f32 %v348_v29, %v413_v45  ;;  %v420_v52 = vsub.f32 %v643_v21, %v413_v45  ;;  %v421_v53 = vsub.f32 %v644_v25, %v413_v45 }
 0x11b   : > { %v422_v54 = vmul.f32 %v414_v46, %v414_v46  ;;  %v423_v55 = vmul.f32 %v415_v47, %v415_v47  ;;  %v424_v56 = vmul.f32 %v416_v48, %v416_v48  ;;  %v425_v58 = vmul.f32 %v417_v49, %v417_v49 }
 0x11c   : > { %v426_v60 = vmul.f32 %v418_v50, %v418_v50  ;;  %v427_v62 = vmul.f32 %v419_v51, %v419_v51  ;;  %v428_v0 = vmul.f32 %v420_v52, %v420_v52  ;;  %v429_v2 = vmul.f32 %v421_v53, %v421_v53 }
 0x11d   : > { %v430_v57 = vadd.f32 %v423_v55, %v422_v54 }
 0x11f   : > { %v431_v59 = vadd.f32 %v430_v57, %v424_v56 }
 0x121   : > { %v432_v61 = vadd.f32 %v431_v59, %v425_v58 }
 0x123   : > { %v433_v63 = vadd.f32 %v432_v61, %v426_v60 }
 0x125   : > { %v434_v1 = vadd.f32 %v433_v63, %v427_v62 }
 0x127   : > { %v435_v3 = vadd.f32 %v434_v1, %v428_v0 }
 0x129   : > { %v436_v4 = vadd.f32 %v435_v3, %v429_v2 }
 0x12b   : > { %v437_v5 = vrot.slane %v436_v4, 4 }
 0x12d   : > { %v438_v6 = vadd.f32 %v437_v5, %v436_v4 }
 0x12f   : > { %v439_v7 = vrot.slane %v438_v6, 2 }
 0x131   : > { %v440_v8 = vadd.f32 %v439_v7, %v438_v6 }
 0x133   : > { %v441_v9 = vrot.slane %v440_v8, 1 }
 0x135   : > { %v442_v10 = vadd.f32 %v441_v9, %v440_v8 }
 0x137   : > { %444 = vst [vmem:[%s217_s23] sm:$0x1] %v442_v10 }
 0x138 PF: > { %s15_s15 = sadd.s32 1, %s683_s15  }
 0x139   : > { %p12_p5 = scmp.ge.s32.totalorder %s15_s15, 4  }
 0x13b   :  { %14 = sbr.rel (!%p12_p5) target bundleno = 1 (0x1), region = 82 }

// kernel: bottleneck_forward.6
= control target key start
LH: loop header
LB: loop body
LE: loop exit
PB: predicated region body
PF: predicated region fallthrough
CT: control target
= control target key end

     0   :  { %s770_s21 = smov 0   ;;  %s836_s0 = inlined_call_operand.vmem [shape: bf16[128,128], index: 0, kind: input, shape index: {}]   ;;  %s837_s1 = inlined_call_operand.vmem [shape: f32[1,128], index: 1, kind: input, shape index: {}]   ;;  %s838_s2 = inlined_call_operand.vmem [shape: f32[1,128], index: 2, kind: input, shape index: {}]   ;;  %s839_s3 = inlined_call_operand.vmem [shape: bf16[128,128], index: 3, kind: input, shape index: {}]   ;;  %s840_s4 = inlined_call_operand.vmem [shape: f32[128,128], index: 4, kind: output, shape index: {0}]   ;;  %s841_s5 = inlined_call_operand.vmem [shape: f32[2,1,128], index: 5, kind: output, shape index: {1}]   ;;  %s842_s6 = inlined_call_operand.vmem [shape: f32[2,1,128], index: 6, kind: output, shape index: {2}]  }
   0x1 LB: > { %s776_s22 = sadd.s32 4294967295, %s733_s21   ;;  %p623_p0 = scmp.ge.s32.totalorder %s733_s21, 1  ;;  %s733_s21 = sphi %s770_s21, %s17_s21  }
   0x2   : > { %p218_p1 = scmp.lt.s32.totalorder %s733_s21, 3 }
   0x4   : > { %p219_p2 = pnand %p623_p0, %p218_p1 }
   0x5   : > { %v719_v0 = vld [vmem:[%s839_s3] sm:$0xff] (!%p219_p2)   ;;  %s624_s25 = sshll.u32 (!%p219_p2), %s776_s22, 3  ;;  %v720_v1 = vld [vmem:[%s839_s3 + $0x8] sm:$0xff] (!%p219_p2)   ;;  %v721_v2 = vld [vmem:[%s839_s3 + $0x10] sm:$0xff] (!%p219_p2)   ;;  %p266_p4 = scmp.lt.s32.totalorder (!%p219_p2), %s776_s22, 1 }
   0x6   : > { %222 = sbr.rel (%p219_p2) target bundleno = 313 (0x139), region = 36  ;;  %p255_p3 = scmp.lt.s32.totalorder (!%p219_p2), %s624_s25, 15  ;;  %671 = vmatprep.subr.bf16.mxu0 (!%p219_p2), %v719_v0  ;;  %695 = vmatprep.subr.bf16.mxu1 (!%p219_p2), %v719_v0  ;;  %v722_v3 = vld [vmem:[%s839_s3 + $0x18] sm:$0xff] (!%p219_p2)   ;;  %v628_v5 = vld [vmem:[%s837_s1] ss:$0 sm:$0xff] (!%p219_p2)  ;;  %v724_v29 = vld [vmem:[%s839_s3 + $0x28] sm:$0xff] (!%p219_p2)  }
   0x7   : > { %672 = vmatpush3.bf16.msra.mxu0 (!%p219_p2), %v719_v0  ;;  %703 = vmatpush3.bf16.msra.mxu1 (!%p219_p2), %v719_v0  ;;  %v629_v9 = vld [vmem:[%s838_s2] ss:$0 sm:$0xff] (!%p219_p2)  ;;  %v725_v38 = vld [vmem:[%s839_s3 + $0x30] sm:$0xff] (!%p219_p2)   ;;  %v726_v43 = vld [vmem:[%s839_s3 + $0x38] sm:$0xff] (!%p219_p2)  }
   0x8   : > { %673 = vmatprep.subr.bf16.mxu0 (!%p219_p2), %v720_v1  ;;  %696 = vmatprep.subr.bf16.mxu1 (!%p219_p2), %v720_v1  ;;  %v723_v16 = vld [vmem:[%s839_s3 + $0x20] sm:$0xff] (!%p219_p2)  }
   0xb   : > { %674 = vmatpush3.bf16.msra.mxu0 (!%p219_p2), %v720_v1  ;;  %704 = vmatpush3.bf16.msra.mxu1 (!%p219_p2), %v720_v1 }
   0xc   : > { %675 = vmatprep.subr.bf16.mxu0 (!%p219_p2), %v721_v2  ;;  %697 = vmatprep.subr.bf16.mxu1 (!%p219_p2), %v721_v2 }
   0xd   : > { %s844_s25 = smov (!%p255_p3, %s624_s25), 15  ;;  %s846_s22 = smov (!%p266_p4, %s776_s22), 1 }
   0xe   : > { %s625_s30 = sshll.u32 %s844_s25, 2  ;;  %s627_s27 = sshll.u32 %s844_s25, 3 }
   0xf   : > { %s258_s9 = scalar_lea.vmem %s836_s0, %s625_s30  ;;  %676 = vmatpush3.bf16.msra.mxu0 %v721_v2  ;;  %705 = vmatpush3.bf16.msra.mxu1 %v721_v2  ;;  %s264_s30 = scalar_lea.vmem %s840_s4, %s627_s27 }
  0x10   : > { %v641_v4 = vld [vmem:[%s258_s9] sm:$0xff]   ;;  %v657_v8 = vld [vmem:[%s258_s9 + $0x10] sm:$0xff]   ;;  %v656_v10 = vld [vmem:[%s258_s9 + $0x8] sm:$0xff]   ;;  %677 = vmatprep.subr.bf16.mxu0 %v722_v3  ;;  %698 = vmatprep.subr.bf16.mxu1 %v722_v3  ;;  %s268_s8 = scalar_lea.vmem %s841_s5, %s846_s22  ;;  %s271_s11 = scalar_lea.vmem %s842_s6, %s846_s22 }
  0x11   : > { %v642_v6 = vunpack.c.l.bf16 %v641_v4  ;;  %v643_v7 = vunpack.c.h.bf16 %v641_v4  ;;  %v650_v11 = vunpack.c.l.bf16 %v657_v8  ;;  %v651_v12 = vunpack.c.h.bf16 %v657_v8  ;;  %v658_v15 = vld [vmem:[%s258_s9 + $0x18] sm:$0xff]  }
  0x12   : > { %v646_v20 = vunpack.c.l.bf16 %v656_v10  ;;  %v647_v22 = vunpack.c.h.bf16 %v656_v10  ;;  %v654_v24 = vunpack.c.l.bf16 %v658_v15  ;;  %v655_v25 = vunpack.c.h.bf16 %v658_v15 }
  0x13   : > { %v296_v13 = vmul.f32 %v642_v6, %v628_v5  ;;  %v297_v14 = vmul.f32 %v643_v7, %v628_v5  ;;  %v300_v17 = vmul.f32 %v650_v11, %v628_v5  ;;  %v301_v21 = vmul.f32 %v651_v12, %v628_v5  ;;  %678 = vmatpush3.bf16.msra.mxu0 %v722_v3 }
  0x14   : > { %706 = vmatpush3.bf16.msra.mxu1 %v722_v3  ;;  %679 = vmatprep.subr.bf16.mxu0 %v723_v16  ;;  %v298_v33 = vmul.f32 %v646_v20, %v628_v5  ;;  %v299_v34 = vmul.f32 %v647_v22, %v628_v5  ;;  %v302_v35 = vmul.f32 %v654_v24, %v628_v5 }
  0x15   : > { %v311_v18 = vadd.f32 %v629_v9, %v296_v13  ;;  %v312_v19 = vadd.f32 %v629_v9, %v297_v14  ;;  %v315_v23 = vadd.f32 %v629_v9, %v300_v17  ;;  %v316_v28 = vadd.f32 %v629_v9, %v301_v21  ;;  %699 = vmatprep.subr.bf16.mxu1 %v723_v16 }
  0x16   : > { %v303_v36 = vmul.f32 %v655_v25, %v628_v5  ;;  %v313_v39 = vadd.f32 %v629_v9, %v298_v33  ;;  %v314_v40 = vadd.f32 %v629_v9, %v299_v34  ;;  %v317_v41 = vadd.f32 %v629_v9, %v302_v35 }
  0x17   : > { %v319_v26 = vmax.f32 %v311_v18, 0.0  ;;  %v320_v27 = vmax.f32 %v312_v19, 0.0  ;;  %v323_v30 = vmax.f32 %v315_v23, 0.0  ;;  %v324_v32 = vmax.f32 %v316_v28, 0.0  ;;  %680 = vmatpush3.bf16.msra.mxu0 %v723_v16 }
  0x18   : > { %707 = vmatpush3.bf16.msra.mxu1 %v723_v16  ;;  %681 = vmatprep.subr.bf16.mxu0 %v724_v29  ;;  %v318_v42 = vadd.f32 %v629_v9, %v303_v36  ;;  %v321_v44 = vmax.f32 %v313_v39, 0.0  ;;  %v322_v45 = vmax.f32 %v314_v40, 0.0  ;;  %v325_v46 = vmax.f32 %v317_v41, 0.0 }
  0x19   : > { %v327_v31 = vpack.c.bf16 %v320_v27, %v319_v26  ;;  %v329_v37 = vpack.c.bf16 %v324_v32, %v323_v30  ;;  %700 = vmatprep.subr.bf16.mxu1 %v724_v29 }
  0x1a   : > { %v326_v47 = vmax.f32 %v318_v42, 0.0  ;;  %v328_v48 = vpack.c.bf16 %v322_v45, %v321_v44 }
  0x1b   : > { %687 = vmatprep.mubr.bf16.mxu0 %v327_v31  ;;  %691 = vmatprep.mubr.bf16.mxu1 %v329_v37 }
  0x1c   : > { %682 = vmatpush3.bf16.msra.mxu0 %v724_v29  ;;  %708 = vmatpush3.bf16.msra.mxu1 %v724_v29  ;;  %v330_v49 = vpack.c.bf16 %v326_v47, %v325_v46 }
  0x1d   : > { %683 = vmatprep.subr.bf16.mxu0 %v725_v38  ;;  %701 = vmatprep.subr.bf16.mxu1 %v725_v38 }
  0x20   : > { %684 = vmatpush3.bf16.msra.mxu0 %v725_v38  ;;  %709 = vmatpush3.bf16.msra.mxu1 %v725_v38 }
  0x21   : > { %685 = vmatprep.subr.bf16.mxu0 %v726_v43  ;;  %702 = vmatprep.subr.bf16.mxu1 %v726_v43 }
  0x24   : > { %686 = vmatpush3.bf16.msra.mxu0 %v726_v43  ;;  %710 = vmatpush3.bf16.msra.mxu1 %v726_v43 }
  0x27   : > { %688 = vmatmul.mubr.bf16.vlgmr.msra.gmra.mrb[0].mxu0 %v328_v48  ;;  %692 = vmatmul.mubr.bf16.vlgmr.msra.gmra.mrb[0].mxu1 %v330_v49 }
  0xfa   : > { %v689_v50 = vpop.f32.mrb[0].mxu0  ;;  %v693_v51 = vpop.f32.mrb[0].mxu1 }
  0xfb   : > { %462 = vst [vmem:[%s264_s30 + $0x10] sm:$0xff] %v689_v50  ;;  %v429_v52 = vpop.f32.mrb[1].mxu0  ;;  %466 = vst [vmem:[%s264_s30 + $0x30] sm:$0xff] %v693_v51  ;;  %v445_v53 = vpop.f32.mrb[1].mxu1 }
  0xfc   : > { %460 = vst [vmem:[%s264_s30] sm:$0xff] %v429_v52  ;;  %v690_v54 = vpop.f32.mrb[2].mxu0  ;;  %464 = vst [vmem:[%s264_s30 + $0x20] sm:$0xff] %v445_v53  ;;  %v694_v55 = vpop.f32.mrb[2].mxu1 }
  0xfd   : > { %463 = vst [vmem:[%s264_s30 + $0x18] sm:$0xff] %v690_v54  ;;  %v432_v56 = vpop.f32.mrb[3].mxu0  ;;  %467 = vst [vmem:[%s264_s30 + $0x38] sm:$0xff] %v694_v55  ;;  %v448_v57 = vpop.f32.mrb[3].mxu1 }
  0xfe   : > { %461 = vst [vmem:[%s264_s30 + $0x8] sm:$0xff] %v432_v56  ;;  %v468_v58 = vadd.f32 %v432_v56, %v429_v52  ;;  %465 = vst [vmem:[%s264_s30 + $0x28] sm:$0xff] %v448_v57 }
 0x100   : > { %v469_v59 = vadd.f32 %v689_v50, %v468_v58 }
 0x102   : > { %v470_v60 = vadd.f32 %v690_v54, %v469_v59 }
 0x104   : > { %v471_v61 = vadd.f32 %v470_v60, %v445_v53 }
 0x106   : > { %v472_v62 = vadd.f32 %v471_v61, %v448_v57 }
 0x108   : > { %v473_v63 = vadd.f32 %v693_v51, %v472_v62 }
 0x10a   : > { %v474_v0 = vadd.f32 %v694_v55, %v473_v63 }
 0x10c   : > { %v475_v1 = vrot.slane %v474_v0, 4 }
 0x10e   : > { %v476_v2 = vadd.f32 %v475_v1, %v474_v0 }
 0x110   : > { %v477_v3 = vrot.slane %v476_v2, 2 }
 0x112   : > { %v478_v4 = vadd.f32 %v477_v3, %v476_v2 }
 0x114   : > { %v479_v5 = vrot.slane %v478_v4, 1 }
 0x116   : > { %v480_v6 = vadd.f32 %v479_v5, %v478_v4 }
 0x118   : > { %v481_v7 = vmul.f32 0.015625, %v480_v6 }
 0x11a   : > { %v482_v8 = vsub.f32 %v429_v52, %v481_v7  ;;  %v483_v9 = vsub.f32 %v432_v56, %v481_v7  ;;  %v484_v10 = vsub.f32 %v689_v50, %v481_v7  ;;  %v485_v11 = vsub.f32 %v690_v54, %v481_v7  ;;  %511 = vst [vmem:[%s268_s8] sm:$0x1] %v481_v7 }
 0x11b   : > { %v486_v12 = vsub.f32 %v445_v53, %v481_v7  ;;  %v487_v13 = vsub.f32 %v448_v57, %v481_v7  ;;  %v488_v14 = vsub.f32 %v693_v51, %v481_v7  ;;  %v489_v15 = vsub.f32 %v694_v55, %v481_v7 }
 0x11c   : > { %v490_v16 = vmul.f32 %v482_v8, %v482_v8  ;;  %v491_v17 = vmul.f32 %v483_v9, %v483_v9  ;;  %v492_v18 = vmul.f32 %v484_v10, %v484_v10  ;;  %v493_v20 = vmul.f32 %v485_v11, %v485_v11 }
 0x11d   : > { %v494_v22 = vmul.f32 %v486_v12, %v486_v12  ;;  %v495_v24 = vmul.f32 %v487_v13, %v487_v13  ;;  %v496_v26 = vmul.f32 %v488_v14, %v488_v14  ;;  %v497_v28 = vmul.f32 %v489_v15, %v489_v15 }
 0x11e   : > { %v498_v19 = vadd.f32 %v491_v17, %v490_v16 }
 0x120   : > { %v499_v21 = vadd.f32 %v498_v19, %v492_v18 }
 0x122   : > { %v500_v23 = vadd.f32 %v499_v21, %v493_v20 }
 0x124   : > { %v501_v25 = vadd.f32 %v500_v23, %v494_v22 }
 0x126   : > { %v502_v27 = vadd.f32 %v501_v25, %v495_v24 }
 0x128   : > { %v503_v29 = vadd.f32 %v502_v27, %v496_v26 }
 0x12a   : > { %v504_v30 = vadd.f32 %v503_v29, %v497_v28 }
 0x12c   : > { %v505_v31 = vrot.slane %v504_v30, 4 }
 0x12e   : > { %v506_v32 = vadd.f32 %v505_v31, %v504_v30 }
 0x130   : > { %v507_v33 = vrot.slane %v506_v32, 2 }
 0x132   : > { %v508_v34 = vadd.f32 %v507_v33, %v506_v32 }
 0x134   : > { %v509_v35 = vrot.slane %v508_v34, 1 }
 0x136   : > { %v510_v36 = vadd.f32 %v509_v35, %v508_v34 }
 0x138   : > { %512 = vst [vmem:[%s271_s11] sm:$0x1] %v510_v36 }
 0x139 PF: > { %s17_s21 = sadd.s32 1, %s733_s21  }
 0x13a   : > { %p14_p5 = scmp.ge.s32.totalorder %s17_s21, 4  }
 0x13c   :  { %16 = sbr.rel (!%p14_p5) target bundleno = 1 (0x1), region = 90 }

// kernel: bottleneck_forward.7
= control target key start
LH: loop header
LB: loop body
LE: loop exit
PB: predicated region body
PF: predicated region fallthrough
CT: control target
= control target key end

     0   :  { %9 = vsyncpa [#allocation3], 0  ;;  %s657_s0 = inlined_call_operand.vmem [shape: f32[128,128], index: 0, kind: input, shape index: {}]   ;;  %s658_s1 = inlined_call_operand.vmem [shape: f32[1,128], index: 1, kind: input, shape index: {}]   ;;  %s659_s2 = inlined_call_operand.vmem [shape: f32[1,128], index: 2, kind: input, shape index: {}]   ;;  %s660_s3 = inlined_call_operand.vmem [shape: f32[128,128], index: 3, kind: input, shape index: {}]   ;;  %s661_s4 = inlined_call_operand.hbm [shape: f32[128,128], index: 4, kind: output, shape index: {}]  }
   0x1   :  { %11 = vsyncpa [#allocation3 + $0x1], 0  ;;  %s529_s15 = smov 0   ;;  %s531_s16 = smov 0  }
   0x2   :  { %s533_s17 = smov 0   ;;  %s535_s18 = smov 0  }
   0x3 LB: > { %s550_s19 = sadd.s32 4294967295, %s499_s18   ;;  %s379_s20 = sadd.s32 4294967294, %s499_s18   ;;  %s499_s18 = sphi %s535_s18, %s667_s18   ;;  %s495_s17 = sphi %s533_s17, %s666_s17   ;;  %s491_s16 = sphi %s531_s16, %s665_s16   ;;  %s487_s15 = sphi %s529_s15, %s664_s15  }
   0x4   : > { %s554_s21 = sadd.s32 1, %s499_s18   ;;  %s118_s22 = sadd.s32 1, %s495_s17 }
   0x5   : > { %s115_s23 = ssub.s32 %s499_s18, %s554_s21  ;;  %p128_p0 = scmp.ne.s32.totalorder %s495_s17, %s491_s16 }
   0x6   : > { %p116_p1 = scmp.eq.s32.totalorder %s115_s23, 0  ;;  %p129_p2 = scmp.eq.s32.totalorder %s550_s19, 1 }
   0x7   : > { %p134_p3 = scmp.ne.s32.totalorder %s491_s16, %s487_s15  ;;  %p135_p4 = scmp.eq.s32.totalorder %s379_s20, 1 }
   0x8   : > { %s565_s24 = scalar_select %p116_p1, %s495_s17, %s118_s22  }
   0x9   : > { %p567_p5 = por %p129_p2, %p128_p0  ;;  %p571_p6 = por %p135_p4, %p134_p3 }
   0xa   : > { %p382_p7 = scmp.ge.s32.totalorder %s499_s18, 1  ;;  %p177_p8 = scmp.lt.s32.totalorder %s499_s18, 3 }
   0xc   : > { %p178_p9 = pnand %p382_p7, %p177_p8 }
   0xd   : > { %s384_s27 = sshll.u32 (!%p178_p9), %s550_s19, 3  ;;  %s205_s28 = sand.u32 (!%p178_p9), 1, %s491_s16   ;;  %v388_v0 = vld [vmem:[%s658_s1] ss:$0 sm:$0xff] (!%p178_p9) }
   0xe   : > { %181 = sbr.rel (%p178_p9) target bundleno = 53 (0x35), region = 36  ;;  %p209_p10 = scmp.lt.s32.totalorder (!%p178_p9), %s384_s27, 15  ;;  %v389_v2 = vld [vmem:[%s659_s2] ss:$0 sm:$0xff] (!%p178_p9) }
   0xf   : > { %s596_s14 = sshll.u32 (!%p178_p9), %s205_s28, 6  ;;  %s395_s23 = sshll.u32 (!%p178_p9), %s550_s19, 10 }
  0x10   : > { %s207_s20 = scalar_lea.vmem (!%p178_p9), [#allocation2], %s596_s14  ;;  %s612_s19 = scalar_lea.hbm (!%p178_p9), %s661_s4, %s395_s23 }
  0x11   : > { %s305_s22 = sshll.u32 (!%p178_p9), %s207_s20, 4  ;;  %s616_s30 = scalar_lea.sflag (!%p178_p9), [#allocation3], %s205_s28  ;;  %s607_s22 = int_to_ptr.vmem [resolvable:$true] %s305_s22 }
  0x12   : > { %s437_s5 = scalar_lea.vmem (!%p178_p9), %s607_s22, 1024  ;;  %s501_s6 = smov (!%p178_p9), [#allocation2]  }
  0x13   : > { %p438_p11 = scmp.ne.s32.totalorder (!%p178_p9), %s607_s22, %s437_s5  ;;  %s441_s7 = sshll.u32 (!%p178_p9), %s501_s6, 4  ;;  %s442_s7 = int_to_ptr.vmem [resolvable:$false] %s441_s7 }
  0x14   : > { %p444_p0 = scmp.lt.s32.totalorder (!%p178_p9), %s607_s22, %s442_s7 }
  0x15   : > { %s669_s27 = smov (!%p209_p10, %s384_s27), 15  ;;  %p439_p12 = pnand %p438_p11, %p567_p5 }
  0x16   : > { %s385_s29 = sshll.u32 %s669_s27, 3 }
  0x17   : > { %s212_s8 = scalar_lea.vmem %s657_s0, %s385_s29  ;;  %s588_s11 = scalar_lea.vmem %s660_s3, %s385_s29 }
  0x18   : > { %v221_v1 = vld [vmem:[%s212_s8] sm:$0xff]  ;;  %v222_v3 = vld [vmem:[%s212_s8 + $0x8] sm:$0xff]  ;;  %v223_v7 = vld [vmem:[%s212_s8 + $0x10] sm:$0xff]  ;;  %p440_p13 = pneg %p439_p12 }
  0x19   : > { %v236_v4 = vmul.f32 %v388_v0, %v221_v1  ;;  %v259_v5 = vld [vmem:[%s588_s11] sm:$0xff]  ;;  %v237_v6 = vmul.f32 %v388_v0, %v222_v3  ;;  %v260_v8 = vld [vmem:[%s588_s11 + $0x8] sm:$0xff]  ;;  %v238_v9 = vmul.f32 %v388_v0, %v223_v7  ;;  %v224_v10 = vld [vmem:[%s212_s8 + $0x18] sm:$0xff] }
  0x1a   : > { %v225_v11 = vld [vmem:[%s212_s8 + $0x20] sm:$0xff]  ;;  %v261_v14 = vld [vmem:[%s588_s11 + $0x10] sm:$0xff]  ;;  %v239_v15 = vmul.f32 %v388_v0, %v224_v10  ;;  %v262_v16 = vld [vmem:[%s588_s11 + $0x18] sm:$0xff] }
  0x1b   : > { %v251_v12 = vadd.f32 %v389_v2, %v236_v4  ;;  %v252_v13 = vadd.f32 %v389_v2, %v237_v6  ;;  %v240_v17 = vmul.f32 %v388_v0, %v225_v11  ;;  %v226_v18 = vld [vmem:[%s212_s8 + $0x28] sm:$0xff]  ;;  %v253_v19 = vadd.f32 %v389_v2, %v238_v9  ;;  %v263_v20 = vld [vmem:[%s588_s11 + $0x20] sm:$0xff]  ;;  %v227_v22 = vld [vmem:[%s212_s8 + $0x30] sm:$0xff] }
  0x1c   : > { %v241_v21 = vmul.f32 %v388_v0, %v226_v18  ;;  %v228_v23 = vld [vmem:[%s212_s8 + $0x38] sm:$0xff]  ;;  %v254_v26 = vadd.f32 %v389_v2, %v239_v15  ;;  %v264_v28 = vld [vmem:[%s588_s11 + $0x28] sm:$0xff]  ;;  %v242_v31 = vmul.f32 %v388_v0, %v227_v22  ;;  %v265_v37 = vld [vmem:[%s588_s11 + $0x30] sm:$0xff]  ;;  %s443_s8 = scalar_lea.vmem %s442_s7, 2048 }
  0x1d   : > { %v267_v24 = vadd.f32 %v259_v5, %v251_v12  ;;  %v268_v25 = vadd.f32 %v260_v8, %v252_v13  ;;  %v255_v27 = vadd.f32 %v389_v2, %v240_v17  ;;  %v269_v29 = vadd.f32 %v261_v14, %v253_v19  ;;  %v266_v38 = vld [vmem:[%s588_s11 + $0x38] sm:$0xff]  ;;  %p445_p1 = scmp.lt.s32.totalorder %s443_s8, %s437_s5 }
  0x1e   : > { %v256_v30 = vadd.f32 %v389_v2, %v241_v21  ;;  %v243_v32 = vmul.f32 %v388_v0, %v228_v23  ;;  %v270_v35 = vadd.f32 %v262_v16, %v254_v26  ;;  %v257_v41 = vadd.f32 %v389_v2, %v242_v31 }
  0x1f   : > { %v275_v33 = vmax.f32 %v267_v24, 0.0  ;;  %v276_v34 = vmax.f32 %v268_v25, 0.0  ;;  %v271_v36 = vadd.f32 %v263_v20, %v255_v27  ;;  %v277_v39 = vmax.f32 %v269_v29, 0.0  ;;  %p446_p2 = por %p445_p1, %p444_p0 }
  0x20   : > { %v272_v40 = vadd.f32 %v264_v28, %v256_v30  ;;  %v258_v42 = vadd.f32 %v389_v2, %v243_v32  ;;  %v278_v43 = vmax.f32 %v270_v35, 0.0  ;;  %v273_v46 = vadd.f32 %v265_v37, %v257_v41 }
  0x21   : > { %283 = vst [vmem:[%s207_s20] sm:$0xff] %v275_v33  ;;  %284 = vst [vmem:[%s207_s20 + $0x8] sm:$0xff] %v276_v34  ;;  %v279_v44 = vmax.f32 %v271_v36, 0.0  ;;  %p447_p3 = pnand %p446_p2, %p440_p13 }
  0x22   : > { %285 = vst [vmem:[%s207_s20 + $0x10] sm:$0xff] %v277_v39  ;;  %v280_v45 = vmax.f32 %v272_v40, 0.0  ;;  %v274_v47 = vadd.f32 %v266_v38, %v258_v42  ;;  %286 = vst [vmem:[%s207_s20 + $0x18] sm:$0xff] %v278_v43  ;;  %v281_v48 = vmax.f32 %v273_v46, 0.0 }
  0x23   : > { %287 = vst [vmem:[%s207_s20 + $0x20] sm:$0xff] %v279_v44 }
  0x24   : > { %288 = vst [vmem:[%s207_s20 + $0x28] sm:$0xff] %v280_v45  ;;  %v282_v49 = vmax.f32 %v274_v47, 0.0  ;;  %289 = vst [vmem:[%s207_s20 + $0x30] sm:$0xff] %v281_v48 }
  0x26   : > { %290 = vst [vmem:[%s207_s20 + $0x38] sm:$0xff] %v282_v49 }
  0x27   : > { %450 = shalt.err (!%p447_p3)
}
  0x28   : > { %s451_s28 = scalar_lea.hbm %s612_s19, 1024  ;;  %s455_s11 = scalar_lea.hbm %s661_s4, 2048 }
  0x29   : > { %p452_p4 = scmp.ne.s32.totalorder %s612_s19, %s451_s28  ;;  %p456_p9 = scmp.lt.u32.totalorder %s612_s19, %s661_s4 }
  0x2a   : > { %p457_p10 = scmp.lt.u32.totalorder %s455_s11, %s451_s28  ;;  %p459_p12 = scmp.lt.u32.totalorder %s451_s28, %s612_s19 }
  0x2b   : > { %p453_p7 = pnand %p452_p4, %p567_p5 }
  0x2c   : > { %p458_p11 = por %p457_p10, %p456_p9 }
  0x2d   : > { %p454_p8 = pneg %p453_p7 }
  0x2e   : > { %p460_p13 = por %p459_p12, %p458_p11 }
  0x30   : > { %p461_p0 = pnand %p460_p13, %p454_p8 }
  0x32   : > { %464 = shalt.err (!%p461_p0)
}
  0x33   : > { %s502_s14 = smov 128   ;;  %s503_s20 = smov 8  }
  0x34   : > { %396 = dma.vmem_to_hbm [thread:$0]  (%p567_p5), %s607_s22, 1024, %s612_s19, %s616_s30, %s502_s14, %s502_s14, %s503_s20  }
  0x35 PF: > { %p402_p1 = scmp.ge.s32.totalorder %s499_s18, 2  ;;  %s320_s23 = sand.u32 1, %s487_s15  }
  0x36   : > { %s321_s27 = scalar_lea.sflag [#allocation3], %s320_s23 }
  0x37   : > { %p399_p2 = pnand %p402_p1, %p571_p6 }
  0x39   : > { %482 = dma.done.wait (!%p399_p2), %s321_s27, 1024  }
  0x3a   : > { %484 = vsyncadd (!%p399_p2), %s321_s27, 4294966272  ;;  %p14_p3 = scmp.ge.s32.totalorder %s554_s21, 4   ;;  %s664_s15 = smov %s491_s16 }
  0x3b   : > { %s665_s16 = smov %s495_s17  ;;  %s666_s17 = smov %s565_s24 }
  0x3c   : > { %s667_s18 = smov %s554_s21  ;;  %16 = sbr.rel (!%p14_p3) target bundleno = 3 (0x3), region = 74 }
  0x43   :  { %326 = vsyncpa [#allocation3], 1 }
  0x44   :  { %328 = vsyncpa [#allocation3 + $0x1], 1 }

// kernel: bottleneck_forward.5
= control target key start
LH: loop header
LB: loop body
LE: loop exit
PB: predicated region body
PF: predicated region fallthrough
CT: control target
= control target key end

     0   :  { %s3029_s21 = smov 0   ;;  %s3563_s0 = inlined_call_operand.vmem [shape: bf16[2,8,8,128], index: 0, kind: input, shape index: {}]   ;;  %s3564_s1 = inlined_call_operand.vmem [shape: f32[1,128], index: 1, kind: input, shape index: {}]   ;;  %s3565_s2 = inlined_call_operand.vmem [shape: f32[1,128], index: 2, kind: input, shape index: {}]   ;;  %s3566_s3 = inlined_call_operand.vmem [shape: bf16[1152,128], index: 3, kind: input, shape index: {}]   ;;  %s3567_s4 = inlined_call_operand.vmem [shape: bf16[128,128], index: 4, kind: output, shape index: {0}]   ;;  %s3568_s5 = inlined_call_operand.vmem [shape: f32[2,1,128], index: 5, kind: output, shape index: {1}]   ;;  %s3569_s6 = inlined_call_operand.vmem [shape: f32[2,1,128], index: 6, kind: output, shape index: {2}]  }
   0x1 LB: > { %s3035_s22 = sadd.s32 4294967295, %s2991_s21   ;;  %p2441_p0 = scmp.ge.s32.totalorder %s2991_s21, 1  ;;  %s2991_s21 = sphi %s3029_s21, %s17_s21  }
   0x2   : > { %p217_p1 = scmp.lt.s32.totalorder %s2991_s21, 3 }
   0x4   : > { %p218_p2 = pnand %p2441_p0, %p217_p1 }
   0x5   : > { %v2861_v0 = vld [vmem:[%s3566_s3 + $0x40] sm:$0xff] (!%p218_p2)   ;;  %v2993_v3 = vmov (!%p218_p2), 0   ;;  %v2864_v4 = vld [vmem:[%s3566_s3 + $0x48] sm:$0xff] (!%p218_p2)   ;;  %v2868_v8 = vld [vmem:[%s3566_s3 + $0x50] sm:$0xff] (!%p218_p2)   ;;  %p253_p3 = scmp.lt.s32.totalorder (!%p218_p2), %s3035_s22, 1  ;;  %vm342_vm0 = vcmask (!%p218_p2), 1040384  }
   0x6   : > { %221 = sbr.rel (%p218_p2) target bundleno = 453 (0x1c5), region = 36  ;;  %v2862_v1 = vld [vmem:[%s3566_s3] sm:$0xff] (!%p218_p2)   ;;  %2640 = vmatprep.subr.bf16.mxu0 (!%p218_p2), %v2861_v0  ;;  %341 = vst [vmem:[#allocation3] sm:$0xf] (!%p218_p2), %v2993_v3  ;;  %457 = vst [vmem:[#allocation3 + $0x4] sm:$0xf] (!%p218_p2), %v2993_v3 }
   0x7   : > { %v2863_v2 = vld [vmem:[%s3566_s3 + $0xc0] sm:$0xff] (!%p218_p2)   ;;  %472 = vst [vmem:[#allocation3 + $0x8] sm:$0xf] (!%p218_p2), %v2993_v3  ;;  %873 = vst [vmem:[#allocation3 + $0x114] sm:$0xf] (!%p218_p2), %v2993_v3  ;;  %2641 = vmatpush3.bf16.msra.mxu0 (!%p218_p2), %v2862_v1  ;;  %v2866_v6 = vld [vmem:[%s3566_s3 + $0x8] sm:$0xff] (!%p218_p2)  }
   0x8   : > { %983 = vst [vmem:[#allocation3 + $0x118] sm:$0xf] (!%p218_p2), %v2993_v3  ;;  %998 = vst [vmem:[#allocation3 + $0x11c] sm:$0xf] (!%p218_p2), %v2993_v3  ;;  %2680 = vmatprep.subr.bf16.mxu1 (!%p218_p2), %v2863_v2  ;;  %v2865_v5 = vld [vmem:[%s3566_s3 + $0x80] sm:$0xff] (!%p218_p2)   ;;  %2642 = vmatprep.subr.bf16.mxu0 (!%p218_p2), %v2864_v4  ;;  %v2867_v7 = vld [vmem:[%s3566_s3 + $0xc8] sm:$0xff] (!%p218_p2)  }
   0x9   : > { %2681 = vmatpush3.bf16.msra.mxu1 (!%p218_p2), %v2865_v5  ;;  %v2869_v9 = vld [vmem:[%s3566_s3 + $0x88] sm:$0xff] (!%p218_p2)   ;;  %v2870_v10 = vld [vmem:[%s3566_s3 + $0x10] sm:$0xff] (!%p218_p2)   ;;  %v2872_v12 = vld [vmem:[%s3566_s3 + $0x58] sm:$0xff] (!%p218_p2)   ;;  %vm343_vm1 = vsmask.f32 (!%p218_p2), 256  ;;  %vm473_vm3 = vcmask (!%p218_p2), 1043459  }
   0xa   : > { %2682 = vmatprep.subr.bf16.mxu1 (!%p218_p2), %v2867_v7  ;;  %v2871_v11 = vld [vmem:[%s3566_s3 + $0xd0] sm:$0xff] (!%p218_p2)   ;;  %v2874_v14 = vld [vmem:[%s3566_s3 + $0x18] sm:$0xff] (!%p218_p2)   ;;  %v2876_v16 = vld [vmem:[%s3566_s3 + $0x60] sm:$0xff] (!%p218_p2)   ;;  %vm474_vm4 = vsmask.f32 (!%p218_p2), 7950  ;;  %vm433_vm6 = vcmask (!%p218_p2), 1043456  }
   0xb   : > { %2643 = vmatpush3.bf16.msra.mxu0 (!%p218_p2), %v2866_v6  ;;  %v2873_v13 = vld [vmem:[%s3566_s3 + $0x90] sm:$0xff] (!%p218_p2)   ;;  %v2875_v15 = vld [vmem:[%s3566_s3 + $0xd8] sm:$0xff] (!%p218_p2)   ;;  %v2878_v18 = vld [vmem:[%s3566_s3 + $0x20] sm:$0xff] (!%p218_p2)   ;;  %vm434_vm7 = vsmask.f32 (!%p218_p2), 7938  ;;  %s2444_s29 = sshll.u32 (!%p218_p2), %s3035_s22, 3 }
   0xc   : > { %2644 = vmatprep.subr.bf16.mxu0 (!%p218_p2), %v2868_v8  ;;  %v2877_v17 = vld [vmem:[%s3566_s3 + $0x98] sm:$0xff] (!%p218_p2)   ;;  %v2879_v19 = vld [vmem:[%s3566_s3 + $0xe0] sm:$0xff] (!%p218_p2)   ;;  %v2880_v20 = vld [vmem:[%s3566_s3 + $0x68] sm:$0xff] (!%p218_p2)   ;;  %vm577_vm8 = vsmask.f32 (!%p218_p2), 3328  ;;  %p259_p4 = scmp.lt.s32.totalorder (!%p218_p2), %s2444_s29, 15 }
   0xd   : > { %2683 = vmatpush3.bf16.msra.mxu1 %v2869_v9  ;;  %v2881_v21 = vld [vmem:[%s3566_s3 + $0xa0] sm:$0xff]   ;;  %v2882_v22 = vld [vmem:[%s3566_s3 + $0x28] sm:$0xff]   ;;  %s3107_s23 = scalar_select %p253_p3, %s3035_s22, 1  ;;  %v2884_v24 = vld [vmem:[%s3566_s3 + $0x70] sm:$0xff]  }
   0xe   : > { %2684 = vmatprep.subr.bf16.mxu1 %v2871_v11  ;;  %v2883_v23 = vld [vmem:[%s3566_s3 + $0xe8] sm:$0xff]   ;;  %v2886_v26 = vld [vmem:[%s3566_s3 + $0x30] sm:$0xff]   ;;  %v2888_v28 = vld [vmem:[%s3566_s3 + $0x78] sm:$0xff]   ;;  %s3579_s29 = smov (!%p259_p4, %s2444_s29), 15 }
   0xf   : > { %2645 = vmatpush3.bf16.msra.mxu0 %v2870_v10  ;;  %v2885_v25 = vld [vmem:[%s3566_s3 + $0xa8] sm:$0xff]   ;;  %s2566_s8 = sshll.u32 %s3107_s23, 5  ;;  %v2887_v27 = vld [vmem:[%s3566_s3 + $0xf0] sm:$0xff]   ;;  %v2890_v30 = vld [vmem:[%s3566_s3 + $0x38] sm:$0xff]   ;;  %s2445_s30 = sshll.u32 %s3579_s29, 2 }
  0x10   : > { %2646 = vmatprep.subr.bf16.mxu0 %v2872_v12  ;;  %v2889_v29 = vld [vmem:[%s3566_s3 + $0xb0] sm:$0xff]   ;;  %s3134_s17 = scalar_lea.vmem %s3563_s0, %s2566_s8  ;;  %v2891_v31 = vld [vmem:[%s3566_s3 + $0xf8] sm:$0xff]   ;;  %v3146_v33 = vld [vmem:[%s3564_s1] ss:$0 sm:$0xff]  ;;  %s262_s9 = scalar_lea.vmem %s3567_s4, %s2445_s30 }
  0x11   : > { %2685 = vmatpush3.bf16.msra.mxu1 %v2873_v13  ;;  %v2576_v32 = vld [vmem:[%s3134_s17] sm:$0xff]   ;;  %vm3153_vm2 = vmand %vm342_vm0, %vm343_vm1  ;;  %v2895_v44 = vld [vmem:[%s3566_s3 + $0xb8] sm:$0xff]   ;;  %s266_s11 = scalar_lea.vmem %s3568_s5, %s3107_s23  ;;  %s269_s14 = scalar_lea.vmem %s3569_s6, %s3107_s23 }
  0x12   : > { %2686 = vmatprep.subr.bf16.mxu1 %v2875_v15  ;;  %v3151_v34 = vld [vmem:[%s3565_s2] ss:$0 sm:$0xff]  ;;  %v2577_v35 = vunpack.c.l.bf16 %v2576_v32  ;;  %v2578_v36 = vunpack.c.h.bf16 %v2576_v32  ;;  %v348_v38 = vld [vmem:[#allocation3 + $0x24] sm:$0x1]  ;;  %vm3175_vm5 = vmand %vm473_vm3, %vm474_vm4 }
  0x13   : > { %2647 = vmatpush3.bf16.msra.mxu0 %v2874_v14  ;;  %v345_v37 = vld [vmem:[#allocation3] sm:$0x1]  ;;  %v349_v43 = vsel %vm3153_vm2, 0, %v348_v38  ;;  %v476_v50 = vld [vmem:[#allocation3 + $0x8] sm:$0x8]  ;;  %vm3198_vm9 = vmand %vm433_vm6, %vm434_vm7 }
  0x14   : > { %2648 = vmatprep.subr.bf16.mxu0 %v2876_v16  ;;  %v294_v40 = vmul.f32 %v2577_v35, %v3146_v33  ;;  %v295_v41 = vmul.f32 %v2578_v36, %v3146_v33  ;;  %v346_v42 = vsel %vm3153_vm2, 0, %v345_v37  ;;  %350 = vst [vmem:[#allocation3 + $0x24] sm:$0x1] %v349_v43  ;;  %v2896_v45 = vld [vmem:[%s3566_s3 + $0x140] sm:$0xff]   ;;  %v479_v51 = vld [vmem:[#allocation3 + $0x2c] sm:$0x8]  ;;  %vm3204_vm10 = vmand %vm433_vm6, %vm577_vm8 }
  0x15   : > { %2687 = vmatpush3.bf16.msra.mxu1 %v2877_v17  ;;  %347 = vst [vmem:[#allocation3] sm:$0x1] %v346_v42  ;;  %v2901_v48 = vld [vmem:[%s3566_s3 + $0x1c0] sm:$0xff]   ;;  %v477_v54 = vsel %vm3175_vm5, 0, %v476_v50  ;;  %v480_v55 = vsel %vm3175_vm5, 0, %v479_v51  ;;  %v2631_v61 = vld [vmem:[%s3134_s17 + $0x8] sm:$0xff]  }
  0x16   : > { %2688 = vmatprep.subr.bf16.mxu1 %v2879_v19  ;;  %v309_v46 = vadd.f32 %v3151_v34, %v294_v40  ;;  %v310_v47 = vadd.f32 %v3151_v34, %v295_v41  ;;  %v600_v56 = vld [vmem:[#allocation3 + $0xc] sm:$0x1]  ;;  %478 = vst [vmem:[#allocation3 + $0x8] sm:$0x8] %v477_v54  ;;  %481 = vst [vmem:[#allocation3 + $0x2c] sm:$0x8] %v480_v55  ;;  %v2581_v62 = vunpack.c.l.bf16 %v2631_v61  ;;  %v2582_v63 = vunpack.c.h.bf16 %v2631_v61 }
  0x17   : > { %2649 = vmatpush3.bf16.msra.mxu0 %v2878_v18  ;;  %v601_v57 = vsel %vm3153_vm2, 0, %v600_v56  ;;  %v603_v58 = vld [vmem:[#allocation3 + $0x30] sm:$0x1]  ;;  %v351_v0 = vld [vmem:[#allocation3 + $0x48] sm:$0x1] }
  0x18   : > { %2650 = vmatprep.subr.bf16.mxu0 %v2880_v20  ;;  %v317_v52 = vmax.f32 %v309_v46, 0.0  ;;  %v318_v53 = vmax.f32 %v310_v47, 0.0  ;;  %602 = vst [vmem:[#allocation3 + $0xc] sm:$0x1] %v601_v57  ;;  %v604_v60 = vsel %vm3153_vm2, 0, %v603_v58  ;;  %v352_v2 = vsel %vm3153_vm2, 0, %v351_v0 }
  0x19   : > { %2689 = vmatpush3.bf16.msra.mxu1 %v2881_v21  ;;  %605 = vst [vmem:[#allocation3 + $0x30] sm:$0x1] %v604_v60  ;;  %v354_v1 = vld [vmem:[#allocation3 + $0x6c] sm:$0x1]  ;;  %v296_v4 = vmul.f32 %v2581_v62, %v3146_v33  ;;  %v297_v5 = vmul.f32 %v2582_v63, %v3146_v33  ;;  %353 = vst [vmem:[#allocation3 + $0x48] sm:$0x1] %v352_v2 }
  0x1a   : > { %2690 = vmatprep.subr.bf16.mxu1 %v2883_v23  ;;  %v2594_v59 = vpack.c.bf16 %v318_v53, %v317_v52  ;;  %v355_v3 = vsel %vm3153_vm2, 0, %v354_v1  ;;  %v482_v51 = vld [vmem:[#allocation3 + $0x50] sm:$0x8]  ;;  %v485_v52 = vld [vmem:[#allocation3 + $0x74] sm:$0x8] }
  0x1b   : > { %2651 = vmatpush3.bf16.msra.mxu0 %v2882_v22  ;;  %356 = vst [vmem:[#allocation3 + $0x6c] sm:$0x1] %v355_v3  ;;  %v311_v9 = vadd.f32 %v3151_v34, %v296_v4  ;;  %v312_v10 = vadd.f32 %v3151_v34, %v297_v5  ;;  %v436_v16 = vld [vmem:[#allocation3 + $0x24] sm:$0xf]  ;;  %v483_v55 = vsel %vm3175_vm5, 0, %v482_v51  ;;  %v486_v56 = vsel %vm3175_vm5, 0, %v485_v52 }
  0x1c   : > { %2652 = vmatprep.subr.bf16.mxu0 %v2884_v24  ;;  %2595 = vst [vmem:[#allocation2] sm:$0xff] %v2594_v59   ;;  %v606_v58 = vld [vmem:[#allocation3 + $0x54] sm:$0x1]  ;;  %484 = vst [vmem:[#allocation3 + $0x50] sm:$0x8] %v483_v55  ;;  %v2897_v5 = vld [vmem:[%s3566_s3 + $0x100] sm:$0xff]  }
  0x1d   : > { %2691 = vmatpush3.bf16.msra.mxu1 %v2885_v25  ;;  %v319_v20 = vmax.f32 %v311_v9, 0.0  ;;  %v320_v21 = vmax.f32 %v312_v10, 0.0  ;;  %487 = vst [vmem:[#allocation3 + $0x74] sm:$0x8] %v486_v56  ;;  %v609_v63 = vld [vmem:[#allocation3 + $0x78] sm:$0x1] }
  0x1e   : > { %2692 = vmatprep.subr.bf16.mxu1 %v2887_v27  ;;  %v607_v1 = vsel %vm3153_vm2, 0, %v606_v58  ;;  %v610_v2 = vsel %vm3153_vm2, 0, %v609_v63  ;;  %v2902_v10 = vld [vmem:[%s3566_s3 + $0x148] sm:$0xff]   ;;  %v2915_v51 = vld [vmem:[%s3566_s3 + $0x1d0] sm:$0xff]  }
  0x1f   : > { %2653 = vmatpush3.bf16.msra.mxu0 %v2886_v26  ;;  %v696_v26 = vld [vmem:[#allocation3 + $0xc] sm:$0xf]  ;;  %v2599_v32 = vpack.c.bf16 %v320_v21, %v319_v20  ;;  %608 = vst [vmem:[#allocation3 + $0x54] sm:$0x1] %v607_v1  ;;  %611 = vst [vmem:[#allocation3 + $0x78] sm:$0x1] %v610_v2 }
  0x20   : > { %2654 = vmatprep.subr.bf16.mxu0 %v2888_v28  ;;  %v699_v41 = vld [vmem:[#allocation3 + $0x30] sm:$0xf]  ;;  %v439_v43 = vld [vmem:[#allocation3 + $0x48] sm:$0xf] }
  0x21   : > { %2693 = vmatpush3.bf16.msra.mxu1 %v2889_v29  ;;  %v579_v29 = vld [vmem:[#allocation3 + $0x2c] sm:$0xf]  ;;  %2634 = vst [vmem:[#allocation2 + $0x8] sm:$0xff] %v2599_v32   ;;  %v2911_v52 = vld [vmem:[%s3566_s3 + $0x110] sm:$0xff]  }
  0x22   : > { %2694 = vmatprep.subr.bf16.mxu1 %v2891_v31  ;;  %v2905_v21 = vld [vmem:[%s3566_s3 + $0x1c8] sm:$0xff]   ;;  %v2632_v55 = vld [vmem:[%s3134_s17 + $0x10] sm:$0xff]  }
  0x23   : > { %2655 = vmatpush3.bf16.msra.mxu0 %v2890_v30  ;;  %v369_v6 = vld [vmem:[#allocation2] sm:$0xf]  ;;  %v625_v17 = vld [vmem:[#allocation2 + $0x4] sm:$0xf]  ;;  %v2586_v58 = vunpack.c.h.bf16 %v2632_v55 }
  0x24   : > { %2720 = vmatprep.subr.bf16.mxu0 %v2896_v45  ;;  %v458_v7 = vld [vmem:[#allocation2] sm:$0xf]  ;;  %v377_v11 = vshrl.u32 %v369_v6, 16  ;;  %v380_v12 = vshll.u32 %v369_v6, 16  ;;  %v640_v25 = vshrl.u32 %v625_v17, 16  ;;  %v643_v31 = vshll.u32 %v625_v17, 16 }
  0x25   : > { %2695 = vmatpush3.bf16.msra.mxu1 %v2895_v44  ;;  %v500_v8 = vld [vmem:[#allocation2] sm:$0xf]  ;;  %465 = vst [vmem:[#allocation3 + $0x28] sm:$0xf] %v458_v7  ;;  %v370_v27 = vld [vmem:[#allocation2 + $0x4] sm:$0xf] }
  0x26   : > { %2760 = vmatprep.subr.bf16.mxu1 %v2901_v48  ;;  %v508_v13 = vshrl.u32 %v500_v8, 16  ;;  %v511_v14 = vshll.u32 %v500_v8, 16  ;;  %v624_v15 = vld [vmem:[#allocation2] sm:$0xf]  ;;  %v379_v22 = vrot.slane %v377_v11, 7  ;;  %v384_v35 = vshrl.u32 %v370_v27, 16 }
  0x27   : > { %v633_v18 = vshrl.u32 %v624_v15, 16  ;;  %v636_v19 = vshll.u32 %v624_v15, 16  ;;  %v459_v36 = vld [vmem:[#allocation2 + $0x4] sm:$0xf]  ;;  %v642_v40 = vrot.slane %v640_v25, 7  ;;  %v387_v42 = vshll.u32 %v370_v27, 16 }
  0x28   : > { %v510_v23 = vrot.slane %v508_v13, 4  ;;  %v513_v24 = vrot.slane %v511_v14, 5  ;;  %v382_v37 = vor.u32 %v380_v12, %v379_v22  ;;  %466 = vst [vmem:[#allocation3 + $0x4c] sm:$0xf] %v459_v36  ;;  %v386_v46 = vrot.slane %v384_v35, 7  ;;  %v2908_v35 = vld [vmem:[%s3566_s3 + $0x150] sm:$0xff]  }
  0x29   : > { %v635_v30 = vrot.slane %v633_v18, 7  ;;  %v645_v50 = vor.u32 %v643_v31, %v642_v40  ;;  %v501_v57 = vld [vmem:[#allocation2 + $0x4] sm:$0xf]  ;;  %v371_v6 = vld [vmem:[#allocation2 + $0x8] sm:$0xf] }
  0x2a   : > { %v514_v38 = vor.u32 %v513_v24, %v510_v23  ;;  %v437_v47 = vsel %vm3198_vm9, %v382_v37, %v436_v16  ;;  %v389_v54 = vor.u32 %v387_v42, %v386_v46  ;;  %v517_v61 = vshrl.u32 %v501_v57, 16  ;;  %v460_v7 = vld [vmem:[#allocation2 + $0x8] sm:$0xf]  ;;  %v2903_v18 = vld [vmem:[%s3566_s3 + $0x180] sm:$0xff]   ;;  %v582_v25 = vld [vmem:[#allocation3 + $0x50] sm:$0xf] }
  0x2b   : > { %v638_v45 = vor.u32 %v636_v19, %v635_v30  ;;  %438 = vst [vmem:[#allocation3 + $0x24] sm:$0xf] %v437_v47  ;;  %v700_v60 = vsel %vm3198_vm9, %v645_v50, %v699_v41  ;;  %v520_v62 = vshll.u32 %v501_v57, 16  ;;  %v502_v8 = vld [vmem:[#allocation2 + $0x8] sm:$0xf]  ;;  %v391_v11 = vshrl.u32 %v371_v6, 16 }
  0x2c   : > { %v515_v48 = vrot.slane %v514_v38, 4  ;;  %701 = vst [vmem:[#allocation3 + $0x30] sm:$0xf] %v700_v60  ;;  %v440_v0 = vsel %vm3198_vm9, %v389_v54, %v439_v43  ;;  %v519_v3 = vrot.slane %v517_v61, 4  ;;  %v394_v12 = vshll.u32 %v371_v6, 16  ;;  %v2909_v41 = vld [vmem:[%s3566_s3 + $0x188] sm:$0xff]  }
  0x2d   : > { %v697_v53 = vsel %vm3198_vm9, %v638_v45, %v696_v26  ;;  %441 = vst [vmem:[#allocation3 + $0x48] sm:$0xf] %v440_v0  ;;  %v522_v4 = vrot.slane %v520_v62, 5  ;;  %467 = vst [vmem:[#allocation3 + $0x70] sm:$0xf] %v460_v7  ;;  %v526_v13 = vshrl.u32 %v502_v8, 16  ;;  %v2585_v57 = vunpack.c.l.bf16 %v2632_v55 }
  0x2e   : > { %v580_v59 = vsel %vm3204_vm10, %v515_v48, %v579_v29  ;;  %698 = vst [vmem:[#allocation3 + $0xc] sm:$0xf] %v697_v53  ;;  %v529_v14 = vshll.u32 %v502_v8, 16  ;;  %v626_v15 = vld [vmem:[#allocation2 + $0x8] sm:$0xf]  ;;  %v393_v22 = vrot.slane %v391_v11, 7  ;;  %v299_v6 = vmul.f32 %v2586_v58, %v3146_v33 }
  0x2f   : > { %581 = vst [vmem:[#allocation3 + $0x2c] sm:$0xf] %v580_v59  ;;  %v523_v9 = vor.u32 %v522_v4, %v519_v3  ;;  %v2894_v17 = vld [vmem:[#allocation3 + $0x4] ss:$36 sps:$4 sm:$0xff]   ;;  %v442_v19 = vld [vmem:[#allocation3 + $0x6c] sm:$0xf] }
  0x30   : > { %v528_v23 = vrot.slane %v526_v13, 4  ;;  %v531_v24 = vrot.slane %v529_v14, 5  ;;  %1953 = vmatprep.mubr.bf16.mxu0 %v2894_v17  ;;  %v2904_v29 = vld [vmem:[%s3566_s3 + $0x108] sm:$0xff]   ;;  %v647_v31 = vshrl.u32 %v626_v15, 16  ;;  %v396_v32 = vor.u32 %v394_v12, %v393_v22  ;;  %v585_v37 = vld [vmem:[#allocation3 + $0x74] sm:$0xf] }
  0x31   : > { %v524_v20 = vrot.slane %v523_v9, 4  ;;  %v627_v38 = vld [vmem:[#allocation2 + $0xc] sm:$0xf]  ;;  %v650_v40 = vshll.u32 %v626_v15, 16  ;;  %v702_v46 = vld [vmem:[#allocation3 + $0x54] sm:$0xf]  ;;  %v314_v13 = vadd.f32 %v3151_v34, %v299_v6 }
  0x32   : > { %v2892_v16 = vld [vmem:[#allocation3] ss:$36 sps:$4 sm:$0xff]   ;;  %v532_v36 = vor.u32 %v531_v24, %v528_v23  ;;  %v649_v42 = vrot.slane %v647_v31, 7  ;;  %v654_v43 = vshrl.u32 %v627_v38, 16  ;;  %v657_v45 = vshll.u32 %v627_v38, 16  ;;  %v2916_v3 = vld [vmem:[%s3566_s3 + $0x158] sm:$0xff]  }
  0x33   : > { %v583_v30 = vsel %vm3204_vm10, %v524_v20, %v582_v25  ;;  %1954 = vmatmul.mubr.bf16.vlgmr.msra.gmra.mrb[0].mxu0 %v2892_v16  ;;  %v443_v47 = vsel %vm3198_vm9, %v396_v32, %v442_v19  ;;  %v705_v50 = vld [vmem:[#allocation3 + $0x78] sm:$0xf]  ;;  %v357_v59 = vld [vmem:[#allocation3 + $0x90] sm:$0x1]  ;;  %v360_v60 = vld [vmem:[#allocation3 + $0xb4] sm:$0x1] }
  0x34   : > { %584 = vst [vmem:[#allocation3 + $0x50] sm:$0xf] %v583_v30  ;;  %2721 = vmatpush3.bf16.msra.mxu0 %v2897_v5  ;;  %v533_v48 = vrot.slane %v532_v36, 4  ;;  %444 = vst [vmem:[#allocation3 + $0x6c] sm:$0xf] %v443_v47  ;;  %v652_v53 = vor.u32 %v650_v40, %v649_v42  ;;  %v656_v54 = vrot.slane %v654_v43, 7  ;;  %v298_v5 = vmul.f32 %v2585_v57, %v3146_v33 }
  0x35   : > { %v2900_v27 = vld [vmem:[#allocation3 + $0xc] ss:$36 sps:$4 sm:$0xff]   ;;  %2722 = vmatprep.subr.bf16.mxu0 %v2902_v10  ;;  %v358_v0 = vsel %vm3153_vm2, 0, %v357_v59  ;;  %v361_v1 = vsel %vm3153_vm2, 0, %v360_v60  ;;  %v2918_v10 = vld [vmem:[%s3566_s3 + $0x118] sm:$0xff]   ;;  %v2922_v16 = vld [vmem:[%s3566_s3 + $0x160] sm:$0xff]  }
  0x36   : > { %v2898_v26 = vld [vmem:[#allocation3 + $0x8] ss:$36 sps:$4 sm:$0xff]   ;;  %2018 = vmatprep.mubr.bf16.mxu1 %v2900_v27  ;;  %v586_v56 = vsel %vm3204_vm10, %v533_v48, %v585_v37  ;;  %v659_v62 = vor.u32 %v657_v45, %v656_v54  ;;  %v703_v63 = vsel %vm3198_vm9, %v652_v53, %v702_v46  ;;  %v2917_v4 = vld [vmem:[%s3566_s3 + $0x190] sm:$0xff]   ;;  %359 = vst [vmem:[#allocation3 + $0x90] sm:$0x1] %v358_v0  ;;  %v2919_v11 = vld [vmem:[%s3566_s3 + $0x1d8] sm:$0xff]  }
  0x37   : > { %2019 = vmatmul.mubr.bf16.vlgmr.msra.gmra.mrb[0].mxu1 %v2898_v26  ;;  %v372_v61 = vld [vmem:[#allocation2 + $0xc] sm:$0xf]  ;;  %587 = vst [vmem:[#allocation3 + $0x74] sm:$0xf] %v586_v56  ;;  %704 = vst [vmem:[#allocation3 + $0x54] sm:$0xf] %v703_v63  ;;  %v313_v12 = vadd.f32 %v3151_v34, %v298_v5 }
  0x38   : > { %2761 = vmatpush3.bf16.msra.mxu1 %v2903_v18  ;;  %2723 = vmatpush3.bf16.msra.mxu0 %v2904_v29  ;;  %v461_v2 = vld [vmem:[#allocation2 + $0xc] sm:$0xf]  ;;  %362 = vst [vmem:[#allocation3 + $0xb4] sm:$0x1] %v361_v1  ;;  %v398_v7 = vshrl.u32 %v372_v61, 16  ;;  %v401_v8 = vshll.u32 %v372_v61, 16  ;;  %v706_v9 = vsel %vm3198_vm9, %v659_v62, %v705_v50 }
  0x39   : > { %2762 = vmatprep.subr.bf16.mxu1 %v2905_v21  ;;  %2724 = vmatprep.subr.bf16.mxu0 %v2908_v35  ;;  %468 = vst [vmem:[#allocation3 + $0x94] sm:$0xf] %v461_v2  ;;  %707 = vst [vmem:[#allocation3 + $0x78] sm:$0xf] %v706_v9  ;;  %v488_v15 = vld [vmem:[#allocation3 + $0x98] sm:$0x8] }
  0x3a   : > { %v400_v14 = vrot.slane %v398_v7, 7  ;;  %v2923_v17 = vld [vmem:[%s3566_s3 + $0x198] sm:$0xff]   ;;  %v489_v18 = vsel %vm3175_vm5, 0, %v488_v15  ;;  %v503_v20 = vld [vmem:[#allocation2 + $0xc] sm:$0xf]  ;;  %v321_v23 = vmax.f32 %v313_v12, 0.0 }
  0x3b   : > { %v491_v19 = vld [vmem:[#allocation3 + $0xbc] sm:$0x8]  ;;  %v2906_v21 = vld [vmem:[#allocation3 + $0x4c] ss:$36 sps:$4 sm:$0xff]   ;;  %490 = vst [vmem:[#allocation3 + $0x98] sm:$0x8] %v489_v18 }
  0x3c   : > { %2763 = vmatpush3.bf16.msra.mxu1 %v2909_v41  ;;  %2725 = vmatpush3.bf16.msra.mxu0 %v2911_v52  ;;  %v2910_v22 = vld [vmem:[#allocation3 + $0x48] ss:$36 sps:$4 sm:$0xff]   ;;  %v403_v24 = vor.u32 %v401_v8, %v400_v14  ;;  %v322_v25 = vmax.f32 %v314_v13, 0.0  ;;  %v492_v26 = vsel %vm3175_vm5, 0, %v491_v19  ;;  %v535_v27 = vshrl.u32 %v503_v20, 16  ;;  %v2925_v31 = vld [vmem:[%s3566_s3 + $0x120] sm:$0xff]  }
  0x3d   : > { %2764 = vmatprep.subr.bf16.mxu1 %v2915_v51  ;;  %2726 = vmatprep.subr.bf16.mxu0 %v2916_v3  ;;  %v538_v29 = vshll.u32 %v503_v20, 16  ;;  %v612_v30 = vld [vmem:[#allocation3 + $0x9c] sm:$0x1]  ;;  %493 = vst [vmem:[#allocation3 + $0xbc] sm:$0x8] %v492_v26  ;;  %v2929_v36 = vld [vmem:[%s3566_s3 + $0x1e0] sm:$0xff]  }
  0x3e   : > { %1961 = vmatprep.mubr.bf16.mxu0 %v2906_v21  ;;  %v613_v32 = vsel %vm3153_vm2, 0, %v612_v30  ;;  %v615_v35 = vld [vmem:[#allocation3 + $0xc0] sm:$0x1]  ;;  %v2604_v37 = vpack.c.bf16 %v322_v25, %v321_v23  ;;  %v445_v38 = vld [vmem:[#allocation3 + $0x90] sm:$0xf]  ;;  %v537_v40 = vrot.slane %v535_v27, 4 }
  0x3f   : > { %1962 = vmatmul.mubr.bf16.gmra.mrb[4].mxu0 %v2910_v22  ;;  %614 = vst [vmem:[#allocation3 + $0x9c] sm:$0x1] %v613_v32  ;;  %v2930_v41 = vld [vmem:[%s3566_s3 + $0x168] sm:$0xff]   ;;  %v446_v42 = vsel %vm3198_vm9, %v403_v24, %v445_v38  ;;  %v540_v43 = vrot.slane %v538_v29, 5  ;;  %v616_v45 = vsel %vm3153_vm2, 0, %v615_v35  ;;  %v2931_v51 = vld [vmem:[%s3566_s3 + $0x1a0] sm:$0xff]  }
  0x40   : > { %2765 = vmatpush3.bf16.msra.mxu1 %v2917_v4  ;;  %2727 = vmatpush3.bf16.msra.mxu0 %v2918_v10  ;;  %v2912_v46 = vld [vmem:[#allocation3 + $0x54] ss:$36 sps:$4 sm:$0xff]   ;;  %2635 = vst [vmem:[#allocation2 + $0x10] sm:$0xff] %v2604_v37   ;;  %447 = vst [vmem:[#allocation3 + $0x90] sm:$0xf] %v446_v42  ;;  %v2932_v53 = vld [vmem:[%s3566_s3 + $0x128] sm:$0xff]  }
  0x41   : > { %2766 = vmatprep.subr.bf16.mxu1 %v2919_v11  ;;  %v2914_v47 = vld [vmem:[#allocation3 + $0x50] ss:$36 sps:$4 sm:$0xff]   ;;  %2728 = vmatprep.subr.bf16.mxu0 %v2922_v16  ;;  %617 = vst [vmem:[#allocation3 + $0xc0] sm:$0x1] %v616_v45  ;;  %v541_v48 = vor.u32 %v540_v43, %v537_v40  ;;  %v2933_v54 = vld [vmem:[%s3566_s3 + $0x1e8] sm:$0xff]   ;;  %v2633_v56 = vld [vmem:[%s3134_s17 + $0x18] sm:$0xff]  }
  0x42   : > { %2026 = vmatprep.mubr.bf16.mxu1 %v2912_v46  ;;  %v588_v50 = vld [vmem:[#allocation3 + $0x98] sm:$0xf]  ;;  %v2589_v58 = vunpack.c.l.bf16 %v2633_v56  ;;  %v2590_v59 = vunpack.c.h.bf16 %v2633_v56  ;;  %v366_v61 = vld [vmem:[#allocation3 + $0xfc] sm:$0x1]  ;;  %v2936_v62 = vld [vmem:[%s3566_s3 + $0x170] sm:$0xff]  }
  0x43   : > { %2027 = vmatmul.mubr.bf16.gmra.mrb[4].mxu1 %v2914_v47  ;;  %v542_v52 = vrot.slane %v541_v48, 4  ;;  %v363_v57 = vld [vmem:[#allocation3 + $0xd8] sm:$0x1]  ;;  %v367_v1 = vsel %vm3153_vm2, 0, %v366_v61  ;;  %v448_v8 = vld [vmem:[#allocation3 + $0xb4] sm:$0xf] }
  0x44   : > { %2767 = vmatpush3.bf16.msra.mxu1 %v2923_v17  ;;  %2729 = vmatpush3.bf16.msra.mxu0 %v2925_v31  ;;  %v364_v60 = vsel %vm3153_vm2, 0, %v363_v57  ;;  %v300_v6 = vmul.f32 %v2589_v58, %v3146_v33  ;;  %v301_v7 = vmul.f32 %v2590_v59, %v3146_v33  ;;  %368 = vst [vmem:[#allocation3 + $0xfc] sm:$0x1] %v367_v1  ;;  %v2937_v19 = vld [vmem:[%s3566_s3 + $0x1a8] sm:$0xff]   ;;  %v2939_v25 = vld [vmem:[%s3566_s3 + $0x130] sm:$0xff]   ;;  %v2944_v43 = vld [vmem:[%s3566_s3 + $0x178] sm:$0xff]  }
  0x45   : > { %2768 = vmatprep.subr.bf16.mxu1 %v2929_v36  ;;  %2730 = vmatprep.subr.bf16.mxu0 %v2930_v41  ;;  %v589_v55 = vsel %vm3204_vm10, %v542_v52, %v588_v50  ;;  %365 = vst [vmem:[#allocation3 + $0xd8] sm:$0x1] %v364_v60  ;;  %v2943_v32 = vld [vmem:[%s3566_s3 + $0x1f0] sm:$0xff]   ;;  %v591_v40 = vld [vmem:[#allocation3 + $0xbc] sm:$0xf] }
  0x46   : > { %590 = vst [vmem:[#allocation3 + $0x98] sm:$0xf] %v589_v55  ;;  %v708_v17 = vld [vmem:[#allocation3 + $0x9c] sm:$0xf]  ;;  %v315_v18 = vadd.f32 %v3151_v34, %v300_v6  ;;  %v316_v23 = vadd.f32 %v3151_v34, %v301_v7  ;;  %v2945_v50 = vld [vmem:[%s3566_s3 + $0x1b0] sm:$0xff]  }
  0x47   : > { %v373_v63 = vld [vmem:[#allocation2 + $0x10] sm:$0xf]  ;;  %v629_v11 = vld [vmem:[#allocation2 + $0x14] sm:$0xf]  ;;  %v618_v59 = vld [vmem:[#allocation3 + $0xe4] sm:$0x1] }
  0x48   : > { %2769 = vmatpush3.bf16.msra.mxu1 %v2931_v51  ;;  %v462_v0 = vld [vmem:[#allocation2 + $0x10] sm:$0xf]  ;;  %2731 = vmatpush3.bf16.msra.mxu0 %v2932_v53  ;;  %v405_v2 = vshrl.u32 %v373_v63, 16  ;;  %v408_v3 = vshll.u32 %v373_v63, 16  ;;  %v668_v15 = vshrl.u32 %v629_v11, 16  ;;  %v671_v16 = vshll.u32 %v629_v11, 16 }
  0x49   : > { %2770 = vmatprep.subr.bf16.mxu1 %v2933_v54  ;;  %469 = vst [vmem:[#allocation3 + $0xb8] sm:$0xf] %v462_v0  ;;  %v504_v4 = vld [vmem:[#allocation2 + $0x10] sm:$0xf]  ;;  %2732 = vmatprep.subr.bf16.mxu0 %v2936_v62  ;;  %v711_v22 = vld [vmem:[#allocation3 + $0xc0] sm:$0xf] }
  0x4a   : > { %v628_v5 = vld [vmem:[#allocation2 + $0x10] sm:$0xf]  ;;  %v544_v9 = vshrl.u32 %v504_v4, 16  ;;  %v547_v10 = vshll.u32 %v504_v4, 16  ;;  %v407_v14 = vrot.slane %v405_v2, 7  ;;  %v670_v27 = vrot.slane %v668_v15, 7 }
  0x4b   : > { %v661_v12 = vshrl.u32 %v628_v5, 16  ;;  %v664_v13 = vshll.u32 %v628_v5, 16  ;;  %v374_v24 = vld [vmem:[#allocation2 + $0x14] sm:$0xf]  ;;  %v323_v29 = vmax.f32 %v315_v18, 0.0  ;;  %v324_v37 = vmax.f32 %v316_v23, 0.0 }
  0x4c   : > { %v546_v20 = vrot.slane %v544_v9, 4  ;;  %v549_v33 = vrot.slane %v547_v10, 5  ;;  %v410_v26 = vor.u32 %v408_v3, %v407_v14  ;;  %v412_v30 = vshrl.u32 %v374_v24, 16  ;;  %v463_v31 = vld [vmem:[#allocation2 + $0x14] sm:$0xf]  ;;  %2771 = vmatpush3.bf16.msra.mxu1 %v2937_v19  ;;  %2733 = vmatpush3.bf16.msra.mxu0 %v2939_v25  ;;  %v2946_v1 = vld [vmem:[%s3566_s3 + $0x138] sm:$0xff]  }
  0x4d   : > { %v663_v21 = vrot.slane %v661_v12, 7  ;;  %v415_v38 = vshll.u32 %v374_v24, 16  ;;  %470 = vst [vmem:[#allocation3 + $0xdc] sm:$0xf] %v463_v31  ;;  %v673_v41 = vor.u32 %v671_v16, %v670_v27  ;;  %2772 = vmatprep.subr.bf16.mxu1 %v2943_v32  ;;  %v2609_v47 = vpack.c.bf16 %v324_v37, %v323_v29  ;;  %v451_v48 = vld [vmem:[#allocation3 + $0xd8] sm:$0xf]  ;;  %2734 = vmatprep.subr.bf16.mxu0 %v2944_v43 }
  0x4e   : > { %v550_v35 = vor.u32 %v549_v33, %v546_v20  ;;  %v449_v34 = vsel %vm3198_vm9, %v410_v26, %v448_v8  ;;  %v414_v42 = vrot.slane %v412_v30, 7  ;;  %v494_v53 = vld [vmem:[#allocation3 + $0xe0] sm:$0x8]  ;;  %v497_v54 = vld [vmem:[#allocation3 + $0x104] sm:$0x8]  ;;  %v619_v63 = vsel %vm3153_vm2, 0, %v618_v59 }
  0x4f   : > { %v666_v36 = vor.u32 %v664_v13, %v663_v21  ;;  %450 = vst [vmem:[#allocation3 + $0xb4] sm:$0xf] %v449_v34  ;;  %v712_v51 = vsel %vm3198_vm9, %v673_v41, %v711_v22  ;;  %2636 = vst [vmem:[#allocation2 + $0x18] sm:$0xff] %v2609_v47   ;;  %v495_v56 = vsel %vm3175_vm5, 0, %v494_v53  ;;  %v498_v57 = vsel %vm3175_vm5, 0, %v497_v54  ;;  %v2947_v3 = vld [vmem:[%s3566_s3 + $0x1f8] sm:$0xff]  }
  0x50   : > { %v551_v45 = vrot.slane %v550_v35, 4  ;;  %v417_v52 = vor.u32 %v415_v38, %v414_v42  ;;  %713 = vst [vmem:[#allocation3 + $0xc0] sm:$0xf] %v712_v51  ;;  %v505_v58 = vld [vmem:[#allocation2 + $0x14] sm:$0xf]  ;;  %2773 = vmatpush3.bf16.msra.mxu1 %v2945_v50  ;;  %2735 = vmatpush3.bf16.msra.mxu0 %v2946_v1  ;;  %v2951_v19 = vld [vmem:[%s3566_s3 + $0x1b8] sm:$0xff]  }
  0x51   : > { %v709_v46 = vsel %vm3198_vm9, %v666_v36, %v708_v17  ;;  %496 = vst [vmem:[#allocation3 + $0xe0] sm:$0x8] %v495_v56  ;;  %499 = vst [vmem:[#allocation3 + $0x104] sm:$0x8] %v498_v57  ;;  %v553_v61 = vshrl.u32 %v505_v58, 16  ;;  %v556_v62 = vshll.u32 %v505_v58, 16  ;;  %2774 = vmatprep.subr.bf16.mxu1 %v2947_v3 }
  0x52   : > { %710 = vst [vmem:[#allocation3 + $0x9c] sm:$0xf] %v709_v46  ;;  %v592_v55 = vsel %vm3204_vm10, %v551_v45, %v591_v40  ;;  %v452_v60 = vsel %vm3198_vm9, %v417_v52, %v451_v48  ;;  %v621_v0 = vld [vmem:[#allocation3 + $0x108] sm:$0x1]  ;;  %620 = vst [vmem:[#allocation3 + $0xe4] sm:$0x1] %v619_v63 }
  0x53   : > { %593 = vst [vmem:[#allocation3 + $0xbc] sm:$0xf] %v592_v55  ;;  %453 = vst [vmem:[#allocation3 + $0xd8] sm:$0xf] %v452_v60  ;;  %v622_v2 = vsel %vm3153_vm2, 0, %v621_v0  ;;  %v555_v4 = vrot.slane %v553_v61, 4 }
  0x54   : > { %v558_v5 = vrot.slane %v556_v62, 5  ;;  %623 = vst [vmem:[#allocation3 + $0x108] sm:$0x1] %v622_v2  ;;  %v2920_v6 = vld [vmem:[#allocation3 + $0x94] ss:$36 sps:$4 sm:$0xff]   ;;  %v3377_v22 = vld [vmem:[%s3566_s3 + $0x200] sm:$0xff]   ;;  %2775 = vmatpush3.bf16.msra.mxu1 %v2951_v19 }
  0x55   : > { %1969 = vmatprep.mubr.bf16.mxu0 %v2920_v6  ;;  %v454_v33 = vld [vmem:[#allocation3 + $0xfc] sm:$0xf]  ;;  %2812 = vmatprep.subr.bf16.mxu0 %v3377_v22  ;;  %v720_v43 = vld [vmem:[#allocation2] sm:$0xf]  ;;  %v721_v45 = vld [vmem:[#allocation2 + $0x4] sm:$0xf] }
  0x56   : > { %v2924_v7 = vld [vmem:[#allocation3 + $0x90] ss:$36 sps:$4 sm:$0xff]   ;;  %v559_v8 = vor.u32 %v558_v5, %v555_v4  ;;  %v375_v9 = vld [vmem:[#allocation2 + $0x18] sm:$0xf]  ;;  %v631_v27 = vld [vmem:[#allocation2 + $0x1c] sm:$0xf]  ;;  %2836 = vmatprep.subr.bf16.mxu1 %v3377_v22 }
  0x57   : > { %v464_v10 = vld [vmem:[#allocation2 + $0x18] sm:$0xf]  ;;  %1970 = vmatmul.mubr.bf16.gmra.mrb[8].mxu0 %v2924_v7  ;;  %v419_v14 = vshrl.u32 %v375_v9, 16  ;;  %v422_v15 = vshll.u32 %v375_v9, 16  ;;  %v682_v35 = vshrl.u32 %v631_v27, 16  ;;  %v685_v37 = vshll.u32 %v631_v27, 16 }
  0x58   : > { %v506_v11 = vld [vmem:[#allocation2 + $0x18] sm:$0xf]  ;;  %471 = vst [vmem:[#allocation3 + $0x100] sm:$0xf] %v464_v10  ;;  %v560_v16 = vrot.slane %v559_v8, 4 }
  0x59   : > { %v2926_v12 = vld [vmem:[#allocation3 + $0x9c] ss:$36 sps:$4 sm:$0xff]   ;;  %v562_v17 = vshrl.u32 %v506_v11, 16  ;;  %v565_v18 = vshll.u32 %v506_v11, 16  ;;  %v421_v20 = vrot.slane %v419_v14, 7  ;;  %v684_v42 = vrot.slane %v682_v35, 7 }
  0x5a   : > { %v2928_v13 = vld [vmem:[#allocation3 + $0x98] ss:$36 sps:$4 sm:$0xff]   ;;  %2034 = vmatprep.mubr.bf16.mxu1 %v2926_v12  ;;  %v594_v21 = vld [vmem:[#allocation3 + $0xe0] sm:$0xf]  ;;  %v597_v30 = vld [vmem:[#allocation3 + $0x104] sm:$0xf] }
  0x5b   : > { %2035 = vmatmul.mubr.bf16.gmra.mrb[8].mxu1 %v2928_v13  ;;  %v564_v23 = vrot.slane %v562_v17, 4  ;;  %v567_v24 = vrot.slane %v565_v18, 5  ;;  %v595_v25 = vsel %vm3204_vm10, %v560_v16, %v594_v21  ;;  %v630_v26 = vld [vmem:[#allocation2 + $0x18] sm:$0xf]  ;;  %v424_v29 = vor.u32 %v422_v15, %v421_v20  ;;  %v714_v38 = vld [vmem:[#allocation3 + $0xe4] sm:$0xf] }
  0x5c   : > { %596 = vst [vmem:[#allocation3 + $0xe0] sm:$0xf] %v595_v25  ;;  %v675_v31 = vshrl.u32 %v630_v26, 16  ;;  %v678_v32 = vshll.u32 %v630_v26, 16  ;;  %v717_v34 = vld [vmem:[#allocation3 + $0x108] sm:$0xf]  ;;  %v687_v51 = vor.u32 %v685_v37, %v684_v42 }
  0x5d   : > { %v568_v36 = vor.u32 %v567_v24, %v564_v23  ;;  %v455_v40 = vsel %vm3198_vm9, %v424_v29, %v454_v33  ;;  %728 = vst [vmem:[#allocation3 + $0x10] sm:$0xf] %v720_v43  ;;  %729 = vst [vmem:[#allocation3 + $0x34] sm:$0xf] %v721_v45  ;;  %v736_v47 = vld [vmem:[#allocation3 + $0x14] sm:$0x8] }
  0x5e   : > { %v677_v41 = vrot.slane %v675_v31, 7  ;;  %456 = vst [vmem:[#allocation3 + $0xfc] sm:$0xf] %v455_v40  ;;  %v739_v48 = vld [vmem:[#allocation3 + $0x38] sm:$0x8]  ;;  %v737_v52 = vsel %vm3175_vm5, 0, %v736_v47  ;;  %v718_v61 = vsel %vm3198_vm9, %v687_v51, %v717_v34 }
  0x5f   : > { %v569_v46 = vrot.slane %v568_v36, 4  ;;  %v740_v53 = vsel %vm3175_vm5, 0, %v739_v48  ;;  %v760_v54 = vld [vmem:[#allocation2] sm:$0xf]  ;;  %v761_v55 = vld [vmem:[#allocation2 + $0x4] sm:$0xf] }
  0x60   : > { %v680_v50 = vor.u32 %v678_v32, %v677_v41  ;;  %738 = vst [vmem:[#allocation3 + $0x14] sm:$0x8] %v737_v52  ;;  %741 = vst [vmem:[#allocation3 + $0x38] sm:$0x8] %v740_v53  ;;  %v769_v57 = vshrl.u32 %v760_v54, 16  ;;  %v772_v58 = vshll.u32 %v760_v54, 16 }
  0x61   : > { %v598_v56 = vsel %vm3204_vm10, %v569_v46, %v597_v30  ;;  %v778_v59 = vshrl.u32 %v761_v55, 16  ;;  %v781_v62 = vshll.u32 %v761_v55, 16  ;;  %719 = vst [vmem:[#allocation3 + $0x108] sm:$0xf] %v718_v61  ;;  %v874_v3 = vld [vmem:[#allocation3 + $0x18] sm:$0x1] }
  0x62   : > { %599 = vst [vmem:[#allocation3 + $0x104] sm:$0xf] %v598_v56  ;;  %v715_v60 = vsel %vm3198_vm9, %v680_v50, %v714_v38  ;;  %v771_v63 = vrot.slane %v769_v57, 4  ;;  %v774_v0 = vrot.slane %v772_v58, 5  ;;  %v877_v4 = vld [vmem:[#allocation3 + $0x3c] sm:$0x1] }
  0x63   : > { %716 = vst [vmem:[#allocation3 + $0xe4] sm:$0xf] %v715_v60  ;;  %v780_v1 = vrot.slane %v778_v59, 4  ;;  %v783_v2 = vrot.slane %v781_v62, 5  ;;  %v875_v6 = vsel %vm3153_vm2, 0, %v874_v3  ;;  %v878_v7 = vsel %vm3153_vm2, 0, %v877_v4 }
  0x64   : > { %v775_v5 = vor.u32 %v774_v0, %v771_v63  ;;  %v899_v8 = vld [vmem:[#allocation2 + $0x4] sm:$0xf]  ;;  %v900_v9 = vld [vmem:[#allocation2 + $0x8] sm:$0xf]  ;;  %v2934_v10 = vld [vmem:[#allocation3 + $0xdc] ss:$36 sps:$4 sm:$0xff]  }
  0x65   : > { %v2938_v11 = vld [vmem:[#allocation3 + $0xd8] ss:$36 sps:$4 sm:$0xff]   ;;  %v784_v12 = vor.u32 %v783_v2, %v780_v1  ;;  %876 = vst [vmem:[#allocation3 + $0x18] sm:$0x1] %v875_v6  ;;  %879 = vst [vmem:[#allocation3 + $0x3c] sm:$0x1] %v878_v7  ;;  %1977 = vmatprep.mubr.bf16.mxu0 %v2934_v10 }
  0x66   : > { %v907_v13 = vshrl.u32 %v899_v8, 16  ;;  %v776_v14 = vrot.slane %v775_v5, 4  ;;  %v910_v15 = vshll.u32 %v899_v8, 16  ;;  %v914_v16 = vshrl.u32 %v900_v9, 16  ;;  %v984_v18 = vld [vmem:[#allocation2 + $0x4] sm:$0xf]  ;;  %1978 = vmatmul.mubr.bf16.gmra.mrb[12].mxu0 %v2938_v11 }
  0x67   : > { %v917_v17 = vshll.u32 %v900_v9, 16  ;;  %v785_v19 = vrot.slane %v784_v12, 4  ;;  %v848_v20 = vld [vmem:[#allocation3 + $0x14] sm:$0xf]  ;;  %v851_v33 = vld [vmem:[#allocation3 + $0x38] sm:$0xf] }
  0x68   : > { %v909_v21 = vrot.slane %v907_v13, 7  ;;  %991 = vst [vmem:[#allocation3 + $0x1c] sm:$0xf] %v984_v18  ;;  %v849_v23 = vsel %vm3204_vm10, %v776_v14, %v848_v20  ;;  %v916_v24 = vrot.slane %v914_v16, 7  ;;  %v985_v25 = vld [vmem:[#allocation2 + $0x8] sm:$0xf] }
  0x69   : > { %850 = vst [vmem:[#allocation3 + $0x14] sm:$0xf] %v849_v23  ;;  %v852_v27 = vsel %vm3204_vm10, %v785_v19, %v851_v33  ;;  %992 = vst [vmem:[#allocation3 + $0x40] sm:$0xf] %v985_v25  ;;  %v2942_v30 = vld [vmem:[#allocation3 + $0xe0] ss:$36 sps:$4 sm:$0xff]  }
  0x6a   : > { %v2940_v26 = vld [vmem:[#allocation3 + $0xe4] ss:$36 sps:$4 sm:$0xff]   ;;  %v912_v29 = vor.u32 %v910_v15, %v909_v21  ;;  %853 = vst [vmem:[#allocation3 + $0x38] sm:$0xf] %v852_v27  ;;  %v919_v31 = vor.u32 %v917_v17, %v916_v24  ;;  %v723_v35 = vld [vmem:[#allocation2 + $0xc] sm:$0xf] }
  0x6b   : > { %v722_v32 = vld [vmem:[#allocation2 + $0x8] sm:$0xf]  ;;  %2042 = vmatprep.mubr.bf16.mxu1 %v2940_v26  ;;  %v742_v36 = vld [vmem:[#allocation3 + $0x5c] sm:$0x8]  ;;  %v745_v37 = vld [vmem:[#allocation3 + $0x80] sm:$0x8] }
  0x6c   : > { %730 = vst [vmem:[#allocation3 + $0x58] sm:$0xf] %v722_v32  ;;  %2043 = vmatmul.mubr.bf16.gmra.mrb[12].mxu1 %v2942_v30  ;;  %v962_v38 = vld [vmem:[#allocation3 + $0x18] sm:$0xf]  ;;  %v965_v34 = vld [vmem:[#allocation3 + $0x3c] sm:$0xf] }
  0x6d   : > { %731 = vst [vmem:[#allocation3 + $0x7c] sm:$0xf] %v723_v35  ;;  %v743_v40 = vsel %vm3175_vm5, 0, %v742_v36  ;;  %v746_v41 = vsel %vm3175_vm5, 0, %v745_v37  ;;  %v963_v42 = vsel %vm3198_vm9, %v912_v29, %v962_v38  ;;  %v966_v43 = vsel %vm3198_vm9, %v919_v31, %v965_v34  ;;  %v762_v45 = vld [vmem:[#allocation2 + $0x8] sm:$0xf] }
  0x6e   : > { %744 = vst [vmem:[#allocation3 + $0x5c] sm:$0x8] %v743_v40  ;;  %747 = vst [vmem:[#allocation3 + $0x80] sm:$0x8] %v746_v41  ;;  %v763_v46 = vld [vmem:[#allocation2 + $0xc] sm:$0xf] }
  0x6f   : > { %964 = vst [vmem:[#allocation3 + $0x18] sm:$0xf] %v963_v42  ;;  %967 = vst [vmem:[#allocation3 + $0x3c] sm:$0xf] %v966_v43  ;;  %v787_v47 = vshrl.u32 %v762_v45, 16  ;;  %v790_v48 = vshll.u32 %v762_v45, 16 }
  0x70   : > { %v796_v50 = vshrl.u32 %v763_v46, 16  ;;  %v799_v51 = vshll.u32 %v763_v46, 16  ;;  %v880_v52 = vld [vmem:[#allocation3 + $0x60] sm:$0x1]  ;;  %v883_v53 = vld [vmem:[#allocation3 + $0x84] sm:$0x1] }
  0x71   : > { %v901_v54 = vld [vmem:[#allocation2 + $0xc] sm:$0xf]  ;;  %v789_v56 = vrot.slane %v787_v47, 4  ;;  %v792_v57 = vrot.slane %v790_v48, 5  ;;  %v2948_v60 = vld [vmem:[#allocation3 + $0x10] ss:$36 sps:$4 sm:$0xff]  }
  0x72   : > { %v3414_v55 = vld [vmem:[%s3566_s3 + $0x208] sm:$0xff]   ;;  %v798_v58 = vrot.slane %v796_v50, 4  ;;  %v801_v59 = vrot.slane %v799_v51, 5  ;;  %v2950_v61 = vld [vmem:[#allocation3 + $0x14] ss:$36 sps:$4 sm:$0xff]   ;;  %v881_v62 = vsel %vm3153_vm2, 0, %v880_v52 }
  0x73   : > { %v793_v63 = vor.u32 %v792_v57, %v789_v56  ;;  %882 = vst [vmem:[#allocation3 + $0x60] sm:$0x1] %v881_v62  ;;  %v884_v1 = vsel %vm3153_vm2, 0, %v883_v53  ;;  %v902_v2 = vld [vmem:[#allocation2 + $0x10] sm:$0xf]  ;;  %v921_v3 = vshrl.u32 %v901_v54, 16  ;;  %2083 = vmatprep.mubr.bf16.mxu0 %v2950_v61 }
  0x74   : > { %v802_v0 = vor.u32 %v801_v59, %v798_v58  ;;  %v986_v4 = vld [vmem:[#allocation2 + $0xc] sm:$0xf]  ;;  %885 = vst [vmem:[#allocation3 + $0x84] sm:$0x1] %v884_v1  ;;  %v924_v5 = vshll.u32 %v901_v54, 16  ;;  %v928_v6 = vshrl.u32 %v902_v2, 16  ;;  %2084 = vmatmul.mubr.bf16.vlgmr.msra.gmra.mrb[16].mxu0 %v2948_v60 }
  0x75   : > { %v931_v7 = vshll.u32 %v902_v2, 16  ;;  %v987_v8 = vld [vmem:[#allocation2 + $0x10] sm:$0xf]  ;;  %993 = vst [vmem:[#allocation3 + $0x64] sm:$0xf] %v986_v4  ;;  %v794_v9 = vrot.slane %v793_v63, 4  ;;  %2813 = vmatpush3.bf16.msra.mxu0 %v3377_v22 }
  0x76   : > { %v803_v10 = vrot.slane %v802_v0, 4  ;;  %v854_v11 = vld [vmem:[#allocation3 + $0x5c] sm:$0xf]  ;;  %v857_v12 = vld [vmem:[#allocation3 + $0x80] sm:$0xf]  ;;  %v3423_v13 = vld [vmem:[%s3566_s3 + $0x210] sm:$0xff]   ;;  %2814 = vmatprep.subr.bf16.mxu0 %v3414_v55 }
  0x77   : > { %994 = vst [vmem:[#allocation3 + $0x88] sm:$0xf] %v987_v8  ;;  %v2953_v14 = vld [vmem:[#allocation3 + $0x18] ss:$36 sps:$4 sm:$0xff]   ;;  %v923_v15 = vrot.slane %v921_v3, 7  ;;  %v930_v16 = vrot.slane %v928_v6, 7  ;;  %v855_v18 = vsel %vm3204_vm10, %v794_v9, %v854_v11 }
  0x78   : > { %v2955_v17 = vld [vmem:[#allocation3 + $0x1c] ss:$36 sps:$4 sm:$0xff]   ;;  %v858_v19 = vsel %vm3204_vm10, %v803_v10, %v857_v12  ;;  %856 = vst [vmem:[#allocation3 + $0x5c] sm:$0xf] %v855_v18  ;;  %v724_v21 = vld [vmem:[#allocation2 + $0x10] sm:$0xf] }
  0x79   : > { %859 = vst [vmem:[#allocation3 + $0x80] sm:$0xf] %v858_v19  ;;  %v926_v20 = vor.u32 %v924_v5, %v923_v15  ;;  %v933_v33 = vor.u32 %v931_v7, %v930_v16  ;;  %v725_v23 = vld [vmem:[#allocation2 + $0x14] sm:$0xf]  ;;  %v748_v24 = vld [vmem:[#allocation3 + $0xa4] sm:$0x8]  ;;  %2148 = vmatprep.mubr.bf16.mxu1 %v2955_v17  ;;  %2815 = vmatpush3.bf16.msra.mxu0 %v3414_v55 }
  0x7a   : > { %732 = vst [vmem:[#allocation3 + $0xa0] sm:$0xf] %v724_v21  ;;  %733 = vst [vmem:[#allocation3 + $0xc4] sm:$0xf] %v725_v23  ;;  %v749_v25 = vsel %vm3175_vm5, 0, %v748_v24  ;;  %2149 = vmatmul.mubr.bf16.vlgmr.msra.gmra.mrb[16].mxu1 %v2953_v14  ;;  %2816 = vmatprep.subr.bf16.mxu0 %v3423_v13  ;;  %v3443_v37 = vld [vmem:[%s3566_s3 + $0x218] sm:$0xff]  }
  0x7b   : > { %v751_v26 = vld [vmem:[#allocation3 + $0xc8] sm:$0x8]  ;;  %v764_v27 = vld [vmem:[#allocation2 + $0x10] sm:$0xf]  ;;  %v968_v29 = vld [vmem:[#allocation3 + $0x60] sm:$0xf]  ;;  %2844 = vmatpush3.bf16.msra.mxu1 %v3377_v22 }
  0x7c   : > { %750 = vst [vmem:[#allocation3 + $0xa4] sm:$0x8] %v749_v25  ;;  %v752_v30 = vsel %vm3175_vm5, 0, %v751_v26  ;;  %v765_v31 = vld [vmem:[#allocation2 + $0x14] sm:$0xf]  ;;  %v805_v32 = vshrl.u32 %v764_v27, 16  ;;  %v969_v35 = vsel %vm3198_vm9, %v926_v20, %v968_v29  ;;  %2837 = vmatprep.subr.bf16.mxu1 %v3414_v55 }
  0x7d   : > { %v971_v36 = vld [vmem:[#allocation3 + $0x84] sm:$0xf]  ;;  %753 = vst [vmem:[#allocation3 + $0xc8] sm:$0x8] %v752_v30  ;;  %v808_v38 = vshll.u32 %v764_v27, 16  ;;  %v814_v34 = vshrl.u32 %v765_v31, 16  ;;  %2817 = vmatpush3.bf16.msra.mxu0 %v3423_v13 }
  0x7e   : > { %v817_v40 = vshll.u32 %v765_v31, 16  ;;  %970 = vst [vmem:[#allocation3 + $0x60] sm:$0xf] %v969_v35  ;;  %v972_v22 = vsel %vm3198_vm9, %v933_v33, %v971_v36  ;;  %v807_v41 = vrot.slane %v805_v32, 4  ;;  %v886_v46 = vld [vmem:[#allocation3 + $0xa8] sm:$0x1]  ;;  %2818 = vmatprep.subr.bf16.mxu0 %v3443_v37 }
  0x7f   : > { %973 = vst [vmem:[#allocation3 + $0x84] sm:$0xf] %v972_v22  ;;  %v810_v42 = vrot.slane %v808_v38, 5  ;;  %v816_v43 = vrot.slane %v814_v34, 4  ;;  %v887_v47 = vsel %vm3153_vm2, 0, %v886_v46  ;;  %2845 = vmatpush3.bf16.msra.mxu1 %v3414_v55  ;;  %v3459_v58 = vld [vmem:[%s3566_s3 + $0x220] sm:$0xff]  }
  0x80   : > { %v819_v45 = vrot.slane %v817_v40, 5  ;;  %v889_v48 = vld [vmem:[#allocation3 + $0xcc] sm:$0x1]  ;;  %v903_v50 = vld [vmem:[#allocation2 + $0x14] sm:$0xf]  ;;  %2838 = vmatprep.subr.bf16.mxu1 %v3423_v13 }
  0x81   : > { %v2957_v51 = vld [vmem:[#allocation3 + $0x5c] ss:$36 sps:$4 sm:$0xff]   ;;  %v811_v52 = vor.u32 %v810_v42, %v807_v41  ;;  %888 = vst [vmem:[#allocation3 + $0xa8] sm:$0x1] %v887_v47  ;;  %v890_v54 = vsel %vm3153_vm2, 0, %v889_v48  ;;  %v935_v56 = vshrl.u32 %v903_v50, 16  ;;  %2819 = vmatpush3.bf16.msra.mxu0 %v3443_v37 }
  0x82   : > { %v820_v53 = vor.u32 %v819_v45, %v816_v43  ;;  %v2960_v57 = vld [vmem:[#allocation3 + $0x58] ss:$36 sps:$4 sm:$0xff]   ;;  %891 = vst [vmem:[#allocation3 + $0xcc] sm:$0x1] %v890_v54  ;;  %v938_v55 = vshll.u32 %v903_v50, 16  ;;  %2091 = vmatprep.mubr.bf16.mxu0 %v2957_v51  ;;  %v3464_v4 = vld [vmem:[%s3566_s3 + $0x228] sm:$0xff]   ;;  %2820 = vmatprep.subr.bf16.mxu0 %v3459_v58 }
  0x83   : > { %v904_v59 = vld [vmem:[#allocation2 + $0x18] sm:$0xf]  ;;  %v812_v60 = vrot.slane %v811_v52, 4  ;;  %v860_v62 = vld [vmem:[#allocation3 + $0xa4] sm:$0xf]  ;;  %v937_v63 = vrot.slane %v935_v56, 7  ;;  %2092 = vmatmul.mubr.bf16.gmra.mrb[20].mxu0 %v2960_v57  ;;  %2846 = vmatpush3.bf16.msra.mxu1 %v3423_v13 }
  0x84   : > { %v821_v61 = vrot.slane %v820_v53, 4  ;;  %v942_v0 = vshrl.u32 %v904_v59, 16  ;;  %v863_v1 = vld [vmem:[#allocation3 + $0xc8] sm:$0xf]  ;;  %v945_v2 = vshll.u32 %v904_v59, 16  ;;  %2839 = vmatprep.subr.bf16.mxu1 %v3443_v37  ;;  %v3477_v18 = vld [vmem:[%s3566_s3 + $0x230] sm:$0xff]  }
  0x85   : > { %v988_v3 = vld [vmem:[#allocation2 + $0x14] sm:$0xf]  ;;  %v861_v5 = vsel %vm3204_vm10, %v812_v60, %v860_v62  ;;  %v940_v7 = vor.u32 %v938_v55, %v937_v63  ;;  %v989_v9 = vld [vmem:[#allocation2 + $0x18] sm:$0xf]  ;;  %v2961_v10 = vld [vmem:[#allocation3 + $0x64] ss:$36 sps:$4 sm:$0xff]   ;;  %2821 = vmatpush3.bf16.msra.mxu0 %v3459_v58 }
  0x86   : > { %v864_v6 = vsel %vm3204_vm10, %v821_v61, %v863_v1  ;;  %v944_v8 = vrot.slane %v942_v0, 7  ;;  %995 = vst [vmem:[#allocation3 + $0xac] sm:$0xf] %v988_v3  ;;  %v2963_v11 = vld [vmem:[#allocation3 + $0x60] ss:$36 sps:$4 sm:$0xff]   ;;  %2156 = vmatprep.mubr.bf16.mxu1 %v2961_v10  ;;  %2822 = vmatprep.subr.bf16.mxu0 %v3464_v4  ;;  %v3501_v45 = vld [vmem:[%s3566_s3 + $0x238] sm:$0xff]  }
  0x87   : > { %862 = vst [vmem:[#allocation3 + $0xa4] sm:$0xf] %v861_v5  ;;  %865 = vst [vmem:[#allocation3 + $0xc8] sm:$0xf] %v864_v6  ;;  %v726_v13 = vld [vmem:[#allocation2 + $0x18] sm:$0xf]  ;;  %2157 = vmatmul.mubr.bf16.gmra.mrb[20].mxu1 %v2963_v11 }
  0x88   : > { %996 = vst [vmem:[#allocation3 + $0xd0] sm:$0xf] %v989_v9  ;;  %v947_v12 = vor.u32 %v945_v2, %v944_v8  ;;  %v727_v14 = vld [vmem:[#allocation2 + $0x1c] sm:$0xf]  ;;  %v974_v15 = vld [vmem:[#allocation3 + $0xa8] sm:$0xf]  ;;  %2847 = vmatpush3.bf16.msra.mxu1 %v3443_v37 }
  0x89   : > { %734 = vst [vmem:[#allocation3 + $0xe8] sm:$0xf] %v726_v13  ;;  %735 = vst [vmem:[#allocation3 + $0x10c] sm:$0xf] %v727_v14  ;;  %v754_v16 = vld [vmem:[#allocation3 + $0xec] sm:$0x8]  ;;  %v975_v19 = vsel %vm3198_vm9, %v940_v7, %v974_v15  ;;  %2840 = vmatprep.subr.bf16.mxu1 %v3459_v58  ;;  %2823 = vmatpush3.bf16.msra.mxu0 %v3464_v4 }
  0x8a   : > { %v757_v17 = vld [vmem:[#allocation3 + $0x110] sm:$0x8]  ;;  %v977_v20 = vld [vmem:[#allocation3 + $0xcc] sm:$0xf]  ;;  %v755_v33 = vsel %vm3175_vm5, 0, %v754_v16  ;;  %2824 = vmatprep.subr.bf16.mxu0 %v3477_v18 }
  0x8b   : > { %v758_v21 = vsel %vm3175_vm5, 0, %v757_v17  ;;  %v766_v23 = vld [vmem:[#allocation2 + $0x18] sm:$0xf]  ;;  %976 = vst [vmem:[#allocation3 + $0xa8] sm:$0xf] %v975_v19  ;;  %v978_v24 = vsel %vm3198_vm9, %v947_v12, %v977_v20 }
  0x8c   : > { %756 = vst [vmem:[#allocation3 + $0xec] sm:$0x8] %v755_v33  ;;  %759 = vst [vmem:[#allocation3 + $0x110] sm:$0x8] %v758_v21  ;;  %v767_v25 = vld [vmem:[#allocation2 + $0x1c] sm:$0xf]  ;;  %2848 = vmatpush3.bf16.msra.mxu1 %v3459_v58 }
  0x8d   : > { %v823_v26 = vshrl.u32 %v766_v23, 16  ;;  %v826_v27 = vshll.u32 %v766_v23, 16  ;;  %979 = vst [vmem:[#allocation3 + $0xcc] sm:$0xf] %v978_v24  ;;  %v832_v29 = vshrl.u32 %v767_v25, 16  ;;  %v835_v30 = vshll.u32 %v767_v25, 16  ;;  %2841 = vmatprep.subr.bf16.mxu1 %v3464_v4  ;;  %2825 = vmatpush3.bf16.msra.mxu0 %v3477_v18 }
  0x8e   : > { %v892_v31 = vld [vmem:[#allocation3 + $0xf0] sm:$0x1]  ;;  %v895_v37 = vld [vmem:[#allocation3 + $0x114] sm:$0x1]  ;;  %v2965_v38 = vld [vmem:[#allocation3 + $0xa4] ss:$36 sps:$4 sm:$0xff]   ;;  %2826 = vmatprep.subr.bf16.mxu0 %v3501_v45 }
  0x8f   : > { %v825_v32 = vrot.slane %v823_v26, 4  ;;  %v828_v35 = vrot.slane %v826_v27, 5  ;;  %v893_v36 = vsel %vm3153_vm2, 0, %v892_v31  ;;  %v834_v34 = vrot.slane %v832_v29, 4  ;;  %v2968_v22 = vld [vmem:[#allocation3 + $0xa0] ss:$36 sps:$4 sm:$0xff]   ;;  %2099 = vmatprep.mubr.bf16.mxu0 %v2965_v38 }
  0x90   : > { %v837_v40 = vrot.slane %v835_v30, 5  ;;  %894 = vst [vmem:[#allocation3 + $0xf0] sm:$0x1] %v893_v36  ;;  %v896_v42 = vsel %vm3153_vm2, 0, %v895_v37  ;;  %v905_v43 = vld [vmem:[#allocation2 + $0x1c] sm:$0xf]  ;;  %2100 = vmatmul.mubr.bf16.gmra.mrb[24].mxu0 %v2968_v22  ;;  %2849 = vmatpush3.bf16.msra.mxu1 %v3464_v4 }
  0x91   : > { %v829_v41 = vor.u32 %v828_v35, %v825_v32  ;;  %897 = vst [vmem:[#allocation3 + $0x114] sm:$0x1] %v896_v42  ;;  %v949_v47 = vshrl.u32 %v905_v43, 16  ;;  %v990_v48 = vld [vmem:[#allocation2 + $0x1c] sm:$0xf]  ;;  %v952_v51 = vshll.u32 %v905_v43, 16  ;;  %2842 = vmatprep.subr.bf16.mxu1 %v3477_v18  ;;  %2827 = vmatpush3.bf16.msra.mxu0 %v3501_v45 }
  0x92   : > { %v838_v46 = vor.u32 %v837_v40, %v834_v34  ;;  %997 = vst [vmem:[#allocation3 + $0xf4] sm:$0xf] %v990_v48  ;;  %v999_v52 = vld [vmem:[#allocation3 + $0x20] sm:$0x8]  ;;  %v2969_v56 = vld [vmem:[#allocation3 + $0xac] ss:$36 sps:$4 sm:$0xff]  }
  0x93   : > { %v830_v50 = vrot.slane %v829_v41, 4  ;;  %v866_v53 = vld [vmem:[#allocation3 + $0xec] sm:$0xf]  ;;  %v869_v54 = vld [vmem:[#allocation3 + $0x110] sm:$0xf]  ;;  %v951_v59 = vrot.slane %v949_v47, 7  ;;  %2164 = vmatprep.mubr.bf16.mxu1 %v2969_v56 }
  0x94   : > { %v839_v39 = vrot.slane %v838_v46, 4  ;;  %v2971_v57 = vld [vmem:[#allocation3 + $0xa8] ss:$36 sps:$4 sm:$0xff]   ;;  %v1000_v60 = vsel %vm3175_vm5, 0, %v999_v52  ;;  %v1002_v61 = vld [vmem:[#allocation3 + $0x44] sm:$0x8]  ;;  %2850 = vmatpush3.bf16.msra.mxu1 %v3477_v18 }
  0x95   : > { %v867_v58 = vsel %vm3204_vm10, %v830_v50, %v866_v53  ;;  %v1023_v62 = vld [vmem:[#allocation2 + $0x4] sm:$0xf]  ;;  %v954_v63 = vor.u32 %v952_v51, %v951_v59  ;;  %1001 = vst [vmem:[#allocation3 + $0x20] sm:$0x8] %v1000_v60  ;;  %v1003_v1 = vsel %vm3175_vm5, 0, %v1002_v61  ;;  %2165 = vmatmul.mubr.bf16.gmra.mrb[24].mxu1 %v2971_v57  ;;  %2843 = vmatprep.subr.bf16.mxu1 %v3501_v45 }
  0x96   : > { %868 = vst [vmem:[#allocation3 + $0xec] sm:$0xf] %v867_v58  ;;  %v870_v55 = vsel %vm3204_vm10, %v839_v39, %v869_v54  ;;  %v1024_v2 = vld [vmem:[#allocation2 + $0x8] sm:$0xf]  ;;  %v1031_v3 = vshrl.u32 %v1023_v62, 16  ;;  %v1034_v4 = vshll.u32 %v1023_v62, 16 }
  0x97   : > { %871 = vst [vmem:[#allocation3 + $0x110] sm:$0xf] %v870_v55  ;;  %v980_v0 = vld [vmem:[#allocation3 + $0xf0] sm:$0xf]  ;;  %1004 = vst [vmem:[#allocation3 + $0x44] sm:$0x8] %v1003_v1 }
  0x98   : > { %v1040_v5 = vshrl.u32 %v1024_v2, 16  ;;  %v1043_v6 = vshll.u32 %v1024_v2, 16  ;;  %v1005_v7 = vld [vmem:[#allocation3 + $0x68] sm:$0x8]  ;;  %v981_v8 = vsel %vm3198_vm9, %v954_v63, %v980_v0  ;;  %v1033_v9 = vrot.slane %v1031_v3, 4  ;;  %2851 = vmatpush3.bf16.msra.mxu1 %v3501_v45 }
  0x99   : > { %v1006_v10 = vsel %vm3175_vm5, 0, %v1005_v7  ;;  %v1008_v11 = vld [vmem:[#allocation3 + $0x8c] sm:$0x8]  ;;  %982 = vst [vmem:[#allocation3 + $0xf0] sm:$0xf] %v981_v8  ;;  %v1036_v12 = vrot.slane %v1034_v4, 5 }
  0x9a   : > { %v1042_v13 = vrot.slane %v1040_v5, 4  ;;  %v1045_v14 = vrot.slane %v1043_v6, 5  ;;  %1007 = vst [vmem:[#allocation3 + $0x68] sm:$0x8] %v1006_v10  ;;  %v1009_v15 = vsel %vm3175_vm5, 0, %v1008_v11 }
  0x9b   : > { %v1025_v16 = vld [vmem:[#allocation2 + $0xc] sm:$0xf]  ;;  %1010 = vst [vmem:[#allocation3 + $0x8c] sm:$0x8] %v1009_v15  ;;  %v1026_v28 = vld [vmem:[#allocation2 + $0x10] sm:$0xf]  ;;  %v1037_v20 = vor.u32 %v1036_v12, %v1033_v9 }
  0x9c   : > { %v1049_v17 = vshrl.u32 %v1025_v16, 16  ;;  %v1052_v18 = vshll.u32 %v1025_v16, 16  ;;  %v1011_v19 = vld [vmem:[#allocation3 + $0xb0] sm:$0x8]  ;;  %v1046_v33 = vor.u32 %v1045_v14, %v1042_v13  ;;  %v1058_v21 = vshrl.u32 %v1026_v28, 16 }
  0x9d   : > { %v1061_v23 = vshll.u32 %v1026_v28, 16  ;;  %v1014_v24 = vld [vmem:[#allocation3 + $0xd4] sm:$0x8]  ;;  %v1012_v29 = vsel %vm3175_vm5, 0, %v1011_v19  ;;  %v2976_v32 = vld [vmem:[#allocation3 + $0xe8] ss:$36 sps:$4 sm:$0xff]  }
  0x9e   : > { %v1027_v25 = vld [vmem:[#allocation2 + $0x14] sm:$0xf]  ;;  %v1051_v26 = vrot.slane %v1049_v17, 4  ;;  %v1054_v27 = vrot.slane %v1052_v18, 5  ;;  %v1015_v30 = vsel %vm3175_vm5, 0, %v1014_v24  ;;  %v1038_v35 = vrot.slane %v1037_v20, 4 }
  0x9f   : > { %v2973_v31 = vld [vmem:[#allocation3 + $0xec] ss:$36 sps:$4 sm:$0xff]   ;;  %1013 = vst [vmem:[#allocation3 + $0xb0] sm:$0x8] %v1012_v29  ;;  %1016 = vst [vmem:[#allocation3 + $0xd4] sm:$0x8] %v1015_v30 }
  0xa0   : > { %v1047_v36 = vrot.slane %v1046_v33, 4  ;;  %v1100_v37 = vld [vmem:[#allocation3 + $0x20] sm:$0xf]  ;;  %v1103_v38 = vld [vmem:[#allocation3 + $0x44] sm:$0xf]  ;;  %v1055_v34 = vor.u32 %v1054_v27, %v1051_v26  ;;  %v1060_v40 = vrot.slane %v1058_v21, 4  ;;  %2107 = vmatprep.mubr.bf16.mxu0 %v2973_v31 }
  0xa1   : > { %v1101_v22 = vsel %vm3204_vm10, %v1038_v35, %v1100_v37  ;;  %v1063_v41 = vrot.slane %v1061_v23, 5  ;;  %v1028_v42 = vld [vmem:[#allocation2 + $0x18] sm:$0xf]  ;;  %v1067_v43 = vshrl.u32 %v1027_v25, 16  ;;  %v1070_v45 = vshll.u32 %v1027_v25, 16  ;;  %2108 = vmatmul.mubr.bf16.gmra.mrb[28].mxu0 %v2976_v32 }
  0xa2   : > { %v2977_v46 = vld [vmem:[#allocation3 + $0xf4] ss:$36 sps:$4 sm:$0xff]   ;;  %1102 = vst [vmem:[#allocation3 + $0x20] sm:$0xf] %v1101_v22  ;;  %v1104_v48 = vsel %vm3204_vm10, %v1047_v36, %v1103_v38  ;;  %v1056_v50 = vrot.slane %v1055_v34, 4  ;;  %v1076_v57 = vshrl.u32 %v1028_v42, 16 }
  0xa3   : > { %v2979_v47 = vld [vmem:[#allocation3 + $0xf0] ss:$36 sps:$4 sm:$0xff]   ;;  %1105 = vst [vmem:[#allocation3 + $0x44] sm:$0xf] %v1104_v48  ;;  %v1064_v51 = vor.u32 %v1063_v41, %v1060_v40  ;;  %v1106_v52 = vld [vmem:[#allocation3 + $0x68] sm:$0xf]  ;;  %2172 = vmatprep.mubr.bf16.mxu1 %v2977_v46 }
  0xa4   : > { %v1109_v39 = vld [vmem:[#allocation3 + $0x8c] sm:$0xf]  ;;  %v1069_v53 = vrot.slane %v1067_v43, 4  ;;  %v1072_v54 = vrot.slane %v1070_v45, 5  ;;  %v1107_v56 = vsel %vm3204_vm10, %v1056_v50, %v1106_v52  ;;  %v1079_v58 = vshll.u32 %v1028_v42, 16  ;;  %2173 = vmatmul.mubr.bf16.gmra.mrb[28].mxu1 %v2979_v47 }
  0xa5   : > { %v1017_v59 = vld [vmem:[#allocation3 + $0xf8] sm:$0x8]  ;;  %v1020_v55 = vld [vmem:[#allocation3 + $0x11c] sm:$0x8]  ;;  %v1065_v60 = vrot.slane %v1064_v51, 4  ;;  %v1078_v1 = vrot.slane %v1076_v57, 4 }
  0xa6   : > { %1108 = vst [vmem:[#allocation3 + $0x68] sm:$0xf] %v1107_v56  ;;  %v1073_v61 = vor.u32 %v1072_v54, %v1069_v53  ;;  %v1018_v62 = vsel %vm3175_vm5, 0, %v1017_v59  ;;  %v1021_v63 = vsel %vm3175_vm5, 0, %v1020_v55  ;;  %v1029_v0 = vld [vmem:[#allocation2 + $0x1c] sm:$0xf] }
  0xa7   : > { %v1081_v2 = vrot.slane %v1079_v58, 5  ;;  %v1112_v3 = vld [vmem:[#allocation3 + $0xb0] sm:$0xf]  ;;  %1019 = vst [vmem:[#allocation3 + $0xf8] sm:$0x8] %v1018_v62  ;;  %v1110_v4 = vsel %vm3204_vm10, %v1065_v60, %v1109_v39  ;;  %v1085_v6 = vshrl.u32 %v1029_v0, 16 }
  0xa8   : > { %1022 = vst [vmem:[#allocation3 + $0x11c] sm:$0x8] %v1021_v63  ;;  %v1074_v5 = vrot.slane %v1073_v61, 4  ;;  %v1088_v7 = vshll.u32 %v1029_v0, 16  ;;  %1111 = vst [vmem:[#allocation3 + $0x8c] sm:$0xf] %v1110_v4 }
  0xa9   : > { %v1082_v8 = vor.u32 %v1081_v2, %v1078_v1  ;;  %v1115_v10 = vld [vmem:[#allocation3 + $0xd4] sm:$0xf]  ;;  %v1087_v49 = vrot.slane %v1085_v6, 4 }
  0xaa   : > { %v1113_v9 = vsel %vm3204_vm10, %v1074_v5, %v1112_v3  ;;  %v1090_v11 = vrot.slane %v1088_v7, 5  ;;  %v2981_v12 = vld [vmem:[#allocation3 + $0x20] ss:$36 sps:$4 sm:$0xff]  }
  0xab   : > { %v1083_v13 = vrot.slane %v1082_v8, 4  ;;  %1114 = vst [vmem:[#allocation3 + $0xb0] sm:$0xf] %v1113_v9  ;;  %2828 = vmatprep.mubr.bf16.mxu0 %v2981_v12 }
  0xac   : > { %v1091_v14 = vor.u32 %v1090_v11, %v1087_v49 }
  0xad   : > { %v1116_v15 = vsel %vm3204_vm10, %v1083_v13, %v1115_v10 }
  0xae   : > { %1117 = vst [vmem:[#allocation3 + $0xd4] sm:$0xf] %v1116_v15  ;;  %v1092_v16 = vrot.slane %v1091_v14, 4  ;;  %v1118_v28 = vld [vmem:[#allocation3 + $0xf8] sm:$0xf] }
  0xaf   : > { %v2982_v17 = vld [vmem:[#allocation3 + $0x68] ss:$36 sps:$4 sm:$0xff]  }
  0xb0   : > { %v1119_v18 = vsel %vm3204_vm10, %v1092_v16, %v1118_v28  ;;  %2829 = vmatmul.mubr.bf16.vlgmr.msra.gmra.mrb[32].mxu0 %v2982_v17 }
  0xb1   : > { %1120 = vst [vmem:[#allocation3 + $0xf8] sm:$0xf] %v1119_v18 }
  0xb5   : > { %v2983_v19 = vld [vmem:[#allocation3 + $0xb0] ss:$36 sps:$4 sm:$0xff]  }
  0xb6   : > { %2832 = vmatprep.mubr.bf16.mxu1 %v2983_v19 }
  0xb8   : > { %v2984_v20 = vld [vmem:[#allocation3 + $0xf8] ss:$36 sps:$4 sm:$0xff]  }
  0xb9   : > { %2833 = vmatmul.mubr.bf16.vlgmr.msra.gmra.mrb[32].mxu1 %v2984_v20 }
 0x106   : > { %v2656_v33 = vpop.f32.mrb[0].mxu0 }
 0x107   : > { %v2657_v21 = vpop.f32.mrb[1].mxu0 }
 0x108   : > { %v2658_v23 = vadd.f32 %v2657_v21, %v2656_v33  ;;  %v2659_v24 = vpop.f32.mrb[2].mxu0 }
 0x109   : > { %v2660_v26 = vpop.f32.mrb[3].mxu0 }
 0x10a   : > { %v2696_v25 = vpop.f32.mrb[0].mxu1  ;;  %v2661_v29 = vadd.f32 %v2660_v26, %v2659_v24 }
 0x10b   : > { %v2697_v27 = vpop.f32.mrb[1].mxu1 }
 0x10c   : > { %v2698_v30 = vadd.f32 %v2697_v27, %v2696_v25  ;;  %v2699_v31 = vpop.f32.mrb[2].mxu1 }
 0x10d   : > { %v2700_v32 = vpop.f32.mrb[3].mxu1 }
 0x10e   : > { %v2021_v35 = vadd.f32 %v2698_v30, %v2658_v23  ;;  %v2701_v44 = vadd.f32 %v2700_v32, %v2699_v31 }
 0x110   : > { %v2024_v36 = vadd.f32 %v2701_v44, %v2661_v29 }
 0x112   : > { %v2662_v37 = vpop.f32.mrb[4].mxu0 }
 0x113   : > { %v2663_v38 = vpop.f32.mrb[5].mxu0 }
 0x114   : > { %v2664_v34 = vadd.f32 %v2663_v38, %v2662_v37  ;;  %v2665_v40 = vpop.f32.mrb[6].mxu0 }
 0x115   : > { %v2666_v22 = vpop.f32.mrb[7].mxu0 }
 0x116   : > { %v2667_v41 = vadd.f32 %v2666_v22, %v2665_v40  ;;  %v2702_v42 = vpop.f32.mrb[4].mxu1 }
 0x117   : > { %v2703_v43 = vpop.f32.mrb[5].mxu1 }
 0x118   : > { %v2704_v45 = vadd.f32 %v2703_v43, %v2702_v42  ;;  %v2705_v46 = vpop.f32.mrb[6].mxu1 }
 0x119   : > { %v2706_v47 = vpop.f32.mrb[7].mxu1 }
 0x11a   : > { %v2029_v48 = vadd.f32 %v2704_v45, %v2664_v34  ;;  %v2707_v50 = vadd.f32 %v2706_v47, %v2705_v46 }
 0x11c   : > { %v2032_v51 = vadd.f32 %v2707_v50, %v2667_v41 }
 0x12a   : > { %v2668_v52 = vpop.f32.mrb[8].mxu0 }
 0x12b   : > { %v2669_v39 = vpop.f32.mrb[9].mxu0 }
 0x12c   : > { %v2670_v53 = vadd.f32 %v2669_v39, %v2668_v52  ;;  %v2671_v54 = vpop.f32.mrb[10].mxu0 }
 0x12d   : > { %v2672_v57 = vpop.f32.mrb[11].mxu0 }
 0x12e   : > { %v2708_v56 = vpop.f32.mrb[8].mxu1  ;;  %v2673_v58 = vadd.f32 %v2672_v57, %v2671_v54 }
 0x12f   : > { %v2709_v59 = vpop.f32.mrb[9].mxu1 }
 0x130   : > { %v2710_v55 = vadd.f32 %v2709_v59, %v2708_v56  ;;  %v2711_v60 = vpop.f32.mrb[10].mxu1 }
 0x131   : > { %v2712_v61 = vpop.f32.mrb[11].mxu1 }
 0x132   : > { %v2037_v62 = vadd.f32 %v2710_v55, %v2670_v53  ;;  %v2713_v63 = vadd.f32 %v2712_v61, %v2711_v60 }
 0x134   : > { %v2040_v0 = vadd.f32 %v2713_v63, %v2673_v58 }
 0x139   : > { %v2674_v1 = vpop.f32.mrb[12].mxu0 }
 0x13a   : > { %v2675_v2 = vpop.f32.mrb[13].mxu0 }
 0x13b   : > { %v2676_v3 = vadd.f32 %v2675_v2, %v2674_v1  ;;  %v2677_v4 = vpop.f32.mrb[14].mxu0 }
 0x13c   : > { %v2678_v5 = vpop.f32.mrb[15].mxu0 }
 0x13d   : > { %v2679_v7 = vadd.f32 %v2678_v5, %v2677_v4 }
 0x13f   : > { %v2714_v6 = vpop.f32.mrb[12].mxu1 }
 0x140   : > { %v2715_v8 = vpop.f32.mrb[13].mxu1 }
 0x141   : > { %v2716_v9 = vadd.f32 %v2715_v8, %v2714_v6  ;;  %v2717_v10 = vpop.f32.mrb[14].mxu1 }
 0x142   : > { %v2718_v49 = vpop.f32.mrb[15].mxu1 }
 0x143   : > { %v2045_v11 = vadd.f32 %v2716_v9, %v2676_v3  ;;  %v2719_v12 = vadd.f32 %v2718_v49, %v2717_v10 }
 0x145   : > { %v2048_v13 = vadd.f32 %v2719_v12, %v2679_v7 }
 0x147   : > { %v2736_v14 = vpop.f32.mrb[16].mxu0 }
 0x148   : > { %v2737_v15 = vpop.f32.mrb[17].mxu0 }
 0x149   : > { %v2738_v16 = vadd.f32 %v2737_v15, %v2736_v14  ;;  %v2739_v28 = vpop.f32.mrb[18].mxu0 }
 0x14a   : > { %v2740_v17 = vpop.f32.mrb[19].mxu0 }
 0x14b   : > { %v2086_v18 = vadd.f32 %v2738_v16, %v2021_v35  ;;  %v2741_v19 = vadd.f32 %v2740_v17, %v2739_v28 }
 0x14d   : > { %v2776_v20 = vpop.f32.mrb[16].mxu1  ;;  %v2089_v33 = vadd.f32 %v2741_v19, %v2024_v36 }
 0x14e   : > { %v2777_v21 = vpop.f32.mrb[17].mxu1 }
 0x14f   : > { %v2778_v23 = vadd.f32 %v2777_v21, %v2776_v20  ;;  %v2779_v24 = vpop.f32.mrb[18].mxu1 }
 0x150   : > { %v2780_v25 = vpop.f32.mrb[19].mxu1 }
 0x151   : > { %v2781_v26 = vadd.f32 %v2780_v25, %v2779_v24  ;;  %v2151_v27 = vadd.f32 %v2778_v23, %v2086_v18 }
 0x153   : > { %v2154_v29 = vadd.f32 %v2781_v26, %v2089_v33 }
 0x156   : > { %v2742_v30 = vpop.f32.mrb[20].mxu0 }
 0x157   : > { %v2743_v31 = vpop.f32.mrb[21].mxu0 }
 0x158   : > { %v2744_v32 = vadd.f32 %v2743_v31, %v2742_v30  ;;  %v2745_v44 = vpop.f32.mrb[22].mxu0 }
 0x159   : > { %v2746_v37 = vpop.f32.mrb[23].mxu0 }
 0x15a   : > { %v2094_v38 = vadd.f32 %v2744_v32, %v2029_v48  ;;  %v2747_v34 = vadd.f32 %v2746_v37, %v2745_v44  ;;  %v2782_v40 = vpop.f32.mrb[20].mxu1 }
 0x15b   : > { %v2783_v35 = vpop.f32.mrb[21].mxu1 }
 0x15c   : > { %v2097_v22 = vadd.f32 %v2747_v34, %v2032_v51  ;;  %v2784_v41 = vadd.f32 %v2783_v35, %v2782_v40  ;;  %v2785_v42 = vpop.f32.mrb[22].mxu1 }
 0x15d   : > { %v2786_v36 = vpop.f32.mrb[23].mxu1 }
 0x15e   : > { %v2787_v43 = vadd.f32 %v2786_v36, %v2785_v42  ;;  %v2159_v45 = vadd.f32 %v2784_v41, %v2094_v38 }
 0x160   : > { %v2162_v46 = vadd.f32 %v2787_v43, %v2097_v22 }
 0x163   : > { %v2748_v47 = vpop.f32.mrb[24].mxu0 }
 0x164   : > { %v2749_v50 = vpop.f32.mrb[25].mxu0 }
 0x165   : > { %v2750_v52 = vadd.f32 %v2749_v50, %v2748_v47  ;;  %v2751_v39 = vpop.f32.mrb[26].mxu0 }
 0x166   : > { %v2752_v53 = vpop.f32.mrb[27].mxu0 }
 0x167   : > { %v2102_v54 = vadd.f32 %v2750_v52, %v2037_v62  ;;  %v2753_v56 = vadd.f32 %v2752_v53, %v2751_v39 }
 0x168   : > { %v2788_v57 = vpop.f32.mrb[24].mxu1 }
 0x169   : > { %v2105_v58 = vadd.f32 %v2753_v56, %v2040_v0  ;;  %v2789_v48 = vpop.f32.mrb[25].mxu1 }
 0x16a   : > { %v2790_v59 = vadd.f32 %v2789_v48, %v2788_v57  ;;  %v2791_v55 = vpop.f32.mrb[26].mxu1 }
 0x16b   : > { %v2792_v51 = vpop.f32.mrb[27].mxu1 }
 0x16c   : > { %v2793_v60 = vadd.f32 %v2792_v51, %v2791_v55  ;;  %v2167_v61 = vadd.f32 %v2790_v59, %v2102_v54 }
 0x16e   : > { %v2170_v63 = vadd.f32 %v2793_v60, %v2105_v58 }
 0x174   : > { %v2754_v1 = vpop.f32.mrb[28].mxu0 }
 0x175   : > { %v2755_v2 = vpop.f32.mrb[29].mxu0 }
 0x176   : > { %v2756_v3 = vadd.f32 %v2755_v2, %v2754_v1  ;;  %v2757_v4 = vpop.f32.mrb[30].mxu0 }
 0x177   : > { %v2794_v5 = vpop.f32.mrb[28].mxu1  ;;  %v2758_v6 = vpop.f32.mrb[31].mxu0 }
 0x178   : > { %v2110_v7 = vadd.f32 %v2756_v3, %v2045_v11  ;;  %v2759_v8 = vadd.f32 %v2758_v6, %v2757_v4  ;;  %v2795_v62 = vpop.f32.mrb[29].mxu1 }
 0x179   : > { %v2796_v9 = vadd.f32 %v2795_v62, %v2794_v5  ;;  %v2797_v10 = vpop.f32.mrb[30].mxu1 }
 0x17a   : > { %v2113_v0 = vadd.f32 %v2759_v8, %v2048_v13  ;;  %v2798_v49 = vpop.f32.mrb[31].mxu1 }
 0x17b   : > { %v2799_v12 = vadd.f32 %v2798_v49, %v2797_v10  ;;  %v2175_v14 = vadd.f32 %v2796_v9, %v2110_v7 }
 0x17d   : > { %v2178_v15 = vadd.f32 %v2799_v12, %v2113_v0 }
 0x183   : > { %v2830_v16 = vpop.f32.mrb[32].mxu0 }
 0x184   : > { %v2224_v28 = vadd.f32 %v2830_v16, %v2159_v45  ;;  %v2215_v17 = vpop.f32.mrb[33].mxu0 }
 0x185   : > { %v2216_v18 = vadd.f32 %v2215_v17, %v2151_v27  ;;  %v2831_v19 = vpop.f32.mrb[34].mxu0 }
 0x186   : > { %v2227_v20 = vadd.f32 %v2831_v19, %v2162_v46  ;;  %v2218_v11 = vpop.f32.mrb[35].mxu0 }
 0x187   : > { %v2219_v33 = vadd.f32 %v2218_v11, %v2154_v29 }
 0x188   : > { %v2619_v13 = vpack.c.bf16 %v2227_v20, %v2224_v28 }
 0x189   : > { %v2614_v21 = vpack.c.bf16 %v2219_v33, %v2216_v18  ;;  %v2286_v23 = vadd.f32 %v2219_v33, %v2216_v18 }
 0x18a   : > { %2637 = vst [vmem:[%s262_s9 + $0x8] sm:$0xff] %v2619_v13  }
 0x18b   : > { %2615 = vst [vmem:[%s262_s9] sm:$0xff] %v2614_v21   ;;  %v2287_v25 = vadd.f32 %v2286_v23, %v2224_v28 }
 0x18c   : > { %v2834_v24 = vpop.f32.mrb[32].mxu1 }
 0x18d   : > { %v2240_v26 = vadd.f32 %v2834_v24, %v2175_v14  ;;  %v2231_v30 = vpop.f32.mrb[33].mxu1  ;;  %v2288_v32 = vadd.f32 %v2287_v25, %v2227_v20 }
 0x18e   : > { %v2232_v31 = vadd.f32 %v2231_v30, %v2167_v61  ;;  %v2835_v27 = vpop.f32.mrb[34].mxu1 }
 0x18f   : > { %v2243_v44 = vadd.f32 %v2835_v27, %v2178_v15  ;;  %v2234_v37 = vpop.f32.mrb[35].mxu1 }
 0x190   : > { %v2289_v38 = vadd.f32 %v2288_v32, %v2232_v31  ;;  %v2235_v34 = vadd.f32 %v2234_v37, %v2170_v63 }
 0x191   : > { %v2629_v40 = vpack.c.bf16 %v2243_v44, %v2240_v26 }
 0x192   : > { %v2624_v22 = vpack.c.bf16 %v2235_v34, %v2232_v31  ;;  %v2290_v29 = vadd.f32 %v2289_v38, %v2235_v34 }
 0x193   : > { %2639 = vst [vmem:[%s262_s9 + $0x18] sm:$0xff] %v2629_v40  }
 0x194   : > { %2638 = vst [vmem:[%s262_s9 + $0x10] sm:$0xff] %v2624_v22   ;;  %v2291_v35 = vadd.f32 %v2290_v29, %v2240_v26 }
 0x196   : > { %v2292_v41 = vadd.f32 %v2291_v35, %v2243_v44 }
 0x198   : > { %v2293_v42 = vrot.slane %v2292_v41, 4 }
 0x19a   : > { %v2294_v36 = vadd.f32 %v2293_v42, %v2292_v41 }
 0x19c   : > { %v2295_v43 = vrot.slane %v2294_v36, 2 }
 0x19e   : > { %v2296_v45 = vadd.f32 %v2295_v43, %v2294_v36 }
 0x1a0   : > { %v2297_v46 = vrot.slane %v2296_v45, 1 }
 0x1a2   : > { %v2298_v47 = vadd.f32 %v2297_v46, %v2296_v45 }
 0x1a4   : > { %v2299_v50 = vmul.f32 0.015625, %v2298_v47 }
 0x1a6   : > { %v2300_v52 = vsub.f32 %v2216_v18, %v2299_v50  ;;  %v2301_v39 = vsub.f32 %v2219_v33, %v2299_v50  ;;  %v2302_v53 = vsub.f32 %v2224_v28, %v2299_v50  ;;  %v2303_v54 = vsub.f32 %v2227_v20, %v2299_v50  ;;  %2329 = vst [vmem:[%s266_s11] sm:$0x1] %v2299_v50 }
 0x1a7   : > { %v2304_v56 = vsub.f32 %v2232_v31, %v2299_v50  ;;  %v2305_v57 = vsub.f32 %v2235_v34, %v2299_v50  ;;  %v2306_v58 = vsub.f32 %v2240_v26, %v2299_v50  ;;  %v2307_v48 = vsub.f32 %v2243_v44, %v2299_v50 }
 0x1a8   : > { %v2308_v59 = vmul.f32 %v2300_v52, %v2300_v52  ;;  %v2309_v55 = vmul.f32 %v2301_v39, %v2301_v39  ;;  %v2310_v51 = vmul.f32 %v2302_v53, %v2302_v53  ;;  %v2311_v61 = vmul.f32 %v2303_v54, %v2303_v54 }
 0x1a9   : > { %v2312_v1 = vmul.f32 %v2304_v56, %v2304_v56  ;;  %v2313_v3 = vmul.f32 %v2305_v57, %v2305_v57  ;;  %v2314_v5 = vmul.f32 %v2306_v58, %v2306_v58  ;;  %v2315_v7 = vmul.f32 %v2307_v48, %v2307_v48 }
 0x1aa   : > { %v2316_v60 = vadd.f32 %v2309_v55, %v2308_v59 }
 0x1ac   : > { %v2317_v63 = vadd.f32 %v2316_v60, %v2310_v51 }
 0x1ae   : > { %v2318_v2 = vadd.f32 %v2317_v63, %v2311_v61 }
 0x1b0   : > { %v2319_v4 = vadd.f32 %v2318_v2, %v2312_v1 }
 0x1b2   : > { %v2320_v6 = vadd.f32 %v2319_v4, %v2313_v3 }
 0x1b4   : > { %v2321_v8 = vadd.f32 %v2320_v6, %v2314_v5 }
 0x1b6   : > { %v2322_v62 = vadd.f32 %v2321_v8, %v2315_v7 }
 0x1b8   : > { %v2323_v9 = vrot.slane %v2322_v62, 4 }
 0x1ba   : > { %v2324_v10 = vadd.f32 %v2323_v9, %v2322_v62 }
 0x1bc   : > { %v2325_v0 = vrot.slane %v2324_v10, 2 }
 0x1be   : > { %v2326_v49 = vadd.f32 %v2325_v0, %v2324_v10 }
 0x1c0   : > { %v2327_v12 = vrot.slane %v2326_v49, 1 }
 0x1c2   : > { %v2328_v14 = vadd.f32 %v2327_v12, %v2326_v49 }
 0x1c4   : > { %2330 = vst [vmem:[%s269_s14] sm:$0x1] %v2328_v14 }
 0x1c5 PF: > { %s17_s21 = sadd.s32 1, %s2991_s21  }
 0x1c6   : > { %p14_p5 = scmp.ge.s32.totalorder %s17_s21, 4  }
 0x1c8   :  { %16 = sbr.rel (!%p14_p5) target bundleno = 1 (0x1), region = 93 }

</bundles_post_ra>
